<compile_context>
chip_gen: v7x
topology: tpu7x:2x2x1
jax: 0.10.0
libtpu: 0.0.40
codegen_flags: <defaults>
</compile_context>

<pallas_src>
import functools

import jax
import jax.numpy as jnp
from jax import lax
from jax.experimental import pallas as pl
from jax.experimental.pallas import tpu as pltpu


def _full_spec(shape):
    n = len(shape)
    return pl.BlockSpec(shape, lambda i, _n=n: (0,) * _n)


# f32 slab row layout (width = d1 = 1024):
#   0: be1[:H]   1: be2[:E]   2: bl[:L]   3: b1[:1024]   4: b2[:512]
#   5: b3[:256]  6: b4[:3]    7..9: we1 rows (3, H)      10..12: w4ᵀ rows (3, 256)
#
# wenc (bf16, lanes = E = L = 64):  rows [0:H]       -> we2 (H, E)
#                                   rows [H:H+768]   -> wl  (768, L)
# whead (bf16, lanes = d2 = 512):   rows [0:d1]          -> w2 (d1, d2)
#                                   rows [d1:d1+d2//2]   -> [w3[:d2//2] | w3[d2//2:]]
def network_kernel(pc_ref, lang_ref, slab_ref, wenc_ref, w1_ref, whead_ref,
                   out_ref, *, batch, num_points, enc_hidden, emb_dim, lang_dim):
    f32 = jnp.float32
    bf16 = jnp.bfloat16
    d1 = w1_ref.shape[1]             # 1024
    d2 = whead_ref.shape[1]          # 512
    d3 = d2 // 2                     # 256
    kh = d2 // 2                     # K-split point of the w3 layer

    # ---- encoder_object stand-in: shared per-point MLP 3 -> H -> emb_dim ----
    x = pc_ref[...]                                              # (B*N, 3) f32
    # K=3 contraction as three broadcast FMAs on the VPU (keeps the MXU free),
    # all in f32 (v5e has no bf16 VPU).
    h = (slab_ref[0:1, 0:enc_hidden]                             # be1
         + x[:, 0:1] * slab_ref[7:8, 0:enc_hidden]
         + x[:, 1:2] * slab_ref[8:9, 0:enc_hidden]
         + x[:, 2:3] * slab_ref[9:10, 0:enc_hidden])             # (B*N, H)
    h = jnp.maximum(h, 0.0)

    # bf16 x bf16 MXU dot, f32 accumulation; cast only the small activation.
    emb = (jnp.dot(h.astype(bf16), wenc_ref[0:enc_hidden, :],
                   preferred_element_type=f32)
           + slab_ref[1:2, 0:emb_dim])                           # (B*N, E) f32
    # object_embedding.detach() is a no-op in the forward pass.

    # ---- AdaptiveMaxPool1d(1) over the point axis, per batch, no reshape ----
    pooled = [jnp.max(emb[b * num_points:(b + 1) * num_points, :],
                      axis=0, keepdims=True)
              for b in range(batch)]                             # B static & tiny
    g = jnp.concatenate(pooled, axis=0)                          # (B, E) f32

    # ---- language_fc: (B, 768) -> (B, L) ------------------------------------
    lang = (jnp.dot(lang_ref[...].astype(bf16),
                    wenc_ref[enc_hidden:enc_hidden + 768, :],
                    preferred_element_type=f32)
            + slab_ref[2:3, 0:lang_dim])                         # (B, L) f32

    # ---- fusion: lane-concat g||lang, ONE K = E+L dot + pose-predictor MLP ---
    fused = jnp.concatenate([g, lang], axis=1).astype(bf16)      # (B, E+L)
    y = jnp.maximum(
        jnp.dot(fused, w1_ref[...], preferred_element_type=f32)
        + slab_ref[3:4, 0:d1], 0.0)                              # (B, d1)
    y = jnp.maximum(
        jnp.dot(y.astype(bf16), whead_ref[0:d1, :], preferred_element_type=f32)
        + slab_ref[4:5, 0:d2], 0.0)                              # (B, d2)
    # w3 is stored K-split side-by-side in the head slab (zero padding bytes).
    yb = y.astype(bf16)
    y = jnp.maximum(
        jnp.dot(yb[:, 0:kh], whead_ref[d1:d1 + kh, 0:d3],
                preferred_element_type=f32)
        + jnp.dot(yb[:, kh:d2], whead_ref[d1:d1 + kh, d3:2 * d3],
                  preferred_element_type=f32)
        + slab_ref[5:6, 0:d3], 0.0)                              # (B, d3) f32

    # ---- final d3 -> 3 layer on the VPU/XLU, lane-dense (B, 128) output ------
    lane = lax.broadcasted_iota(jnp.int32, (batch, 128), 1)
    out = slab_ref[6:7, 0:128]                                   # b4, zero padded
    for j in range(3):
        w4j = slab_ref[10 + j:11 + j, 0:d3]                      # (1, d3)
        col = jnp.sum(y * w4j, axis=1, keepdims=True)            # (B, 1)
        out = out + jnp.where(lane == j, col, 0.0)               # (B, 128)
    out_ref[...] = out


def forward_pallas(object_pc, clip_language_emb, packed, *,
                   enc_hidden, emb_dim, lang_dim):
    B, N, C = object_pc.shape
    slab, wenc, w1, whead = packed
    d1 = w1.shape[1]
    d2 = whead.shape[1]
    # Config sanity checks (so a config change can't silently read zero-padded
    # slab columns or break sublane / lane alignment).
    assert C == 3
    assert N % 8 == 0, "num_points must be a multiple of 8 (sublane-aligned pooling)"
    assert B % 8 == 0, "batch must be a multiple of 8 (unmasked (B,128) output store)"
    assert slab.shape == (16, d1)
    assert max(enc_hidden, emb_dim, lang_dim, d2) <= d1
    assert emb_dim + lang_dim == w1.shape[0]
    assert emb_dim == lang_dim == wenc.shape[1]
    assert wenc.shape[0] == enc_hidden + clip_language_emb.shape[1]
    assert whead.shape[0] == d1 + d2 // 2

    pc_flat = object_pc.reshape(B * N, 3)            # glue reshape in plain JAX
    inputs = (pc_flat, clip_language_emb, slab, wenc, w1, whead)
    kernel = functools.partial(network_kernel, batch=B, num_points=N,
                               enc_hidden=enc_hidden, emb_dim=emb_dim,
                               lang_dim=lang_dim)
    out_pad = pl.pallas_call(
        kernel,
        grid=(1,),
        in_specs=[_full_spec(a.shape) for a in inputs],
        out_specs=_full_spec((B, 128)),
        out_shape=jax.ShapeDtypeStruct((B, 128), jnp.float32),
        compiler_params=pltpu.CompilerParams(dimension_semantics=("arbitrary",)),
    )(*inputs)
    return out_pad[:, :3]                            # drop the lane padding


def init_params(key, emb_dim, language_dim, encoder_hidden):
    """Deterministic synthetic f32 parameters (shapes follow the module)."""
    fusion_dim = emb_dim + language_dim
    keys = jax.random.split(key, 16)

    def uniform_w(k, fan_in, fan_out, xavier=False):
        lim = ((6.0 / (fan_in + fan_out)) if xavier else (1.0 / fan_in)) ** 0.5
        return jax.random.uniform(k, (fan_in, fan_out), jnp.float32, -lim, lim)

    def uniform_b(k, fan_in, n):
        lim = (1.0 / fan_in) ** 0.5
        return jax.random.uniform(k, (n,), jnp.float32, -lim, lim)

    return dict(
        # encoder_object stand-in: shared per-point MLP 3 -> H -> emb_dim
        we1=uniform_w(keys[0], 3, encoder_hidden),
        be1=uniform_b(keys[1], 3, encoder_hidden),
        we2=uniform_w(keys[2], encoder_hidden, emb_dim),
        be2=uniform_b(keys[3], encoder_hidden, emb_dim),
        # language_fc: xavier_uniform_ weight, zero bias (as in the module)
        wl=uniform_w(keys[4], 768, language_dim, xavier=True),
        bl=jnp.zeros((language_dim,), jnp.float32),
        # fused head: fusion_dim -> 1024 -> 512 -> 256 -> 3
        w1=uniform_w(keys[5], fusion_dim, 1024),
        b1=uniform_b(keys[6], fusion_dim, 1024),
        w2=uniform_w(keys[7], 1024, 512),
        b2=uniform_b(keys[8], 1024, 512),
        w3=uniform_w(keys[9], 512, 256),
        b3=uniform_b(keys[10], 512, 256),
        w4=uniform_w(keys[11], 256, 3),
        b4=uniform_b(keys[12], 256, 3),
    )


def pack_params(p, emb_dim, language_dim, encoder_hidden):
    """Pack small operands into one f32 slab and the bf16 weights into 3 slabs."""
    d1, d2, d3 = p["w1"].shape[1], p["w2"].shape[1], p["w3"].shape[1]
    assert emb_dim == language_dim, "we2/wl share one 64-lane bf16 slab"
    assert 2 * d3 == d2, "w3 is packed K-split side-by-side in the head slab"

    slab = jnp.zeros((16, d1), jnp.float32)
    slab = slab.at[0, :encoder_hidden].set(p["be1"])
    slab = slab.at[1, :emb_dim].set(p["be2"])
    slab = slab.at[2, :language_dim].set(p["bl"])
    slab = slab.at[3, :d1].set(p["b1"])
    slab = slab.at[4, :d2].set(p["b2"])
    slab = slab.at[5, :d3].set(p["b3"])
    slab = slab.at[6, :3].set(p["b4"])
    slab = slab.at[7:10, :encoder_hidden].set(p["we1"])
    slab = slab.at[10:13, :d3].set(p["w4"].T)

    # bf16 slab #1: encoder output weight stacked over language_fc weight.
    wenc = jnp.concatenate([p["we2"], p["wl"]], axis=0).astype(jnp.bfloat16)
    # bf16 slab #2: w1 alone (lane width d1).
    w1 = p["w1"].astype(jnp.bfloat16)
    # bf16 slab #3: w2 with w3 split along K and packed side-by-side (no pad bytes).
    w3_packed = jnp.concatenate([p["w3"][:d2 // 2], p["w3"][d2 // 2:]], axis=1)
    whead = jnp.concatenate([p["w2"], w3_packed], axis=0).astype(jnp.bfloat16)
    return (slab, wenc, w1, whead)


def forward_ref(object_pc, lang_emb, p):
    """Pure-JAX reference using the same bf16 weight storage as the kernel."""
    bf = lambda w: w.astype(jnp.bfloat16).astype(jnp.float32)
    B, N, _ = object_pc.shape
    x = object_pc.reshape(B * N, 3)
    h = jnp.maximum(x @ p["we1"] + p["be1"], 0.0)
    emb = h @ bf(p["we2"]) + p["be2"]
    g = jnp.max(emb.reshape(B, N, -1), axis=1)
    lang = lang_emb @ bf(p["wl"]) + p["bl"]
    fused = jnp.concatenate([g, lang], axis=-1)
    y = jnp.maximum(fused @ bf(p["w1"]) + p["b1"], 0.0)
    y = jnp.maximum(y @ bf(p["w2"]) + p["b2"], 0.0)
    y = jnp.maximum(y @ bf(p["w3"]) + p["b3"], 0.0)
    return y @ p["w4"] + p["b4"]


if __name__ == "__main__":
    B, N = 8, 64                              # batch (multiple of 8), points
    emb_dim, language_dim, hidden = 64, 64, 64

    key = jax.random.PRNGKey(0)
    k_pc, k_lang, k_par = jax.random.split(key, 3)
    object_pc = jax.random.normal(k_pc, (B, N, 3), jnp.float32)
    clip_language_emb = jax.random.normal(k_lang, (B, 768), jnp.float32)

    raw = init_params(k_par, emb_dim, language_dim, hidden)
    packed = pack_params(raw, emb_dim, language_dim, hidden)

    pose = forward_pallas(object_pc, clip_language_emb, packed,
                          enc_hidden=hidden, emb_dim=emb_dim,
                          lang_dim=language_dim)
    pose = jax.block_until_ready(pose)
    assert pose.shape == (B, 3) and pose.dtype == jnp.float32

    ref = forward_ref(object_pc, clip_language_emb, raw)
    assert jnp.allclose(pose, ref, rtol=5e-2, atol=5e-2), (pose, ref)
    print("KERNEL_OK")
</pallas_src>

<mosaic_0001>
module attributes {stable_mosaic.version = 11 : i64} {
  func.func @network_kernel(%arg0: i32, %arg1: memref<512x3xf32, #tpu.memory_space<vmem>>, %arg2: memref<8x768xf32, #tpu.memory_space<vmem>>, %arg3: memref<16x1024xf32, #tpu.memory_space<vmem>>, %arg4: memref<832x64xbf16, #tpu.memory_space<vmem>>, %arg5: memref<128x1024xbf16, #tpu.memory_space<vmem>>, %arg6: memref<1280x512xbf16, #tpu.memory_space<vmem>>, %arg7: memref<8x128xf32, #tpu.memory_space<vmem>>) attributes {dimension_semantics = [#tpu.dimension_semantics<arbitrary>], iteration_bounds = array<i64: 1>, scalar_prefetch = 0 : i64, scratch_operands = 0 : i64, tpu.core_type = #tpu.core_type<tc>, window_params = [{pipeline_mode = #tpu.pipeline_mode<synchronous>, transform_indices = @transform_0, window_bounds = array<i64: 512, 3>}, {pipeline_mode = #tpu.pipeline_mode<synchronous>, transform_indices = @transform_1, window_bounds = array<i64: 8, 768>}, {pipeline_mode = #tpu.pipeline_mode<synchronous>, transform_indices = @transform_2, window_bounds = array<i64: 16, 1024>}, {pipeline_mode = #tpu.pipeline_mode<synchronous>, transform_indices = @transform_3, window_bounds = array<i64: 832, 64>}, {pipeline_mode = #tpu.pipeline_mode<synchronous>, transform_indices = @transform_4, window_bounds = array<i64: 128, 1024>}, {pipeline_mode = #tpu.pipeline_mode<synchronous>, transform_indices = @transform_5, window_bounds = array<i64: 1280, 512>}, {pipeline_mode = #tpu.pipeline_mode<synchronous>, transform_indices = @transform_6, window_bounds = array<i64: 8, 128>}]} {
    %c0 = arith.constant 0 : index
    %c0_0 = arith.constant 0 : index
    %0 = vector.load %arg1[%c0, %c0_0] : memref<512x3xf32, #tpu.memory_space<vmem>>, vector<512x3xf32>
    %c0_1 = arith.constant 0 : index
    %c0_2 = arith.constant 0 : index
    %1 = vector.load %arg3[%c0_1, %c0_2] : memref<16x1024xf32, #tpu.memory_space<vmem>>, vector<1x64xf32>
    %2 = vector.extract_strided_slice %0 {offsets = [0, 0], sizes = [512, 1], strides = [1, 1]} : vector<512x3xf32> to vector<512x1xf32>
    %c7 = arith.constant 7 : index
    %c0_3 = arith.constant 0 : index
    %3 = vector.load %arg3[%c7, %c0_3] : memref<16x1024xf32, #tpu.memory_space<vmem>>, vector<1x64xf32>
    %4 = vector.broadcast %2 : vector<512x1xf32> to vector<512x64xf32>
    %5 = vector.broadcast %3 : vector<1x64xf32> to vector<512x64xf32>
    %6 = arith.mulf %4, %5 : vector<512x64xf32>
    %7 = vector.broadcast %1 : vector<1x64xf32> to vector<512x64xf32>
    %8 = arith.addf %7, %6 : vector<512x64xf32>
    %9 = vector.extract_strided_slice %0 {offsets = [0, 1], sizes = [512, 1], strides = [1, 1]} : vector<512x3xf32> to vector<512x1xf32>
    %c8 = arith.constant 8 : index
    %c0_4 = arith.constant 0 : index
    %10 = vector.load %arg3[%c8, %c0_4] : memref<16x1024xf32, #tpu.memory_space<vmem>>, vector<1x64xf32>
    %11 = vector.broadcast %9 : vector<512x1xf32> to vector<512x64xf32>
    %12 = vector.broadcast %10 : vector<1x64xf32> to vector<512x64xf32>
    %13 = arith.mulf %11, %12 : vector<512x64xf32>
    %14 = arith.addf %8, %13 : vector<512x64xf32>
    %15 = vector.extract_strided_slice %0 {offsets = [0, 2], sizes = [512, 1], strides = [1, 1]} : vector<512x3xf32> to vector<512x1xf32>
    %c9 = arith.constant 9 : index
    %c0_5 = arith.constant 0 : index
    %16 = vector.load %arg3[%c9, %c0_5] : memref<16x1024xf32, #tpu.memory_space<vmem>>, vector<1x64xf32>
    %17 = vector.broadcast %15 : vector<512x1xf32> to vector<512x64xf32>
    %18 = vector.broadcast %16 : vector<1x64xf32> to vector<512x64xf32>
    %19 = arith.mulf %17, %18 : vector<512x64xf32>
    %20 = arith.addf %14, %19 : vector<512x64xf32>
    %cst = arith.constant 0.000000e+00 : f32
    %21 = vector.broadcast %cst : f32 to vector<512x64xf32>
    %22 = arith.maximumf %20, %21 : vector<512x64xf32>
    %23 = arith.truncf %22 : vector<512x64xf32> to vector<512x64xbf16>
    %c0_6 = arith.constant 0 : index
    %c0_7 = arith.constant 0 : index
    %24 = vector.load %arg4[%c0_6, %c0_7] : memref<832x64xbf16, #tpu.memory_space<vmem>>, vector<64x64xbf16>
    %cst_8 = arith.constant dense<0.000000e+00> : vector<512x64xf32>
    %25 = tpu.matmul %23, %24, %cst_8 {dimension_numbers = #tpu.dot_dimension_numbers<[1], [0], [0], [1], [0, 0, 1, 1], [], []>} : vector<512x64xbf16>, vector<64x64xbf16>, vector<512x64xf32> -> vector<512x64xf32>
    %c1 = arith.constant 1 : index
    %c0_9 = arith.constant 0 : index
    %26 = vector.load %arg3[%c1, %c0_9] : memref<16x1024xf32, #tpu.memory_space<vmem>>, vector<1x64xf32>
    %27 = vector.broadcast %26 : vector<1x64xf32> to vector<512x64xf32>
    %28 = arith.addf %25, %27 : vector<512x64xf32>
    %29 = vector.extract_strided_slice %28 {offsets = [0, 0], sizes = [64, 64], strides = [1, 1]} : vector<512x64xf32> to vector<64x64xf32>
    %cst_10 = arith.constant dense<0xFF800000> : vector<64xf32>
    %30 = vector.multi_reduction <maximumf>, %29, %cst_10 [0] : vector<64x64xf32> to vector<64xf32>
    %31 = vector.shape_cast %30 : vector<64xf32> to vector<1x64xf32>
    %32 = vector.extract_strided_slice %28 {offsets = [64, 0], sizes = [64, 64], strides = [1, 1]} : vector<512x64xf32> to vector<64x64xf32>
    %cst_11 = arith.constant dense<0xFF800000> : vector<64xf32>
    %33 = vector.multi_reduction <maximumf>, %32, %cst_11 [0] : vector<64x64xf32> to vector<64xf32>
    %34 = vector.shape_cast %33 : vector<64xf32> to vector<1x64xf32>
    %35 = vector.extract_strided_slice %28 {offsets = [128, 0], sizes = [64, 64], strides = [1, 1]} : vector<512x64xf32> to vector<64x64xf32>
    %cst_12 = arith.constant dense<0xFF800000> : vector<64xf32>
    %36 = vector.multi_reduction <maximumf>, %35, %cst_12 [0] : vector<64x64xf32> to vector<64xf32>
    %37 = vector.shape_cast %36 : vector<64xf32> to vector<1x64xf32>
    %38 = vector.extract_strided_slice %28 {offsets = [192, 0], sizes = [64, 64], strides = [1, 1]} : vector<512x64xf32> to vector<64x64xf32>
    %cst_13 = arith.constant dense<0xFF800000> : vector<64xf32>
    %39 = vector.multi_reduction <maximumf>, %38, %cst_13 [0] : vector<64x64xf32> to vector<64xf32>
    %40 = vector.shape_cast %39 : vector<64xf32> to vector<1x64xf32>
    %41 = vector.extract_strided_slice %28 {offsets = [256, 0], sizes = [64, 64], strides = [1, 1]} : vector<512x64xf32> to vector<64x64xf32>
    %cst_14 = arith.constant dense<0xFF800000> : vector<64xf32>
    %42 = vector.multi_reduction <maximumf>, %41, %cst_14 [0] : vector<64x64xf32> to vector<64xf32>
    %43 = vector.shape_cast %42 : vector<64xf32> to vector<1x64xf32>
    %44 = vector.extract_strided_slice %28 {offsets = [320, 0], sizes = [64, 64], strides = [1, 1]} : vector<512x64xf32> to vector<64x64xf32>
    %cst_15 = arith.constant dense<0xFF800000> : vector<64xf32>
    %45 = vector.multi_reduction <maximumf>, %44, %cst_15 [0] : vector<64x64xf32> to vector<64xf32>
    %46 = vector.shape_cast %45 : vector<64xf32> to vector<1x64xf32>
    %47 = vector.extract_strided_slice %28 {offsets = [384, 0], sizes = [64, 64], strides = [1, 1]} : vector<512x64xf32> to vector<64x64xf32>
    %cst_16 = arith.constant dense<0xFF800000> : vector<64xf32>
    %48 = vector.multi_reduction <maximumf>, %47, %cst_16 [0] : vector<64x64xf32> to vector<64xf32>
    %49 = vector.shape_cast %48 : vector<64xf32> to vector<1x64xf32>
    %50 = vector.extract_strided_slice %28 {offsets = [448, 0], sizes = [64, 64], strides = [1, 1]} : vector<512x64xf32> to vector<64x64xf32>
    %cst_17 = arith.constant dense<0xFF800000> : vector<64xf32>
    %51 = vector.multi_reduction <maximumf>, %50, %cst_17 [0] : vector<64x64xf32> to vector<64xf32>
    %52 = vector.shape_cast %51 : vector<64xf32> to vector<1x64xf32>
    %53 = tpu.concatenate %31, %34, %37, %40, %43, %46, %49, %52 in 0 : vector<1x64xf32>, vector<1x64xf32>, vector<1x64xf32>, vector<1x64xf32>, vector<1x64xf32>, vector<1x64xf32>, vector<1x64xf32>, vector<1x64xf32> -> vector<8x64xf32>
    %c0_18 = arith.constant 0 : index
    %c0_19 = arith.constant 0 : index
    %54 = vector.load %arg2[%c0_18, %c0_19] : memref<8x768xf32, #tpu.memory_space<vmem>>, vector<8x768xf32>
    %55 = arith.truncf %54 : vector<8x768xf32> to vector<8x768xbf16>
    %c64 = arith.constant 64 : index
    %c0_20 = arith.constant 0 : index
    %56 = vector.load %arg4[%c64, %c0_20] : memref<832x64xbf16, #tpu.memory_space<vmem>>, vector<768x64xbf16>
    %cst_21 = arith.constant dense<0.000000e+00> : vector<8x64xf32>
    %57 = tpu.matmul %55, %56, %cst_21 {dimension_numbers = #tpu.dot_dimension_numbers<[1], [0], [0], [1], [0, 0, 1, 1], [], []>} : vector<8x768xbf16>, vector<768x64xbf16>, vector<8x64xf32> -> vector<8x64xf32>
    %c2 = arith.constant 2 : index
    %c0_22 = arith.constant 0 : index
    %58 = vector.load %arg3[%c2, %c0_22] : memref<16x1024xf32, #tpu.memory_space<vmem>>, vector<1x64xf32>
    %59 = vector.broadcast %58 : vector<1x64xf32> to vector<8x64xf32>
    %60 = arith.addf %57, %59 : vector<8x64xf32>
    %61 = tpu.concatenate %53, %60 in 1 : vector<8x64xf32>, vector<8x64xf32> -> vector<8x128xf32>
    %62 = arith.truncf %61 : vector<8x128xf32> to vector<8x128xbf16>
    %c0_23 = arith.constant 0 : index
    %c0_24 = arith.constant 0 : index
    %63 = vector.load %arg5[%c0_23, %c0_24] : memref<128x1024xbf16, #tpu.memory_space<vmem>>, vector<128x1024xbf16>
    %cst_25 = arith.constant dense<0.000000e+00> : vector<8x1024xf32>
    %64 = tpu.matmul %62, %63, %cst_25 {dimension_numbers = #tpu.dot_dimension_numbers<[1], [0], [0], [1], [0, 0, 1, 1], [], []>} : vector<8x128xbf16>, vector<128x1024xbf16>, vector<8x1024xf32> -> vector<8x1024xf32>
    %c3 = arith.constant 3 : index
    %c0_26 = arith.constant 0 : index
    %65 = vector.load %arg3[%c3, %c0_26] : memref<16x1024xf32, #tpu.memory_space<vmem>>, vector<1x1024xf32>
    %66 = vector.broadcast %65 : vector<1x1024xf32> to vector<8x1024xf32>
    %67 = arith.addf %64, %66 : vector<8x1024xf32>
    %cst_27 = arith.constant 0.000000e+00 : f32
    %68 = vector.broadcast %cst_27 : f32 to vector<8x1024xf32>
    %69 = arith.maximumf %67, %68 : vector<8x1024xf32>
    %70 = arith.truncf %69 : vector<8x1024xf32> to vector<8x1024xbf16>
    %c0_28 = arith.constant 0 : index
    %c0_29 = arith.constant 0 : index
    %71 = vector.load %arg6[%c0_28, %c0_29] : memref<1280x512xbf16, #tpu.memory_space<vmem>>, vector<1024x512xbf16>
    %cst_30 = arith.constant dense<0.000000e+00> : vector<8x512xf32>
    %72 = tpu.matmul %70, %71, %cst_30 {dimension_numbers = #tpu.dot_dimension_numbers<[1], [0], [0], [1], [0, 0, 1, 1], [], []>} : vector<8x1024xbf16>, vector<1024x512xbf16>, vector<8x512xf32> -> vector<8x512xf32>
    %c4 = arith.constant 4 : index
    %c0_31 = arith.constant 0 : index
    %73 = vector.load %arg3[%c4, %c0_31] : memref<16x1024xf32, #tpu.memory_space<vmem>>, vector<1x512xf32>
    %74 = vector.broadcast %73 : vector<1x512xf32> to vector<8x512xf32>
    %75 = arith.addf %72, %74 : vector<8x512xf32>
    %cst_32 = arith.constant 0.000000e+00 : f32
    %76 = vector.broadcast %cst_32 : f32 to vector<8x512xf32>
    %77 = arith.maximumf %75, %76 : vector<8x512xf32>
    %78 = arith.truncf %77 : vector<8x512xf32> to vector<8x512xbf16>
    %79 = vector.extract_strided_slice %78 {offsets = [0, 0], sizes = [8, 256], strides = [1, 1]} : vector<8x512xbf16> to vector<8x256xbf16>
    %c1024 = arith.constant 1024 : index
    %c0_33 = arith.constant 0 : index
    %80 = vector.load %arg6[%c1024, %c0_33] : memref<1280x512xbf16, #tpu.memory_space<vmem>>, vector<256x256xbf16>
    %cst_34 = arith.constant dense<0.000000e+00> : vector<8x256xf32>
    %81 = tpu.matmul %79, %80, %cst_34 {dimension_numbers = #tpu.dot_dimension_numbers<[1], [0], [0], [1], [0, 0, 1, 1], [], []>} : vector<8x256xbf16>, vector<256x256xbf16>, vector<8x256xf32> -> vector<8x256xf32>
    %82 = vector.extract_strided_slice %78 {offsets = [0, 256], sizes = [8, 256], strides = [1, 1]} : vector<8x512xbf16> to vector<8x256xbf16>
    %c1024_35 = arith.constant 1024 : index
    %c256 = arith.constant 256 : index
    %83 = vector.load %arg6[%c1024_35, %c256] : memref<1280x512xbf16, #tpu.memory_space<vmem>>, vector<256x256xbf16>
    %cst_36 = arith.constant dense<0.000000e+00> : vector<8x256xf32>
    %84 = tpu.matmul %82, %83, %cst_36 {dimension_numbers = #tpu.dot_dimension_numbers<[1], [0], [0], [1], [0, 0, 1, 1], [], []>} : vector<8x256xbf16>, vector<256x256xbf16>, vector<8x256xf32> -> vector<8x256xf32>
    %85 = arith.addf %81, %84 : vector<8x256xf32>
    %c5 = arith.constant 5 : index
    %c0_37 = arith.constant 0 : index
    %86 = vector.load %arg3[%c5, %c0_37] : memref<16x1024xf32, #tpu.memory_space<vmem>>, vector<1x256xf32>
    %87 = vector.broadcast %86 : vector<1x256xf32> to vector<8x256xf32>
    %88 = arith.addf %85, %87 : vector<8x256xf32>
    %cst_38 = arith.constant 0.000000e+00 : f32
    %89 = vector.broadcast %cst_38 : f32 to vector<8x256xf32>
    %90 = arith.maximumf %88, %89 : vector<8x256xf32>
    %91 = tpu.iota {dimensions = array<i32: 1>} : vector<8x128xi32>
    %c6 = arith.constant 6 : index
    %c0_39 = arith.constant 0 : index
    %92 = vector.load %arg3[%c6, %c0_39] : memref<16x1024xf32, #tpu.memory_space<vmem>>, vector<1x128xf32>
    %c10 = arith.constant 10 : index
    %c0_40 = arith.constant 0 : index
    %93 = vector.load %arg3[%c10, %c0_40] : memref<16x1024xf32, #tpu.memory_space<vmem>>, vector<1x256xf32>
    %94 = vector.broadcast %93 : vector<1x256xf32> to vector<8x256xf32>
    %95 = arith.mulf %90, %94 : vector<8x256xf32>
    %cst_41 = arith.constant dense<0.000000e+00> : vector<8xf32>
    %96 = vector.multi_reduction <add>, %95, %cst_41 [1] : vector<8x256xf32> to vector<8xf32>
    %97 = vector.shape_cast %96 : vector<8xf32> to vector<8x1xf32>
    %c0_i32 = arith.constant 0 : i32
    %98 = vector.broadcast %c0_i32 : i32 to vector<8x128xi32>
    %99 = arith.cmpi eq, %91, %98 : vector<8x128xi32>
    %cst_42 = arith.constant 0.000000e+00 : f32
    %100 = vector.shape_cast %97 : vector<8x1xf32> to vector<8x1xf32>
    %101 = vector.broadcast %100 : vector<8x1xf32> to vector<8x128xf32>
    %102 = vector.broadcast %cst_42 : f32 to vector<8x128xf32>
    %103 = arith.select %99, %101, %102 : vector<8x128xi1>, vector<8x128xf32>
    %104 = vector.broadcast %92 : vector<1x128xf32> to vector<8x128xf32>
    %105 = arith.addf %104, %103 : vector<8x128xf32>
    %c11 = arith.constant 11 : index
    %c0_43 = arith.constant 0 : index
    %106 = vector.load %arg3[%c11, %c0_43] : memref<16x1024xf32, #tpu.memory_space<vmem>>, vector<1x256xf32>
    %107 = vector.broadcast %106 : vector<1x256xf32> to vector<8x256xf32>
    %108 = arith.mulf %90, %107 : vector<8x256xf32>
    %cst_44 = arith.constant dense<0.000000e+00> : vector<8xf32>
    %109 = vector.multi_reduction <add>, %108, %cst_44 [1] : vector<8x256xf32> to vector<8xf32>
    %110 = vector.shape_cast %109 : vector<8xf32> to vector<8x1xf32>
    %c1_i32 = arith.constant 1 : i32
    %111 = vector.broadcast %c1_i32 : i32 to vector<8x128xi32>
    %112 = arith.cmpi eq, %91, %111 : vector<8x128xi32>
    %cst_45 = arith.constant 0.000000e+00 : f32
    %113 = vector.shape_cast %110 : vector<8x1xf32> to vector<8x1xf32>
    %114 = vector.broadcast %113 : vector<8x1xf32> to vector<8x128xf32>
    %115 = vector.broadcast %cst_45 : f32 to vector<8x128xf32>
    %116 = arith.select %112, %114, %115 : vector<8x128xi1>, vector<8x128xf32>
    %117 = arith.addf %105, %116 : vector<8x128xf32>
    %c12 = arith.constant 12 : index
    %c0_46 = arith.constant 0 : index
    %118 = vector.load %arg3[%c12, %c0_46] : memref<16x1024xf32, #tpu.memory_space<vmem>>, vector<1x256xf32>
    %119 = vector.broadcast %118 : vector<1x256xf32> to vector<8x256xf32>
    %120 = arith.mulf %90, %119 : vector<8x256xf32>
    %cst_47 = arith.constant dense<0.000000e+00> : vector<8xf32>
    %121 = vector.multi_reduction <add>, %120, %cst_47 [1] : vector<8x256xf32> to vector<8xf32>
    %122 = vector.shape_cast %121 : vector<8xf32> to vector<8x1xf32>
    %c2_i32 = arith.constant 2 : i32
    %123 = vector.broadcast %c2_i32 : i32 to vector<8x128xi32>
    %124 = arith.cmpi eq, %91, %123 : vector<8x128xi32>
    %cst_48 = arith.constant 0.000000e+00 : f32
    %125 = vector.shape_cast %122 : vector<8x1xf32> to vector<8x1xf32>
    %126 = vector.broadcast %125 : vector<8x1xf32> to vector<8x128xf32>
    %127 = vector.broadcast %cst_48 : f32 to vector<8x128xf32>
    %128 = arith.select %124, %126, %127 : vector<8x128xi1>, vector<8x128xf32>
    %129 = arith.addf %117, %128 : vector<8x128xf32>
    %c0_49 = arith.constant 0 : index
    %c0_50 = arith.constant 0 : index
    %130 = vector.load %arg7[%c0_49, %c0_50] : memref<8x128xf32, #tpu.memory_space<vmem>>, vector<8x128xf32>
    tpu.vector_store %arg7[%c0_49, %c0_50], %129 {strides = array<i32>} : memref<8x128xf32, #tpu.memory_space<vmem>>, vector<8x128xf32>,
    return
  }
  func.func @transform_0(%arg0: i32) -> (i32, i32) {
    %c0_i32 = arith.constant 0 : i32
    %c0_i32_0 = arith.constant 0 : i32
    %c0_i32_1 = arith.constant 0 : i32
    return %c0_i32, %c0_i32_0 : i32, i32
  }
  func.func @transform_1(%arg0: i32) -> (i32, i32) {
    %c0_i32 = arith.constant 0 : i32
    %c0_i32_0 = arith.constant 0 : i32
    %c0_i32_1 = arith.constant 0 : i32
    return %c0_i32, %c0_i32_0 : i32, i32
  }
  func.func @transform_2(%arg0: i32) -> (i32, i32) {
    %c0_i32 = arith.constant 0 : i32
    %c0_i32_0 = arith.constant 0 : i32
    %c0_i32_1 = arith.constant 0 : i32
    return %c0_i32, %c0_i32_0 : i32, i32
  }
  func.func @transform_3(%arg0: i32) -> (i32, i32) {
    %c0_i32 = arith.constant 0 : i32
    %c0_i32_0 = arith.constant 0 : i32
    %c0_i32_1 = arith.constant 0 : i32
    return %c0_i32, %c0_i32_0 : i32, i32
  }
  func.func @transform_4(%arg0: i32) -> (i32, i32) {
    %c0_i32 = arith.constant 0 : i32
    %c0_i32_0 = arith.constant 0 : i32
    %c0_i32_1 = arith.constant 0 : i32
    return %c0_i32, %c0_i32_0 : i32, i32
  }
  func.func @transform_5(%arg0: i32) -> (i32, i32) {
    %c0_i32 = arith.constant 0 : i32
    %c0_i32_0 = arith.constant 0 : i32
    %c0_i32_1 = arith.constant 0 : i32
    return %c0_i32, %c0_i32_0 : i32, i32
  }
  func.func @transform_6(%arg0: i32) -> (i32, i32) {
    %c0_i32 = arith.constant 0 : i32
    %c0_i32_0 = arith.constant 0 : i32
    %c0_i32_1 = arith.constant 0 : i32
    return %c0_i32, %c0_i32_0 : i32, i32
  }
}

</mosaic_0001>

<bundles_post_ra>
// kernel: tpu_custom_call.1
= control target key start
LH: loop header
LB: loop body
LE: loop exit
PB: predicated region body
PF: predicated region fallthrough
CT: control target
= control target key end

     0   :  { %11 = vsyncpa [#allocation3], 0  ;;  %s8671_s0 = inlined_call_operand.vmem [shape: f32[512,3], index: 0, kind: input, shape index: {}]   ;;  %s8672_s1 = inlined_call_operand.hbm [shape: f32[8,768], index: 1, kind: input, shape index: {}]   ;;  %s8673_s2 = inlined_call_operand.hbm [shape: f32[16,1024], index: 2, kind: input, shape index: {}]   ;;  %s8674_s3 = inlined_call_operand.vmem [shape: bf16[832,64], index: 3, kind: input, shape index: {}]   ;;  %s8675_s4 = inlined_call_operand.hbm [shape: bf16[128,1024], index: 4, kind: input, shape index: {}]   ;;  %s8676_s5 = inlined_call_operand.hbm [shape: bf16[1280,512], index: 5, kind: input, shape index: {}]   ;;  %s8677_s6 = inlined_call_operand.hbm [shape: f32[8,128], index: 6, kind: output, shape index: {}]  }
   0x1   :  { %12 = vsyncpa [#allocation6], 0 }
   0x2   :  { %13 = vsyncpa [#allocation9], 0 }
   0x3   :  { %14 = vsyncpa [#allocation4], 0  ;;  %s7068_s21 = smov [#allocation5]   ;;  %s6950_s25 = scalar_lea.hbm %s8673_s2, 2048 }
   0x4   :  { %s32_s22 = sshll.u32 %s7068_s21, 4  ;;  %p6951_p0 = scmp.ne.s32.totalorder %s8673_s2, %s6950_s25  ;;  %s33_s22 = int_to_ptr.vmem [resolvable:$true] %s32_s22 }
   0x5   :  { %p6954_p1 = scmp.lt.u32.totalorder %s6950_s25, %s8673_s2 }
   0x7   :  { %p6956_p2 = pnand %p6954_p1, %p6951_p0 }
   0x9   :  { %6959 = shalt.err (!%p6956_p2)
}
   0xa   :  { %s6960_s30 = scalar_lea.vmem %s33_s22, 2048  ;;  %p6965_p4 = scmp.lt.s32.totalorder %s33_s22, %s33_s22 }
   0xb   :  { %p6961_p3 = scmp.ne.s32.totalorder %s33_s22, %s6960_s30  ;;  %p6966_p5 = scmp.lt.s32.totalorder %s6960_s30, %s6960_s30 }
   0xd   :  { %p6967_p6 = por %p6966_p5, %p6965_p4 }
   0xf   :  { %p6968_p7 = pnand %p6967_p6, %p6961_p3 }
  0x11   :  { %6971 = shalt.err (!%p6968_p7)
}
  0x12   :  { %s7069_s7 = smov 1024   ;;  %s7070_s8 = smov 64  }
  0x13   :  { %38 = dma.hbm_to_vmem [thread:$0]  %s8673_s2, 2048, %s33_s22, [#allocation6], %s7069_s7, %s7069_s7, %s7070_s8  }
  0x14   :  { %s7071_s11 = smov [#allocation2]   ;;  %s7072_s13 = smov [#allocation7]  }
  0x15   :  { %s23_s12 = sshll.u32 %s7071_s11, 4  ;;  %s46_s14 = sshll.u32 %s7072_s13, 4  ;;  %s24_s12 = int_to_ptr.vmem [resolvable:$true] %s23_s12  ;;  %s47_s14 = int_to_ptr.vmem [resolvable:$true] %s46_s14 }
  0x16   :  { %s6972_s17 = scalar_lea.hbm %s8672_s1, 768 }
  0x17   :  { %p6973_p8 = scmp.ne.s32.totalorder %s8672_s1, %s6972_s17  ;;  %p6976_p9 = scmp.lt.u32.totalorder %s6972_s17, %s8672_s1 }
  0x19   :  { %p6978_p10 = pnand %p6976_p9, %p6973_p8 }
  0x1b   :  { %6981 = shalt.err (!%p6978_p10)
}
  0x1c   :  { %s6982_s2 = scalar_lea.vmem %s24_s12, 768  ;;  %p6987_p12 = scmp.lt.s32.totalorder %s24_s12, %s24_s12 }
  0x1d   :  { %p6983_p11 = scmp.ne.s32.totalorder %s24_s12, %s6982_s2  ;;  %p6988_p13 = scmp.lt.s32.totalorder %s6982_s2, %s6982_s2 }
  0x1f   :  { %p6989_p0 = por %p6988_p13, %p6987_p12 }
  0x21   :  { %p6990_p1 = pnand %p6989_p0, %p6983_p11 }
  0x23   :  { %6993 = shalt.err (!%p6990_p1)
}
  0x24   :  { %26 = dma.hbm_to_vmem [thread:$0]  %s8672_s1, 768, %s24_s12, [#allocation3]  }
  0x25   :  { %s6994_s26 = scalar_lea.hbm %s8675_s4, 8192 }
  0x26   :  { %p6995_p2 = scmp.ne.s32.totalorder %s8675_s4, %s6994_s26  ;;  %p6998_p3 = scmp.lt.u32.totalorder %s6994_s26, %s8675_s4 }
  0x28   :  { %p7000_p4 = pnand %p6998_p3, %p6995_p2 }
  0x2a   :  { %7003 = shalt.err (!%p7000_p4)
}
  0x2b   :  { %s7004_s7 = scalar_lea.vmem %s47_s14, 8192  ;;  %p7009_p6 = scmp.lt.s32.totalorder %s47_s14, %s47_s14 }
  0x2c   :  { %p7005_p5 = scmp.ne.s32.totalorder %s47_s14, %s7004_s7  ;;  %p7010_p7 = scmp.lt.s32.totalorder %s7004_s7, %s7004_s7 }
  0x2e   :  { %p7011_p8 = por %p7010_p7, %p7009_p6 }
  0x30   :  { %p7012_p9 = pnand %p7011_p8, %p7005_p5 }
  0x32   :  { %7015 = shalt.err (!%p7012_p9)
}
  0x33   :  { %s7073_s1 = smov 512   ;;  %s7074_s9 = smov 32  }
  0x34   :  { %52 = dma.hbm_to_vmem [thread:$0]  %s8675_s4, 8192, %s47_s14, [#allocation6], %s7073_s1, %s7073_s1, %s7074_s9  }
  0x35   :  { %s7075_s12 = smov [#allocation8]   ;;  %s7016_s17 = scalar_lea.hbm %s8676_s5, 40960 }
  0x36   :  { %s58_s13 = sshll.u32 %s7075_s12, 4  ;;  %p7017_p10 = scmp.ne.s32.totalorder %s8676_s5, %s7016_s17  ;;  %s59_s13 = int_to_ptr.vmem [resolvable:$true] %s58_s13 }
  0x37   :  { %p7020_p11 = scmp.lt.u32.totalorder %s7016_s17, %s8676_s5 }
  0x39   :  { %p7022_p12 = pnand %p7020_p11, %p7017_p10 }
  0x3b   :  { %7025 = shalt.err (!%p7022_p12)
}
  0x3c   :  { %s7026_s2 = scalar_lea.vmem %s59_s13, 40960  ;;  %p7031_p0 = scmp.lt.s32.totalorder %s59_s13, %s59_s13 }
  0x3d   :  { %p7027_p13 = scmp.ne.s32.totalorder %s59_s13, %s7026_s2  ;;  %p7032_p1 = scmp.lt.s32.totalorder %s7026_s2, %s7026_s2 }
  0x3f   :  { %p7033_p2 = por %p7032_p1, %p7031_p0 }
  0x41   :  { %p7034_p3 = pnand %p7033_p2, %p7027_p13 }
  0x43   :  { %7037 = shalt.err (!%p7034_p3)
}
  0x44   :  { %s7076_s4 = smov 256   ;;  %s7077_s14 = smov 16  }
  0x45   :  { %64 = dma.hbm_to_vmem [thread:$0]  %s8676_s5, 40960, %s59_s13, [#allocation9], %s7076_s4, %s7076_s4, %s7077_s14  }
  0x46   :  { %7060 = dma.done.wait [#allocation3], 768  }
  0x47   :  { %7061 = vsyncadd [#allocation3], 4294966528 }
  0x48   :  { %7062 = dma.done.wait [#allocation6], 10240  }
  0x49   :  { %7063 = vsyncadd [#allocation6], 4294957056 }
  0x4a   :  { %7064 = dma.done.wait [#allocation9], 40960  }
  0x4b   :  { %7065 = vsyncadd [#allocation9], 4294926336  ;;  %v8678_v0 = vmov 1   ;;  %v8680_v1 = vmov 0   ;;  %v80_v2 = vld [vmem:[%s8671_s0 + $0x10] sm:$0xff]  ;;  %v78_v3 = vld [vmem:[%s8671_s0] sm:$0xff] }
  0x4c   :  { %6338 = vset.pattern.permute.xlu0 %v8678_v0  ;;  %6337 = vset.pattern.permute.xlu1 %v8680_v1  ;;  %v81_v4 = vld [vmem:[%s8671_s0 + $0x18] sm:$0xff]  ;;  %v83_v5 = vld [vmem:[%s8671_s0 + $0x28] sm:$0xff]  ;;  %v86_v7 = vld [vmem:[%s8671_s0 + $0x40] sm:$0xff]  ;;  %v8682_v9 = vmov 2   ;;  %vm1491_vm0 = vcmask 523264   ;;  %vm2045_vm1 = vcmask 1040384  }
  0x4d   :  { %156 = vperm.xlu1 %6337, %v80_v2   ;;  %594 = vperm.xlu0 %6338, %v78_v3   ;;  %v79_v6 = vld [vmem:[%s8671_s0 + $0x8] sm:$0xff]  ;;  %v7190_v8 = vld [vmem:[%s8671_s0 + $0x58] sm:$0xff]  ;;  %v7203_v11 = vld [vmem:[%s8671_s0 + $0x80] sm:$0xff]  ;;  %vm2047_vm2 = vcmask 1041408   ;;  %vm2049_vm3 = vcmask 1042432   ;;  %vm2051_vm4 = vcmask 1043456  }
  0x4e   :  { %v7197_v10 = vld [vmem:[%s8671_s0 + $0x68] sm:$0xff]  ;;  %v7209_v12 = vld [vmem:[%s8671_s0 + $0x98] sm:$0xff]  ;;  %v84_v14 = vld [vmem:[%s8671_s0 + $0x30] sm:$0xff]  ;;  %vm2053_vm5 = vcmask 1044480   ;;  %vm2055_vm6 = vcmask 1045504   ;;  %vm2057_vm7 = vcmask 1046528  }
  0x4f   :  { %v99_v13 = vld [vmem:[%s8671_s0 + $0xa8] sm:$0xff]  ;;  %v102_v15 = vld [vmem:[%s8671_s0 + $0xc0] sm:$0xff]  ;;  %v105_v17 = vld [vmem:[%s8671_s0 + $0xd8] sm:$0xff] }
  0x50   :  { %v7225_v16 = vld [vmem:[%s8671_s0 + $0x20] sm:$0xff]  ;;  %v107_v18 = vld [vmem:[%s8671_s0 + $0xe8] sm:$0xff]  ;;  %v7238_v19 = vld [vmem:[%s8671_s0 + $0x38] sm:$0xff] }
  0x51   :  { %161 = vperm.xlu1 %6337, %v81_v4   ;;  %606 = vperm.xlu0 %6338, %v81_v4   ;;  %v110_v20 = vld [vmem:[%s8671_s0 + $0x100] sm:$0xff]  ;;  %v113_v21 = vld [vmem:[%s8671_s0 + $0x118] sm:$0xff]  ;;  %v115_v22 = vld [vmem:[%s8671_s0 + $0x128] sm:$0xff] }
  0x52   :  { %v118_v23 = vld [vmem:[%s8671_s0 + $0x140] sm:$0xff]  ;;  %v121_v24 = vld [vmem:[%s8671_s0 + $0x158] sm:$0xff]  ;;  %v88_v25 = vld [vmem:[%s8671_s0 + $0x50] sm:$0xff] }
  0x53   :  { %v7266_v26 = vld [vmem:[%s8671_s0 + $0x48] sm:$0xff]  ;;  %v7275_v27 = vld [vmem:[%s8671_s0 + $0x60] sm:$0xff]  ;;  %v7282_v28 = vld [vmem:[%s8671_s0 + $0x78] sm:$0xff] }
  0x54   :  { %v7288_v29 = vld [vmem:[%s8671_s0 + $0x88] sm:$0xff]  ;;  %v7295_v30 = vld [vmem:[%s8671_s0 + $0xa0] sm:$0xff]  ;;  %v92_v31 = vld [vmem:[%s8671_s0 + $0x70] sm:$0xff] }
  0x55   :  { %6339 = vset.pattern.permute.xlu1 %v8678_v0  ;;  %614 = vperm.xlu0 %6338, %v83_v5   ;;  %v7305_v32 = vld [vmem:[%s8671_s0 + $0xb8] sm:$0xff]  ;;  %v7312_v33 = vld [vmem:[%s8671_s0 + $0xc8] sm:$0xff]  ;;  %v7318_v34 = vld [vmem:[%s8671_s0 + $0xe0] sm:$0xff] }
  0x56   :  { %598 = vperm.xlu1 %6339, %v79_v6   ;;  %v7326_v35 = vld [vmem:[%s8671_s0 + $0xf8] sm:$0xff]  ;;  %v7332_v36 = vld [vmem:[%s8671_s0 + $0x108] sm:$0xff]  ;;  %v7339_v37 = vld [vmem:[%s8671_s0 + $0x120] sm:$0xff] }
  0x57   :  { %v7347_v38 = vld [vmem:[%s8671_s0 + $0x138] sm:$0xff]  ;;  %v7353_v39 = vld [vmem:[%s8671_s0 + $0x148] sm:$0xff]  ;;  %v96_v42 = vld [vmem:[%s8671_s0 + $0x90] sm:$0xff] }
  0x58   :  { %v7368_v43 = vld [vmem:[%s8671_s0 + $0x160] sm:$0xff]  ;;  %v7378_v46 = vld [vmem:[%s8671_s0 + $0x178] sm:$0xff]  ;;  %v7389_v49 = vld [vmem:[%s8671_s0 + $0x188] sm:$0xff] }
  0x59   :  { %626 = vperm.xlu0 %6338, %v86_v7   ;;  %v7400_v52 = vld [vmem:[%s8671_s0 + $0x1a0] sm:$0xff]  ;;  %v7409_v54 = vld [vmem:[%s8671_s0 + $0x1b8] sm:$0xff]  ;;  %v7419_v57 = vld [vmem:[%s8671_s0 + $0x1c8] sm:$0xff] }
  0x5a   :  { %602 = vperm.xlu1 %6339, %v80_v2   ;;  %v6390_v62 = vld [vmem:[%s8674_s3] sm:$0xff]   ;;  %v6922_v63 = vld [vmem:[%s8671_s0 + $0x98] sm:$0xff] }
  0x5b   :  { %6223 = vmatprep.subr.bf16.mxu0 %v6390_v62 }
  0x5c   :  { %6224 = vmatpush3.bf16.msra.mxu0 %v6390_v62  ;;  %v6927_v62 = vld [vmem:[%s8671_s0 + $0xd8] sm:$0xff] }
  0x5d   :  { %638 = vperm.xlu0 %6338, %v7190_v8  }
  0x5e   :  { %6340 = vset.pattern.permute.xlu1 %v8682_v9 }
  0x5f   :  { %979 = vperm.xlu1 %6340, %v78_v3   ;;  %v6923_v3 = vld [vmem:[%s8671_s0] sm:$0xff] }
  0x61   :  { %646 = vperm.xlu0 %6338, %v7197_v10  }
  0x63   :  { %987 = vperm.xlu1 %6340, %v80_v2  }
  0x65   :  { %658 = vperm.xlu0 %6338, %v7203_v11  }
  0x67   :  { %991 = vperm.xlu1 %6340, %v81_v4  }
  0x69   :  { %670 = vperm.xlu0 %6338, %v7209_v12  }
  0x6b   :  { %6341 = vset.pattern.permute.xlu1 %v8680_v1 }
  0x6c   :  { %171 = vperm.xlu1 %6341, %v83_v5  }
  0x6d   :  { %678 = vperm.xlu0 %6338, %v99_v13  }
  0x70   :  { %176 = vperm.xlu1 %6341, %v84_v14  }
  0x71   :  { %690 = vperm.xlu0 %6338, %v102_v15   ;;  %v6393_v15 = vld [vmem:[%s8674_s3 + $0x18] sm:$0xff]  }
  0x74   :  { %6342 = vset.pattern.permute.xlu1 %v8678_v0 }
  0x75   :  { %610 = vperm.xlu1 %6342, %v7225_v16   ;;  %702 = vperm.xlu0 %6338, %v105_v17  }
  0x79   :  { %618 = vperm.xlu1 %6342, %v84_v14   ;;  %710 = vperm.xlu0 %6338, %v107_v18  }
  0x7d   :  { %622 = vperm.xlu1 %6342, %v7238_v19   ;;  %722 = vperm.xlu0 %6338, %v110_v20  }
  0x81   :  { %6343 = vset.pattern.permute.xlu1 %v8682_v9  ;;  %734 = vperm.xlu0 %6338, %v113_v21  }
  0x82   :  { %999 = vperm.xlu1 %6343, %v83_v5   ;;  %v6391_v5 = vld [vmem:[%s8674_s3 + $0x8] sm:$0xff]  }
  0x83   :  { %6225 = vmatprep.subr.bf16.mxu0 %v6391_v5 }
  0x84   :  { %6226 = vmatpush3.bf16.msra.mxu0 %v6391_v5 }
  0x85   :  { %742 = vperm.xlu0 %6338, %v115_v22  }
  0x86   :  { %1003 = vperm.xlu1 %6343, %v84_v14  }
  0x89   :  { %754 = vperm.xlu0 %6338, %v118_v23  }
  0x8a   :  { %6344 = vset.pattern.permute.xlu1 %v8680_v1 }
  0x8b   :  { %186 = vperm.xlu1 %6344, %v86_v7  }
  0x8d   :  { %766 = vperm.xlu0 %6338, %v121_v24  }
  0x8f   :  { %196 = vperm.xlu1 %6344, %v88_v25  }
  0x91   :  { %6370 = vset.pattern.permute.xlu0 %v8682_v9 }
  0x92   :  { %983 = vperm.xlu0 %6370, %v79_v6  }
  0x93   :  { %201 = vperm.xlu1 %6344, %v7190_v8  }
  0x96   :  { %995 = vperm.xlu0 %6370, %v7225_v16  }
  0x97   :  { %6345 = vset.pattern.permute.xlu1 %v8678_v0 }
  0x98   :  { %630 = vperm.xlu1 %6345, %v7266_v26  }
  0x9a   :  { %1007 = vperm.xlu0 %6370, %v7238_v19  }
  0x9c   :  { %634 = vperm.xlu1 %6345, %v88_v25  }
  0x9e   :  { %1015 = vperm.xlu0 %6370, %v7266_v26  }
  0xa0   :  { %6346 = vset.pattern.permute.xlu1 %v8682_v9 }
  0xa1   :  { %1011 = vperm.xlu1 %6346, %v86_v7   ;;  %v6924_v7 = vld [vmem:[%s8671_s0 + $0x8] sm:$0xff] }
  0xa2   :  { %1027 = vperm.xlu0 %6370, %v7275_v27  }
  0xa5   :  { %1019 = vperm.xlu1 %6346, %v88_v25  }
  0xa6   :  { %1039 = vperm.xlu0 %6370, %v7282_v28  }
  0xa9   :  { %1023 = vperm.xlu1 %6346, %v7190_v8   ;;  %v6925_v8 = vld [vmem:[%s8671_s0 + $0xa8] sm:$0xff] }
  0xaa   :  { %1047 = vperm.xlu0 %6370, %v7288_v29  }
  0xad   :  { %6347 = vset.pattern.permute.xlu1 %v8680_v1 }
  0xae   :  { %211 = vperm.xlu1 %6347, %v7197_v10   ;;  %1059 = vperm.xlu0 %6370, %v7295_v30  }
  0xb2   :  { %216 = vperm.xlu1 %6347, %v92_v31   ;;  %1071 = vperm.xlu0 %6370, %v7305_v32  }
  0xb6   :  { %6348 = vset.pattern.permute.xlu1 %v8678_v0  ;;  %1079 = vperm.xlu0 %6370, %v7312_v33  }
  0xb7   :  { %642 = vperm.xlu1 %6348, %v7275_v27  }
  0xba   :  { %1091 = vperm.xlu0 %6370, %v7318_v34  }
  0xbb   :  { %650 = vperm.xlu1 %6348, %v92_v31  }
  0xbe   :  { %1103 = vperm.xlu0 %6370, %v7326_v35  }
  0xbf   :  { %654 = vperm.xlu1 %6348, %v7282_v28  }
  0xc2   :  { %1111 = vperm.xlu0 %6370, %v7332_v36  }
  0xc3   :  { %6349 = vset.pattern.permute.xlu1 %v8682_v9 }
  0xc4   :  { %1031 = vperm.xlu1 %6349, %v7197_v10  }
  0xc6   :  { %1123 = vperm.xlu0 %6370, %v7339_v37  }
  0xc8   :  { %1035 = vperm.xlu1 %6349, %v92_v31  }
  0xca   :  { %1135 = vperm.xlu0 %6370, %v7347_v38  }
  0xcc   :  { %v7356_v40 = vpop.permute.xlu1 %156  ;;  %6350 = vset.pattern.permute.xlu1 %v8680_v1  ;;  %v7359_v41 = vpop.permute.xlu0 %594 }
  0xcd   :  { %226 = vperm.xlu1 %6350, %v7203_v11  }
  0xce   :  { %1143 = vperm.xlu0 %6370, %v7353_v39  }
  0xd0   :  { %v7371_v44 = vpop.permute.xlu1 %161  ;;  %v7373_v45 = vpop.permute.xlu0 %606 }
  0xd1   :  { %236 = vperm.xlu1 %6350, %v96_v42  }
  0xd2   :  { %1155 = vperm.xlu0 %6370, %v7368_v43  }
  0xd4   :  { %v7381_v47 = vpop.permute.xlu0 %614 }
  0xd5   :  { %v7383_v48 = vpop.permute.xlu1 %598  ;;  %241 = vperm.xlu1 %6350, %v7209_v12   ;;  %v6392_v12 = vld [vmem:[%s8674_s3 + $0x10] sm:$0xff]  }
  0xd6   :  { %1167 = vperm.xlu0 %6370, %v7378_v46   ;;  %6227 = vmatprep.subr.bf16.mxu0 %v6392_v12 }
  0xd7   :  { %6228 = vmatpush3.bf16.msra.mxu0 %v6392_v12 }
  0xd8   :  { %v7392_v50 = vpop.permute.xlu0 %626  ;;  %6229 = vmatprep.subr.bf16.mxu0 %v6393_v15 }
  0xd9   :  { %v7394_v51 = vpop.permute.xlu1 %602  ;;  %6351 = vset.pattern.permute.xlu1 %v8678_v0 }
  0xda   :  { %662 = vperm.xlu1 %6351, %v7288_v29   ;;  %1175 = vperm.xlu0 %6370, %v7389_v49  }
  0xdb   :  { %6230 = vmatpush3.bf16.msra.mxu0 %v6393_v15 }
  0xdc   :  { %v7404_v53 = vpop.permute.xlu0 %638 }
  0xde   :  { %666 = vperm.xlu1 %6351, %v96_v42   ;;  %v7411_v55 = vpop.permute.xlu1 %979  ;;  %1187 = vperm.xlu0 %6370, %v7400_v52  }
  0xe0   :  { %v7414_v56 = vpop.permute.xlu0 %646 }
  0xe2   :  { %6352 = vset.pattern.permute.xlu1 %v8682_v9  ;;  %v7422_v58 = vpop.permute.xlu1 %987  ;;  %1199 = vperm.xlu0 %6370, %v7409_v54  }
  0xe3   :  { %1043 = vperm.xlu1 %6352, %v7203_v11   ;;  %v100_v11 = vld [vmem:[%s8671_s0 + $0xb0] sm:$0xff] }
  0xe4   :  { %v7426_v59 = vpop.permute.xlu0 %658 }
  0xe6   :  { %v7428_v60 = vpop.permute.xlu1 %991  ;;  %1207 = vperm.xlu0 %6370, %v7419_v57  }
  0xe7   :  { %1051 = vperm.xlu1 %6352, %v96_v42  }
  0xe8   :  { %v7431_v61 = vpop.permute.xlu0 %670 }
  0xea   :  { %6384 = vset.pattern.permute.xlu0 %v8680_v1 }
  0xeb   :  { %1055 = vperm.xlu1 %6352, %v6922_v63   ;;  %v7440_v2 = vpop.permute.xlu1 %171  ;;  %146 = vperm.xlu0 %6384, %v6923_v3  }
  0xec   :  { %v7445_v4 = vpop.permute.xlu0 %678 }
  0xef   :  { %6353 = vset.pattern.permute.xlu1 %v8680_v1  ;;  %v7451_v6 = vpop.permute.xlu1 %176  ;;  %151 = vperm.xlu0 %6384, %v6924_v7  }
  0xf0   :  { %251 = vperm.xlu1 %6353, %v6925_v8   ;;  %v7459_v10 = vpop.permute.xlu0 %690 }
  0xf1   :  { %8691 = vst [vmem:[#allocation15_spill] sm:$0xff] %v7459_v10 }
  0xf3   :  { %166 = vperm.xlu0 %6384, %v7225_v16  }
  0xf4   :  { %256 = vperm.xlu1 %6353, %v100_v11   ;;  %v7468_v13 = vpop.permute.xlu1 %610  ;;  %v7470_v14 = vpop.permute.xlu0 %702 }
  0xf5   :  { %8692 = vst [vmem:[#allocation16_spill] sm:$0xff] %v7470_v14 }
  0xf7   :  { %181 = vperm.xlu0 %6384, %v7238_v19  }
  0xf8   :  { %6354 = vset.pattern.permute.xlu1 %v8678_v0  ;;  %v7477_v17 = vpop.permute.xlu1 %618  ;;  %v7479_v18 = vpop.permute.xlu0 %710 }
  0xf9   :  { %8693 = vst [vmem:[#allocation17_spill] sm:$0xff] %v7479_v18  ;;  %674 = vperm.xlu1 %6354, %v7295_v30  }
  0xfb   :  { %191 = vperm.xlu0 %6384, %v7266_v26  }
  0xfc   :  { %v7483_v16 = vpop.permute.xlu1 %622  ;;  %v7485_v20 = vpop.permute.xlu0 %722 }
  0xfd   :  { %8694 = vst [vmem:[#allocation18_spill] sm:$0xff] %v7485_v20  ;;  %682 = vperm.xlu1 %6354, %v100_v11  }
  0xff   :  { %206 = vperm.xlu0 %6384, %v7275_v27  }
 0x100   :  { %v7488_v19 = vpop.permute.xlu0 %734 }
 0x101   :  { %8695 = vst [vmem:[#allocation19_spill] sm:$0xff] %v7488_v19  ;;  %686 = vperm.xlu1 %6354, %v7305_v32   ;;  %v7491_v21 = vpop.permute.xlu1 %999 }
 0x103   :  { %221 = vperm.xlu0 %6384, %v7282_v28   ;;  %v6926_v28 = vld [vmem:[%s8671_s0 + $0xc0] sm:$0xff] }
 0x104   :  { %v7494_v22 = vpop.permute.xlu0 %742 }
 0x105   :  { %8696 = vst [vmem:[#allocation20_spill] sm:$0xff] %v7494_v22  ;;  %6355 = vset.pattern.permute.xlu1 %v8682_v9  ;;  %v7497_v23 = vpop.permute.xlu1 %1003  ;;  %v8706_v22 = vmov 1  }
 0x106   :  { %1063 = vperm.xlu1 %6355, %v6925_v8  }
 0x107   :  { %231 = vperm.xlu0 %6384, %v7288_v29   ;;  %v104_v29 = vld [vmem:[%s8671_s0 + $0xd0] sm:$0xff] }
 0x108   :  { %v7500_v24 = vpop.permute.xlu0 %754 }
 0x109   :  { %8697 = vst [vmem:[#allocation21_spill] sm:$0xff] %v7500_v24 }
 0x10a   :  { %1067 = vperm.xlu1 %6355, %v100_v11   ;;  %v7502_v25 = vpop.permute.xlu1 %186 }
 0x10b   :  { %246 = vperm.xlu0 %6384, %v7295_v30  }
 0x10c   :  { %v7505_v26 = vpop.permute.xlu0 %766 }
 0x10d   :  { %8698 = vst [vmem:[#allocation22_spill] sm:$0xff] %v7505_v26 }
 0x10e   :  { %6356 = vset.pattern.permute.xlu1 %v8680_v1  ;;  %v7508_v27 = vpop.permute.xlu1 %196 }
 0x10f   :  { %266 = vperm.xlu1 %6356, %v6926_v28   ;;  %261 = vperm.xlu0 %6384, %v7305_v32  }
 0x111   :  { %v7517_v31 = vpop.permute.xlu0 %983 }
 0x112   :  { %v7519_v30 = vpop.permute.xlu1 %201 }
 0x113   :  { %276 = vperm.xlu1 %6356, %v104_v29   ;;  %271 = vperm.xlu0 %6384, %v7312_v33  }
 0x115   :  { %v7522_v42 = vpop.permute.xlu0 %995 }
 0x117   :  { %281 = vperm.xlu1 %6356, %v6927_v62   ;;  %v7527_v63 = vpop.permute.xlu1 %630  ;;  %286 = vperm.xlu0 %6384, %v7318_v34  }
 0x119   :  { %v7530_v32 = vpop.permute.xlu0 %1007 }
 0x11b   :  { %6357 = vset.pattern.permute.xlu1 %v8678_v0  ;;  %v7533_v3 = vpop.permute.xlu1 %634  ;;  %301 = vperm.xlu0 %6384, %v7326_v35  }
 0x11c   :  { %694 = vperm.xlu1 %6357, %v7312_v33  }
 0x11d   :  { %v7537_v5 = vpop.permute.xlu0 %1015 }
 0x11f   :  { %311 = vperm.xlu0 %6384, %v7332_v36  }
 0x120   :  { %698 = vperm.xlu1 %6357, %v104_v29   ;;  %v7540_v7 = vpop.permute.xlu1 %1011 }
 0x121   :  { %v7542_v8 = vpop.permute.xlu0 %1027 }
 0x123   :  { %326 = vperm.xlu0 %6384, %v7339_v37  }
 0x124   :  { %6358 = vset.pattern.permute.xlu1 %v8682_v9  ;;  %v7546_v11 = vpop.permute.xlu1 %1019  ;;  %v8702_v9 = vmov 0  }
 0x125   :  { %1075 = vperm.xlu1 %6358, %v6926_v28   ;;  %v7548_v12 = vpop.permute.xlu0 %1039 }
 0x126   :  { %8699 = vst [vmem:[#allocation23_spill] sm:$0xff] %v7548_v12 }
 0x127   :  { %341 = vperm.xlu0 %6384, %v7347_v38  }
 0x128   :  { %v7551_v33 = vpop.permute.xlu1 %1023 }
 0x129   :  { %1083 = vperm.xlu1 %6358, %v104_v29   ;;  %v7553_v15 = vpop.permute.xlu0 %1047  ;;  %v6928_v29 = vld [vmem:[%s8671_s0 + $0xe8] sm:$0xff] }
 0x12a   :  { %8700 = vst [vmem:[#allocation24_spill] sm:$0xff] %v7553_v15 }
 0x12b   :  { %351 = vperm.xlu0 %6384, %v7353_v39   ;;  %v108_v39 = vld [vmem:[%s8671_s0 + $0xf0] sm:$0xff] }
 0x12d   :  { %1087 = vperm.xlu1 %6358, %v6927_v62   ;;  %v7556_v0 = vpop.permute.xlu1 %211  ;;  %v7558_v1 = vpop.permute.xlu0 %1059 }
 0x12e   :  { %8701 = vst [vmem:[#allocation25_spill] sm:$0xff] %v7558_v1  ;;  %v6394_v1 = vld [vmem:[%s8674_s3 + $0x60] sm:$0xff]  }
 0x12f   :  { %366 = vperm.xlu0 %6384, %v7368_v43   ;;  %6157 = vmatprep.subr.bf16.mxu1 %v6394_v1  ;;  %v7698_v1 = vld [vmem:[#allocation5 + $0x41] ss:$0 sm:$0xff] }
 0x130   :  { %v1236_v12 = vmul.f32 %v7422_v58, %v7698_v1 }
 0x131   :  { %6359 = vset.pattern.permute.xlu1 %v8702_v9  ;;  %v7562_v28 = vpop.permute.xlu1 %216  ;;  %v7564_v26 = vpop.permute.xlu0 %1071 }
 0x132   :  { %8703 = vst [vmem:[#allocation26_spill] sm:$0xff] %v7564_v26  ;;  %291 = vperm.xlu1 %6359, %v6928_v29   ;;  %v7669_v26 = vld [vmem:[#allocation5 + $0x7] ss:$0 sm:$0xff] }
 0x133   :  { %381 = vperm.xlu0 %6384, %v7378_v46  }
 0x135   :  { %v7573_v62 = vpop.permute.xlu0 %1079 }
 0x136   :  { %8704 = vst [vmem:[#allocation27_spill] sm:$0xff] %v7573_v62  ;;  %296 = vperm.xlu1 %6359, %v108_v39   ;;  %v7575_v43 = vpop.permute.xlu1 %642 }
 0x137   :  { %391 = vperm.xlu0 %6384, %v7389_v49  }
 0x139   :  { %v7578_v24 = vpop.permute.xlu0 %1091 }
 0x13a   :  { %8705 = vst [vmem:[#allocation28_spill] sm:$0xff] %v7578_v24  ;;  %6360 = vset.pattern.permute.xlu1 %v8706_v22  ;;  %v7581_v19 = vpop.permute.xlu1 %650 }
 0x13b   :  { %706 = vperm.xlu1 %6360, %v7318_v34   ;;  %406 = vperm.xlu0 %6384, %v7400_v52   ;;  %v7599_v34 = vld [vmem:[%s8671_s0 + $0x1e0] sm:$0xff] }
 0x13c   :  { %8709 = vst [vmem:[#allocation31_spill] sm:$0xff] %v7599_v34 }
 0x13d   :  { %v7585_v20 = vpop.permute.xlu0 %1103 }
 0x13e   :  { %8707 = vst [vmem:[#allocation29_spill] sm:$0xff] %v7585_v20  ;;  %v7587_v46 = vpop.permute.xlu1 %654  ;;  %v8711_v20 = vmov 2  }
 0x13f   :  { %714 = vperm.xlu1 %6360, %v108_v39   ;;  %421 = vperm.xlu0 %6384, %v7409_v54  }
 0x141   :  { %v7590_v18 = vpop.permute.xlu0 %1111 }
 0x142   :  { %8708 = vst [vmem:[#allocation30_spill] sm:$0xff] %v7590_v18  ;;  %v7622_v18 = vld [vmem:[%s8671_s0 + $0x168] sm:$0xff] }
 0x143   :  { %718 = vperm.xlu1 %6360, %v7326_v35   ;;  %v7593_v49 = vpop.permute.xlu1 %1031  ;;  %431 = vperm.xlu0 %6384, %v7419_v57   ;;  %v7610_v35 = vld [vmem:[%s8671_s0 + $0x1f8] sm:$0xff]  ;;  %8716 = vst [vmem:[#allocation37_spill] sm:$0xff] %v7622_v18 }
 0x144   :  { %8713 = vst [vmem:[#allocation34_spill] sm:$0xff] %v7610_v35 }
 0x145   :  { %v7601_v52 = vpop.permute.xlu0 %1123 }
 0x146   :  { %8710 = vst [vmem:[#allocation32_spill] sm:$0xff] %v7601_v52 }
 0x147   :  { %6361 = vset.pattern.permute.xlu1 %v8711_v20  ;;  %v7604_v24 = vpop.permute.xlu1 %1035  ;;  %446 = vperm.xlu0 %6384, %v7599_v34  }
 0x148   :  { %8712 = vst [vmem:[#allocation33_spill] sm:$0xff] %v7604_v24  ;;  %1095 = vperm.xlu1 %6361, %v6928_v29  }
 0x149   :  { %v7612_v54 = vpop.permute.xlu0 %1135 }
 0x14a   :  { %8714 = vst [vmem:[#allocation35_spill] sm:$0xff] %v7612_v54 }
 0x14b   :  { %461 = vperm.xlu0 %6384, %v7610_v35  }
 0x14c   :  { %1099 = vperm.xlu1 %6361, %v108_v39   ;;  %v7615_v57 = vpop.permute.xlu1 %226  ;;  %v6929_v39 = vld [vmem:[%s8671_s0 + $0x100] sm:$0xff] }
 0x14d   :  { %v7617_v52 = vpop.permute.xlu0 %1143 }
 0x14e   :  { %8715 = vst [vmem:[#allocation36_spill] sm:$0xff] %v7617_v52  ;;  %v112_v52 = vld [vmem:[%s8671_s0 + $0x110] sm:$0xff] }
 0x14f   :  { %6386 = vset.pattern.permute.xlu0 %v8706_v22 }
 0x150   :  { %6362 = vset.pattern.permute.xlu1 %v8702_v9  ;;  %v7626_v29 = vpop.permute.xlu1 %236  ;;  %774 = vperm.xlu0 %6386, %v7622_v18   ;;  %v7644_v18 = vld [vmem:[%s8671_s0 + $0x180] sm:$0xff] }
 0x151   :  { %8717 = vst [vmem:[#allocation38_spill] sm:$0xff] %v7626_v29  ;;  %306 = vperm.xlu1 %6362, %v6929_v39   ;;  %v7632_v54 = vpop.permute.xlu0 %1155  ;;  %8721 = vst [vmem:[#allocation42_spill] sm:$0xff] %v7644_v18  ;;  %v7676_v29 = vld [vmem:[#allocation5 + $0x40] ss:$0 sm:$0xff] }
 0x152   :  { %8718 = vst [vmem:[#allocation39_spill] sm:$0xff] %v7632_v54  ;;  %v7650_v54 = vld [vmem:[%s8671_s0 + $0x118] sm:$0xff]  ;;  %v849_v58 = vmul.f32 %v7359_v41, %v7676_v29 }
 0x154   :  { %v7637_v35 = vpop.permute.xlu1 %241  ;;  %786 = vperm.xlu0 %6386, %v7644_v18  }
 0x155   :  { %8719 = vst [vmem:[#allocation40_spill] sm:$0xff] %v7637_v35  ;;  %316 = vperm.xlu1 %6362, %v112_v52   ;;  %v7639_v34 = vpop.permute.xlu0 %1167  ;;  %v852_v35 = vmul.f32 %v7373_v45, %v7676_v29 }
 0x156   :  { %8720 = vst [vmem:[#allocation41_spill] sm:$0xff] %v7639_v34  ;;  %v7660_v34 = vld [vmem:[%s8671_s0 + $0x198] sm:$0xff] }
 0x157   :  { %8724 = vst [vmem:[#allocation45_spill] sm:$0xff] %v7660_v34 }
 0x158   :  { %798 = vperm.xlu0 %6386, %v7660_v34  }
 0x159   :  { %321 = vperm.xlu1 %6362, %v7650_v54   ;;  %v7653_v14 = vpop.permute.xlu1 %662  ;;  %v7655_v62 = vpop.permute.xlu0 %1175 }
 0x15a   :  { %8722 = vst [vmem:[#allocation43_spill] sm:$0xff] %v7653_v14  ;;  %8723 = vst [vmem:[#allocation44_spill] sm:$0xff] %v7655_v62  ;;  %v467_v62 = vmul.f32 %v7371_v44, %v7669_v26  ;;  %v466_v44 = vmul.f32 %v7356_v40, %v7669_v26  ;;  %v851_v40 = vmul.f32 %v7394_v51, %v7676_v29  ;;  %v6398_v51 = vld [vmem:[%s8674_s3 + $0x70] sm:$0xff]  }
 0x15d   :  { %6363 = vset.pattern.permute.xlu1 %v8706_v22  ;;  %v7664_v18 = vpop.permute.xlu1 %666  ;;  %v7666_v10 = vpop.permute.xlu0 %1187 }
 0x15e   :  { %8725 = vst [vmem:[#allocation46_spill] sm:$0xff] %v7664_v18  ;;  %8726 = vst [vmem:[#allocation47_spill] sm:$0xff] %v7666_v10  ;;  %726 = vperm.xlu1 %6363, %v7332_v36   ;;  %v6395_v18 = vld [vmem:[%s8674_s3 + $0x20] sm:$0xff]   ;;  %v7685_v36 = vld [vmem:[#allocation5] ss:$0 sm:$0xff] }
 0x15f   :  { %6158 = vmatpush3.bf16.msra.mxu1 %v6395_v18  ;;  %v531_v14 = vadd.f32 %v467_v62, %v7685_v36  ;;  %v1237_v18 = vmul.f32 %v7428_v60, %v7698_v1  ;;  %v530_v62 = vadd.f32 %v466_v44, %v7685_v36  ;;  %v6399_v60 = vld [vmem:[%s8674_s3 + $0x30] sm:$0xff]   ;;  %v6400_v44 = vld [vmem:[%s8674_s3 + $0x78] sm:$0xff]  }
 0x161   :  { %v7678_v34 = vpop.permute.xlu0 %1199  ;;  %v916_v15 = vadd.f32 %v852_v35, %v531_v14 }
 0x162   :  { %8727 = vst [vmem:[#allocation48_spill] sm:$0xff] %v7678_v34  ;;  %730 = vperm.xlu1 %6363, %v112_v52   ;;  %v7683_v10 = vpop.permute.xlu1 %1043  ;;  %v6396_v34 = vld [vmem:[%s8674_s3 + $0x68] sm:$0xff]  }
 0x163   :  { %8728 = vst [vmem:[#allocation49_spill] sm:$0xff] %v7683_v10  ;;  %v6397_v10 = vld [vmem:[%s8674_s3 + $0x28] sm:$0xff]   ;;  %6159 = vmatprep.subr.bf16.mxu1 %v6396_v34  ;;  %v469_v34 = vmul.f32 %v7440_v2, %v7669_v26  ;;  %v854_v2 = vmul.f32 %v7381_v47, %v7676_v29 }
 0x164   :  { %6160 = vmatpush3.bf16.msra.mxu1 %v6397_v10 }
 0x165   :  { %v7700_v24 = vpop.permute.xlu0 %1207  ;;  %6161 = vmatprep.subr.bf16.mxu1 %v6398_v51  ;;  %v533_v47 = vadd.f32 %v469_v34, %v7685_v36  ;;  %v472_v34 = vmul.f32 %v7502_v25, %v7669_v26  ;;  %v6403_v25 = vld [vmem:[%s8674_s3 + $0x40] sm:$0xff]  }
 0x166   :  { %8729 = vst [vmem:[#allocation50_spill] sm:$0xff] %v7700_v24  ;;  %6364 = vset.pattern.permute.xlu1 %v8711_v20  ;;  %v7707_v45 = vpop.permute.xlu1 %1051  ;;  %v915_v24 = vadd.f32 %v851_v40, %v530_v62  ;;  %v1301_v20 = vadd.f32 %v1237_v18, %v916_v15  ;;  %v850_v15 = vmul.f32 %v7383_v48, %v7676_v29 }
 0x167   :  { %1107 = vperm.xlu1 %6364, %v6929_v39   ;;  %v7734_v40 = vmul.f32 %v7392_v50, %v7676_v29  ;;  %v7749_v50 = vmul.f32 %v7414_v56, %v7676_v29  ;;  %v6402_v56 = vld [vmem:[%s8674_s3 + $0x80] sm:$0xff]  }
 0x168   :  { %6162 = vmatpush3.bf16.msra.mxu1 %v6399_v60  ;;  %v1300_v35 = vadd.f32 %v1236_v12, %v915_v24  ;;  %v6401_v24 = vld [vmem:[%s8674_s3 + $0x38] sm:$0xff]   ;;  %v1234_v12 = vmul.f32 %v7411_v55, %v7698_v1  ;;  %v1365_v48 = vmax.f32 %v1301_v20, 0.0  ;;  %v1239_v20 = vmul.f32 %v7491_v21, %v7698_v1 }
 0x169   :  { %6163 = vmatprep.subr.bf16.mxu1 %v6400_v44 }
 0x16a   :  { %v7720_v10 = vpop.permute.xlu1 %1055  ;;  %v147_v39 = vpop.permute.xlu0 %146  ;;  %v1364_v55 = vmax.f32 %v1300_v35, 0.0 }
 0x16b   :  { %v464_v14 = vmul.f32 %v147_v39, %v7669_v26  ;;  %1115 = vperm.xlu1 %6364, %v112_v52   ;;  %v7744_v52 = vmul.f32 %v7404_v53, %v7676_v29  ;;  %v470_v53 = vmul.f32 %v7451_v6, %v7669_v26  ;;  %v7770_v39 = vmul.f32 %v7431_v61, %v7676_v29 }
 0x16c   :  { %6164 = vmatpush3.bf16.msra.mxu1 %v6401_v24  ;;  %v1235_v6 = vmul.f32 %v7517_v31, %v7698_v1  ;;  %v918_v61 = vadd.f32 %v854_v2, %v533_v47  ;;  %v6404_v2 = vld [vmem:[%s8674_s3 + $0x88] sm:$0xff]   ;;  %v1238_v47 = vmul.f32 %v7522_v42, %v7698_v1 }
 0x16d   :  { %v528_v41 = vadd.f32 %v464_v14, %v7685_v36  ;;  %v7782_v14 = vmul.f32 %v7445_v4, %v7676_v29  ;;  %6165 = vmatprep.subr.bf16.mxu1 %v6402_v56  ;;  %v1240_v4 = vmul.f32 %v7497_v23, %v7698_v1 }
 0x16e   :  { %v152_v18 = vpop.permute.xlu0 %151 }
 0x16f   :  { %v913_v62 = vadd.f32 %v849_v58, %v528_v41  ;;  %v465_v51 = vmul.f32 %v152_v18, %v7669_v26  ;;  %1119 = vperm.xlu1 %6364, %v7650_v54   ;;  %v7753_v60 = vpop.permute.xlu1 %251  ;;  %v7766_v54 = vmul.f32 %v7426_v59, %v7676_v29  ;;  %v7778_v58 = vpack.c.bf16 %v1365_v48, %v1364_v55  ;;  %v6405_v55 = vld [vmem:[%s8674_s3 + $0x48] sm:$0xff]  }
 0x170   :  { %v855_v59 = vmul.f32 %v7477_v17, %v7676_v29  ;;  %6166 = vmatpush3.bf16.msra.mxu1 %v6403_v25  ;;  %v534_v48 = vadd.f32 %v470_v53, %v7685_v36  ;;  %v1303_v18 = vadd.f32 %v1239_v20, %v918_v61  ;;  %v536_v17 = vadd.f32 %v472_v34, %v7685_v36 }
 0x171   :  { %v529_v21 = vadd.f32 %v465_v51, %v7685_v36  ;;  %v1298_v24 = vadd.f32 %v1234_v12, %v913_v62  ;;  %v853_v12 = vmul.f32 %v7468_v13, %v7676_v29  ;;  %v7811_v62 = vld [vmem:[%s8671_s0 + $0x130] sm:$0xff]  ;;  %v474_v20 = vmul.f32 %v7508_v27, %v7669_v26  ;;  %6167 = vmatprep.subr.bf16.mxu1 %v6404_v2 }
 0x172   :  { %v167_v35 = vpop.permute.xlu0 %166  ;;  %v919_v53 = vadd.f32 %v855_v59, %v534_v48  ;;  %v475_v13 = vmul.f32 %v7519_v30, %v7669_v26  ;;  %v1367_v61 = vmax.f32 %v1303_v18, 0.0  ;;  %v921_v27 = vadd.f32 %v7734_v40, %v536_v17  ;;  %v6407_v48 = vld [vmem:[%s8674_s3 + $0x50] sm:$0xff]  }
 0x173   :  { %v914_v44 = vadd.f32 %v850_v15, %v529_v21  ;;  %v468_v31 = vmul.f32 %v167_v35, %v7669_v26  ;;  %6365 = vset.pattern.permute.xlu1 %v8702_v9  ;;  %v7788_v41 = vpop.permute.xlu1 %256  ;;  %v7797_v15 = vld [vmem:[%s8671_s0 + $0x128] sm:$0xff]  ;;  %v1362_v21 = vmax.f32 %v1298_v24, 0.0  ;;  %v1242_v17 = vmul.f32 %v7540_v7, %v7698_v1 }
 0x174   :  { %331 = vperm.xlu1 %6365, %v7797_v15   ;;  %6168 = vmatpush3.bf16.msra.mxu1 %v6405_v55  ;;  %v7823_v59 = vadd.f32 %v1240_v4, %v919_v53  ;;  %v7832_v35 = vld [vmem:[%s8671_s0 + $0x1a8] sm:$0xff]  ;;  %v539_v18 = vadd.f32 %v475_v13, %v7685_v36  ;;  %v859_v4 = vmul.f32 %v7533_v3, %v7676_v29 }
 0x175   :  { %v532_v23 = vadd.f32 %v468_v31, %v7685_v36  ;;  %v1299_v51 = vadd.f32 %v1235_v6, %v914_v44  ;;  %v856_v6 = vmul.f32 %v7483_v16, %v7676_v29  ;;  %v6406_v44 = vld [vmem:[%s8674_s3 + $0x90] sm:$0xff]   ;;  %v1241_v16 = vmul.f32 %v7530_v32, %v7698_v1  ;;  %806 = vperm.xlu0 %6386, %v7832_v35  }
 0x176   :  { %v182_v42 = vpop.permute.xlu0 %181  ;;  %v477_v32 = vmul.f32 %v7556_v0, %v7669_v26  ;;  %6169 = vmatprep.subr.bf16.mxu1 %v6406_v44  ;;  %v1368_v55 = vmax.f32 %v7823_v59, 0.0  ;;  %v858_v3 = vmul.f32 %v7527_v63, %v7676_v29  ;;  %v1244_v7 = vmul.f32 %v7546_v11, %v7698_v1 }
 0x177   :  { %v917_v34 = vadd.f32 %v853_v12, %v532_v23  ;;  %v471_v56 = vmul.f32 %v182_v42, %v7669_v26  ;;  %v1363_v25 = vmax.f32 %v1299_v51, 0.0  ;;  %v538_v12 = vadd.f32 %v474_v20, %v7685_v36  ;;  %v6408_v20 = vld [vmem:[%s8674_s3 + $0x98] sm:$0xff]  }
 0x178   :  { %336 = vperm.xlu1 %6365, %v7811_v62   ;;  %v7827_v30 = vpop.permute.xlu1 %674  ;;  %6170 = vmatpush3.bf16.msra.mxu1 %v6407_v48  ;;  %v1245_v0 = vmul.f32 %v7551_v33, %v7698_v1  ;;  %v1243_v63 = vmul.f32 %v7537_v5, %v7698_v1  ;;  %v6409_v42 = vld [vmem:[%s8674_s3 + $0x58] sm:$0xff]   ;;  %v1246_v5 = vmul.f32 %v7542_v8, %v7698_v1  ;;  %v6410_v8 = vld [vmem:[%s8674_s3 + $0xe0] sm:$0xff]  }
 0x179   :  { %v1302_v31 = vadd.f32 %v1238_v47, %v917_v34  ;;  %v535_v24 = vadd.f32 %v471_v56, %v7685_v36  ;;  %v1426_v40 = vpack.c.bf16 %v1363_v25, %v1362_v21  ;;  %v923_v34 = vadd.f32 %v859_v4, %v538_v12  ;;  %6171 = vmatprep.subr.bf16.mxu1 %v6408_v20 }
 0x17a   :  { %v192_v2 = vpop.permute.xlu0 %191  ;;  %v1306_v56 = vadd.f32 %v1242_v17, %v921_v27  ;;  %v541_v21 = vadd.f32 %v477_v32, %v7685_v36 }
 0x17b   :  { %v1366_v47 = vmax.f32 %v1302_v31, 0.0  ;;  %v920_v23 = vadd.f32 %v856_v6, %v535_v24  ;;  %v473_v51 = vmul.f32 %v192_v2, %v7669_v26  ;;  %6231 = vmatprep.mubr.msk.bf16.mxu0 %vm1491_vm0, %v1426_v40  ;;  %v1308_v44 = vadd.f32 %v1244_v7, %v923_v34  ;;  %v2059_v24 = vld [vmem:[#allocation2] sm:$0xff] }
 0x17c   :  { %6366 = vset.pattern.permute.xlu1 %v8706_v22  ;;  %v7862_v53 = vpop.permute.xlu1 %682  ;;  %6232 = vmatmul.mubr.msk.bf16.vlgmr.msra.gmra.mrb[0].mxu0 %vm1491_vm0, %v7778_v58  ;;  %v924_v58 = vadd.f32 %v7744_v52, %v539_v18  ;;  %v1247_v52 = vmul.f32 %v7593_v49, %v7698_v1  ;;  %v861_v40 = vmul.f32 %v7575_v43, %v7676_v29  ;;  %v6411_v49 = vld [vmem:[%s8674_s3 + $0xa0] sm:$0xff]   ;;  %v1370_v17 = vmax.f32 %v1306_v56, 0.0 }
 0x17d   :  { %v1305_v13 = vadd.f32 %v1241_v16, %v920_v23  ;;  %v537_v11 = vadd.f32 %v473_v51, %v7685_v36  ;;  %738 = vperm.xlu1 %6366, %v7339_v37   ;;  %v1428_v33 = vpack.c.bf16 %v1367_v61, %v1366_v47  ;;  %6172 = vmatpush3.bf16.msra.mxu1 %v6409_v42  ;;  %v2060_v61 = vld [vmem:[#allocation2 + $0x8] sm:$0xff]  ;;  %v8731_v42 = vld [vmem:[#allocation24_spill] sm:$0xff] }
 0x17e   :  { %v207_v25 = vpop.permute.xlu0 %206  ;;  %v1309_v16 = vadd.f32 %v1245_v0, %v924_v58  ;;  %v2066_v31 = vpack.c.bf16 %v2060_v61, %v2060_v61  ;;  %v926_v32 = vadd.f32 %v7749_v50, %v541_v21  ;;  %v480_v2 = vmul.f32 %v7615_v57, %v7669_v26  ;;  %6179 = vmatprep.subr.bf16.mxu1 %v6410_v8  ;;  %v6412_v57 = vld [vmem:[%s8674_s3 + $0xe8] sm:$0xff]   ;;  %v8733_v61 = vld [vmem:[#allocation40_spill] sm:$0xff] }
 0x17f   :  { %v1369_v6 = vmax.f32 %v1305_v13, 0.0  ;;  %v922_v59 = vadd.f32 %v858_v3, %v537_v11  ;;  %v476_v37 = vmul.f32 %v207_v25, %v7669_v26  ;;  %6235 = vmatprep.mubr.msk.bf16.mxu0 %vm1491_vm0, %v1428_v33  ;;  %v2065_v43 = vpack.c.bf16 %v2059_v24, %v2059_v24  ;;  %v8730_v11 = vld [vmem:[#allocation23_spill] sm:$0xff] }
 0x180   :  { %v7884_v27 = vpop.permute.xlu1 %686  ;;  %2488 = vmatprep.mubr.bf16.mxu1 %v2066_v31  ;;  %v478_v47 = vmul.f32 %v7562_v28, %v7669_v26  ;;  %v1373_v3 = vmax.f32 %v1309_v16, 0.0  ;;  %v863_v7 = vmul.f32 %v7581_v19, %v7676_v29  ;;  %v864_v50 = vmul.f32 %v7587_v46, %v7676_v29  ;;  %v6413_v19 = vld [vmem:[%s8674_s3 + $0xa8] sm:$0xff]   ;;  %v6414_v31 = vld [vmem:[%s8674_s3 + $0xf0] sm:$0xff]  }
 0x181   :  { %v1307_v48 = vadd.f32 %v1243_v63, %v922_v59  ;;  %v540_v18 = vadd.f32 %v476_v37, %v7685_v36  ;;  %746 = vperm.xlu1 %6366, %v7811_v62   ;;  %v1429_v4 = vpack.c.bf16 %v1369_v6, %v1368_v55  ;;  %v1311_v0 = vadd.f32 %v1247_v52, %v926_v32  ;;  %v8732_v59 = vld [vmem:[#allocation33_spill] sm:$0xff]  ;;  %v8737_v32 = vld [vmem:[#allocation38_spill] sm:$0xff] }
 0x182   :  { %v222_v12 = vpop.permute.xlu0 %221  ;;  %2489 = vmatmul.mubr.bf16.vlgmr.msra.gmra.mrb[0].mxu1 %v2065_v43  ;;  %v1372_v46 = vmax.f32 %v1308_v44, 0.0  ;;  %v1249_v33 = vmul.f32 %v8730_v11, %v7698_v1  ;;  %v1251_v34 = vmul.f32 %v8731_v42, %v7698_v1  ;;  %v544_v56 = vadd.f32 %v480_v2, %v7685_v36  ;;  %v8734_v16 = vld [vmem:[#allocation49_spill] sm:$0xff] }
 0x183   :  { %v1371_v23 = vmax.f32 %v1307_v48, 0.0  ;;  %v925_v51 = vadd.f32 %v861_v40, %v540_v18  ;;  %v479_v55 = vmul.f32 %v222_v12, %v7669_v26  ;;  %6180 = vmatpush3.bf16.msra.mxu1 %v6411_v49  ;;  %v1248_v37 = vmul.f32 %v8732_v59, %v7698_v1  ;;  %v8735_v40 = vld [vmem:[#allocation43_spill] sm:$0xff] }
 0x184   :  { %6236 = vmatmul.mubr.msk.bf16.gmra.mrb[4].mxu0 %vm1491_vm0, %v1429_v4  ;;  %6181 = vmatprep.subr.bf16.mxu1 %v6412_v57  ;;  %v1431_v6 = vpack.c.bf16 %v1373_v3, %v1372_v46  ;;  %v483_v44 = vmul.f32 %v8733_v61, %v7669_v26  ;;  %v1250_v52 = vmul.f32 %v8734_v16, %v7698_v1  ;;  %v1375_v24 = vmax.f32 %v1311_v0, 0.0  ;;  %v8738_v0 = vld [vmem:[#allocation46_spill] sm:$0xff] }
 0x185   :  { %v1310_v28 = vadd.f32 %v1246_v5, %v925_v51  ;;  %v543_v20 = vadd.f32 %v479_v55, %v7685_v36  ;;  %750 = vperm.xlu1 %6366, %v7347_v38   ;;  %v7912_v63 = vpop.permute.xlu1 %1063  ;;  %v1430_v13 = vpack.c.bf16 %v1371_v23, %v1370_v17  ;;  %v542_v38 = vadd.f32 %v478_v47, %v7685_v36  ;;  %v6415_v17 = vld [vmem:[%s8674_s3 + $0xb0] sm:$0xff]  }
 0x186   :  { %v232_v58 = vpop.permute.xlu0 %231  ;;  %v866_v48 = vmul.f32 %v8735_v40, %v7676_v29  ;;  %v8736_v4 = vmov 2   ;;  %v482_v2 = vmul.f32 %v8737_v32, %v7669_v26  ;;  %v929_v12 = vadd.f32 %v7766_v54, %v544_v56  ;;  %v6416_v54 = vld [vmem:[%s8674_s3 + $0xf8] sm:$0xff]   ;;  %v8740_v32 = vld [vmem:[#allocation26_spill] sm:$0xff] }
 0x187   :  { %v1374_v21 = vmax.f32 %v1310_v28, 0.0  ;;  %v928_v25 = vadd.f32 %v864_v50, %v543_v20  ;;  %v481_v5 = vmul.f32 %v232_v58, %v7669_v26  ;;  %6239 = vmatprep.mubr.msk.bf16.mxu0 %vm1491_vm0, %v1430_v13  ;;  %v927_v8 = vadd.f32 %v863_v7, %v542_v38  ;;  %6182 = vmatpush3.bf16.msra.mxu1 %v6413_v19  ;;  %v6417_v13 = vld [vmem:[%s8674_s3 + $0xb8] sm:$0xff]   ;;  %v8739_v19 = vld [vmem:[#allocation25_spill] sm:$0xff] }
 0x188   :  { %6183 = vmatprep.subr.bf16.mxu1 %v6414_v31  ;;  %v485_v23 = vmul.f32 %v7753_v60, %v7669_v26  ;;  %v547_v50 = vadd.f32 %v483_v44, %v7685_v36  ;;  %v867_v57 = vmul.f32 %v8738_v0, %v7676_v29  ;;  %v1314_v28 = vadd.f32 %v1250_v52, %v929_v12 }
 0x189   :  { %v545_v18 = vadd.f32 %v481_v5, %v7685_v36  ;;  %6367 = vset.pattern.permute.xlu1 %v8736_v4  ;;  %v7938_v49 = vpop.permute.xlu1 %1067  ;;  %v1313_v43 = vadd.f32 %v1249_v33, %v928_v25  ;;  %v1432_v3 = vpack.c.bf16 %v1375_v24, %v1374_v21  ;;  %v1312_v7 = vadd.f32 %v1248_v37, %v927_v8 }
 0x18a   :  { %1127 = vperm.xlu1 %6367, %v7797_v15   ;;  %v247_v47 = vpop.permute.xlu0 %246  ;;  %v869_v60 = vmul.f32 %v7827_v30, %v7676_v29  ;;  %v1254_v46 = vmul.f32 %v8739_v19, %v7698_v1  ;;  %v546_v11 = vadd.f32 %v482_v2, %v7685_v36  ;;  %v1253_v33 = vmul.f32 %v7720_v10, %v7698_v1  ;;  %v6418_v10 = vld [vmem:[%s8674_s3 + $0x100] sm:$0xff]  }
 0x18b   :  { %v930_v51 = vadd.f32 %v866_v48, %v545_v18  ;;  %v484_v55 = vmul.f32 %v247_v47, %v7669_v26  ;;  %6184 = vmatpush3.bf16.msra.mxu1 %v6415_v17  ;;  %v1377_v42 = vmax.f32 %v1313_v43, 0.0  ;;  %v549_v56 = vadd.f32 %v485_v23, %v7685_v36  ;;  %v6420_v18 = vld [vmem:[%s8674_s3 + $0x108] sm:$0xff]  }
 0x18c   :  { %6240 = vmatmul.mubr.msk.bf16.gmra.mrb[8].mxu0 %vm1491_vm0, %v1431_v6  ;;  %6185 = vmatprep.subr.bf16.mxu1 %v6416_v54  ;;  %v1376_v25 = vmax.f32 %v1312_v7, 0.0  ;;  %v1252_v5 = vmul.f32 %v7707_v45, %v7698_v1  ;;  %v932_v6 = vadd.f32 %v7770_v39, %v547_v50  ;;  %v1378_v59 = vmax.f32 %v1314_v28, 0.0  ;;  %v6419_v39 = vld [vmem:[%s8674_s3 + $0xc0] sm:$0xff]   ;;  %v6421_v23 = vld [vmem:[%s8674_s3 + $0xc8] sm:$0xff]   ;;  %v6422_v50 = vld [vmem:[%s8674_s3 + $0x110] sm:$0xff]  }
 0x18d   :  { %v1315_v15 = vadd.f32 %v1251_v34, %v930_v51  ;;  %v548_v20 = vadd.f32 %v484_v55, %v7685_v36  ;;  %6243 = vmatprep.mubr.msk.bf16.mxu0 %vm1491_vm0, %v1432_v3  ;;  %v1255_v37 = vmul.f32 %v7912_v63, %v7698_v1  ;;  %v934_v52 = vadd.f32 %v7782_v14, %v549_v56  ;;  %v7993_v63 = vld [vmem:[%s8671_s0 + $0x140] sm:$0xff]  ;;  %v8004_v14 = vld [vmem:[%s8671_s0 + $0x150] sm:$0xff] }
 0x18e   :  { %1131 = vperm.xlu1 %6367, %v7811_v62   ;;  %v7970_v30 = vpop.permute.xlu1 %266  ;;  %v262_v34 = vpop.permute.xlu0 %261  ;;  %v931_v62 = vadd.f32 %v867_v57, %v546_v11  ;;  %v1317_v61 = vadd.f32 %v1253_v33, %v932_v6  ;;  %v1433_v45 = vpack.c.bf16 %v1377_v42, %v1376_v25  ;;  %v486_v40 = vmul.f32 %v7788_v41, %v7669_v26  ;;  %v8021_v55 = vld [vmem:[%s8671_s0 + $0x1c0] sm:$0xff]  ;;  %v6934_v6 = vld [vmem:[%s8671_s0 + $0x148] sm:$0xff] }
 0x18f   :  { %v1379_v58 = vmax.f32 %v1315_v15, 0.0  ;;  %v933_v38 = vadd.f32 %v869_v60, %v548_v20  ;;  %v487_v21 = vmul.f32 %v262_v34, %v7669_v26  ;;  %6186 = vmatpush3.bf16.msra.mxu1 %v6417_v13  ;;  %v872_v48 = vmul.f32 %v7884_v27, %v7676_v29  ;;  %818 = vperm.xlu0 %6386, %v8021_v55   ;;  %v6423_v15 = vld [vmem:[%s8674_s3 + $0xd0] sm:$0xff]   ;;  %v8052_v34 = vld [vmem:[%s8671_s0 + $0x1d8] sm:$0xff] }
 0x190   :  { %6187 = vmatprep.subr.bf16.mxu1 %v6418_v10  ;;  %v1316_v24 = vadd.f32 %v1252_v5, %v931_v62  ;;  %v1319_v17 = vadd.f32 %v1255_v37, %v934_v52  ;;  %v1257_v41 = vmul.f32 %v8740_v32, %v7698_v1  ;;  %v1381_v2 = vmax.f32 %v1317_v61, 0.0  ;;  %v6426_v62 = vld [vmem:[%s8674_s3 + $0x160] sm:$0xff]   ;;  %v8742_v37 = vld [vmem:[#allocation27_spill] sm:$0xff] }
 0x191   :  { %v551_v44 = vadd.f32 %v487_v21, %v7685_v36  ;;  %v1318_v31 = vadd.f32 %v1254_v46, %v933_v38  ;;  %v1434_v8 = vpack.c.bf16 %v1379_v58, %v1378_v59  ;;  %v871_v27 = vmul.f32 %v7862_v53, %v7676_v29  ;;  %v6424_v46 = vld [vmem:[%s8674_s3 + $0x118] sm:$0xff]   ;;  %v2061_v59 = vld [vmem:[#allocation2 + $0x10] sm:$0xff] }
 0x192   :  { %6368 = vset.pattern.permute.xlu1 %v8702_v9  ;;  %v7984_v16 = vpop.permute.xlu1 %276  ;;  %v272_v47 = vpop.permute.xlu0 %271  ;;  %v1380_v3 = vmax.f32 %v1316_v24, 0.0  ;;  %v550_v53 = vadd.f32 %v486_v40, %v7685_v36  ;;  %v1256_v7 = vmul.f32 %v7938_v49, %v7698_v1  ;;  %v1383_v0 = vmax.f32 %v1319_v17, 0.0  ;;  %v8037_v49 = vld [vmem:[%s8671_s0 + $0x158] sm:$0xff]  ;;  %v6428_v40 = vld [vmem:[%s8674_s3 + $0x168] sm:$0xff]  }
 0x193   :  { %346 = vperm.xlu1 %6368, %v7993_v63   ;;  %v936_v12 = vadd.f32 %v872_v48, %v551_v44  ;;  %6188 = vmatpush3.bf16.msra.mxu1 %v6419_v39  ;;  %v1382_v51 = vmax.f32 %v1318_v31, 0.0  ;;  %v489_v57 = vmul.f32 %v272_v47, %v7669_v26  ;;  %v488_v11 = vmul.f32 %v7970_v30, %v7669_v26  ;;  %v6425_v58 = vld [vmem:[%s8674_s3 + $0xd8] sm:$0xff]   ;;  %v6427_v31 = vld [vmem:[%s8674_s3 + $0x120] sm:$0xff]  }
 0x194   :  { %6244 = vmatmul.mubr.msk.bf16.gmra.mrb[12].mxu0 %vm1491_vm0, %v1433_v45  ;;  %6189 = vmatprep.subr.bf16.mxu1 %v6420_v18  ;;  %v1435_v28 = vpack.c.bf16 %v1381_v2, %v1380_v3  ;;  %v935_v54 = vadd.f32 %v871_v27, %v550_v53  ;;  %v2062_v38 = vld [vmem:[#allocation2 + $0x18] sm:$0xff]  ;;  %v1259_v61 = vmul.f32 %v8742_v37, %v7698_v1  ;;  %v8743_v27 = vld [vmem:[#allocation16_spill] sm:$0xff] }
 0x195   :  { %6247 = vmatprep.mubr.msk.bf16.mxu0 %vm1491_vm0, %v1434_v8  ;;  %v1321_v60 = vadd.f32 %v1257_v41, %v936_v12  ;;  %v1436_v13 = vpack.c.bf16 %v1383_v0, %v1382_v51  ;;  %v553_v33 = vadd.f32 %v489_v57, %v7685_v36  ;;  %830 = vperm.xlu0 %6386, %v8052_v34   ;;  %v8741_v21 = vld [vmem:[#allocation15_spill] sm:$0xff] }
 0x196   :  { %v282_v43 = vpop.permute.xlu1 %281  ;;  %v1320_v19 = vadd.f32 %v1256_v7, %v935_v54  ;;  %v873_v25 = vmul.f32 %v8741_v21, %v7676_v29  ;;  %v2068_v10 = vpack.c.bf16 %v2062_v38, %v2062_v38  ;;  %v552_v44 = vadd.f32 %v488_v11, %v7685_v36  ;;  %v6432_v54 = vld [vmem:[%s8674_s3 + $0x178] sm:$0xff]   ;;  %v6437_v38 = vld [vmem:[%s8674_s3 + $0x148] sm:$0xff]   ;;  %v8133_v21 = vld [vmem:[%s8671_s0 + $0x170] sm:$0xff] }
 0x197   :  { %356 = vperm.xlu1 %6368, %v8004_v14   ;;  %6190 = vmatpush3.bf16.msra.mxu1 %v6421_v23  ;;  %v1385_v56 = vmax.f32 %v1321_v60, 0.0  ;;  %v2067_v39 = vpack.c.bf16 %v2061_v59, %v2061_v59  ;;  %v490_v8 = vmul.f32 %v7984_v16, %v7669_v26  ;;  %v491_v48 = vmul.f32 %v282_v43, %v7669_v26  ;;  %v6429_v16 = vld [vmem:[%s8674_s3 + $0x128] sm:$0xff]   ;;  %v6430_v23 = vld [vmem:[%s8674_s3 + $0x170] sm:$0xff]   ;;  %v6440_v37 = vld [vmem:[%s8674_s3 + $0x198] sm:$0xff]  }
 0x198   :  { %6191 = vmatprep.subr.bf16.mxu1 %v6422_v50  ;;  %v1384_v5 = vmax.f32 %v1320_v19, 0.0  ;;  %2528 = vmatprep.mubr.bf16.mxu1 %v2068_v10  ;;  %v937_v17 = vadd.f32 %v873_v25, %v552_v44  ;;  %v876_v12 = vmul.f32 %v8743_v27, %v7676_v29  ;;  %v6431_v50 = vld [vmem:[%s8674_s3 + $0x130] sm:$0xff]   ;;  %v6434_v19 = vld [vmem:[%s8674_s3 + $0x180] sm:$0xff]   ;;  %v287_v25 = vpop.permute.xlu0 %286 }
 0x199   :  { %v554_v47 = vadd.f32 %v490_v8, %v7685_v36  ;;  %v555_v51 = vadd.f32 %v491_v48, %v7685_v36  ;;  %v492_v59 = vmul.f32 %v287_v25, %v7669_v26 }
 0x19a   :  { %v1437_v52 = vpack.c.bf16 %v1385_v56, %v1384_v5  ;;  %v6438_v5 = vld [vmem:[%s8674_s3 + $0x190] sm:$0xff]  }
 0x19b   :  { %361 = vperm.xlu1 %6368, %v8037_v49   ;;  %v695_v20 = vpop.permute.xlu1 %694  ;;  %6192 = vmatpush3.bf16.msra.mxu1 %v6423_v15  ;;  %v940_v15 = vadd.f32 %v876_v12, %v555_v51 }
 0x19c   :  { %6248 = vmatmul.mubr.msk.bf16.gmra.mrb[16].mxu0 %vm1491_vm0, %v1435_v28  ;;  %v874_v42 = vmul.f32 %v695_v20, %v7676_v29  ;;  %6193 = vmatprep.subr.bf16.mxu1 %v6424_v46  ;;  %v302_v44 = vpop.permute.xlu0 %301 }
 0x19d   :  { %6251 = vmatprep.mubr.msk.bf16.mxu0 %vm1491_vm0, %v1436_v13 }
 0x19e   :  { %v938_v45 = vadd.f32 %v874_v42, %v553_v33  ;;  %v6435_v42 = vld [vmem:[%s8674_s3 + $0x140] sm:$0xff]  }
 0x19f   :  { %6369 = vset.pattern.permute.xlu1 %v8706_v22  ;;  %v699_v30 = vpop.permute.xlu1 %698  ;;  %6194 = vmatpush3.bf16.msra.mxu1 %v6425_v58  ;;  %v6436_v58 = vld [vmem:[%s8674_s3 + $0x188] sm:$0xff]  }
 0x1a0   :  { %758 = vperm.xlu1 %6369, %v6934_v6   ;;  %6201 = vmatprep.subr.bf16.mxu1 %v6426_v62  ;;  %v1323_v18 = vadd.f32 %v1259_v61, %v938_v45  ;;  %v875_v41 = vmul.f32 %v699_v30, %v7676_v29  ;;  %v8744_v30 = vld [vmem:[#allocation37_spill] sm:$0xff]  ;;  %v8745_v6 = vld [vmem:[#allocation31_spill] sm:$0xff]  ;;  %v6439_v62 = vld [vmem:[%s8674_s3 + $0x150] sm:$0xff]  }
 0x1a1   :  { %v8746_v61 = vld [vmem:[#allocation34_spill] sm:$0xff] }
 0x1a2   :  { %2529 = vmatmul.mubr.bf16.vlgmr.msra.gmra.mrb[4].mxu1 %v2067_v39  ;;  %v1387_v3 = vmax.f32 %v1323_v18, 0.0  ;;  %v939_v0 = vadd.f32 %v875_v41, %v554_v47  ;;  %v6441_v39 = vld [vmem:[%s8674_s3 + $0x158] sm:$0xff]   ;;  %v495_v18 = vmul.f32 %v302_v44, %v7669_v26  ;;  %v8747_v41 = vld [vmem:[#allocation28_spill] sm:$0xff] }
 0x1a3   :  { %6202 = vmatpush3.bf16.msra.mxu1 %v6427_v31  ;;  %v556_v31 = vadd.f32 %v492_v59, %v7685_v36  ;;  %v312_v59 = vpop.permute.xlu0 %311 }
 0x1a4   :  { %762 = vperm.xlu1 %6369, %v8004_v14   ;;  %v1076_v24 = vpop.permute.xlu1 %1075  ;;  %6252 = vmatmul.mubr.msk.bf16.gmra.mrb[20].mxu0 %vm1491_vm0, %v1437_v52  ;;  %v2064_v52 = vld [vmem:[#allocation2 + $0x28] sm:$0xff]  ;;  %v559_v47 = vadd.f32 %v495_v18, %v7685_v36  ;;  %v8753_v18 = vld [vmem:[#allocation18_spill] sm:$0xff] }
 0x1a5   :  { %v1258_v32 = vmul.f32 %v1076_v24, %v7698_v1  ;;  %6203 = vmatprep.subr.bf16.mxu1 %v6428_v40  ;;  %v6935_v24 = vld [vmem:[%s8671_s0 + $0x160] sm:$0xff] }
 0x1a6   :  { %v2063_v40 = vld [vmem:[#allocation2 + $0x20] sm:$0xff] }
 0x1a7   :  { %v1322_v2 = vadd.f32 %v1258_v32, %v937_v17  ;;  %6204 = vmatpush3.bf16.msra.mxu1 %v6429_v16  ;;  %v2070_v17 = vpack.c.bf16 %v2064_v52, %v2064_v52  ;;  %v2069_v32 = vpack.c.bf16 %v2063_v40, %v2063_v40 }
 0x1a8   :  { %6371 = vset.pattern.permute.xlu1 %v8736_v4  ;;  %v1084_v43 = vpop.permute.xlu1 %1083  ;;  %6205 = vmatprep.subr.bf16.mxu1 %v6430_v23  ;;  %v8748_v23 = vld [vmem:[#allocation17_spill] sm:$0xff] }
 0x1a9   :  { %v1386_v53 = vmax.f32 %v1322_v2, 0.0  ;;  %v1260_v7 = vmul.f32 %v1084_v43, %v7698_v1  ;;  %1139 = vperm.xlu1 %6371, %v7993_v63   ;;  %v6433_v63 = vld [vmem:[%s8674_s3 + $0x138] sm:$0xff]   ;;  %2568 = vmatprep.mubr.bf16.mxu1 %v2070_v17  ;;  %v1262_v2 = vmul.f32 %v8747_v41, %v7698_v1  ;;  %v878_v51 = vmul.f32 %v8748_v23, %v7676_v29 }
 0x1aa   :  { %v881_v17 = vmul.f32 %v8753_v18, %v7676_v29 }
 0x1ab   :  { %v1438_v57 = vpack.c.bf16 %v1387_v3, %v1386_v53  ;;  %v1324_v60 = vadd.f32 %v1260_v7, %v939_v0  ;;  %6206 = vmatpush3.bf16.msra.mxu1 %v6431_v50  ;;  %v8749_v53 = vld [vmem:[#allocation29_spill] sm:$0xff]  ;;  %v6936_v0 = vld [vmem:[%s8671_s0 + $0x178] sm:$0xff] }
 0x1ac   :  { %v1088_v28 = vpop.permute.xlu1 %1087  ;;  %6207 = vmatprep.subr.bf16.mxu1 %v6432_v54  ;;  %v1265_v7 = vmul.f32 %v8749_v53, %v7698_v1 }
 0x1ad   :  { %v1261_v20 = vmul.f32 %v1088_v28, %v7698_v1  ;;  %1147 = vperm.xlu1 %6371, %v8004_v14   ;;  %6255 = vmatprep.mubr.msk.bf16.mxu0 %vm1491_vm0, %v1438_v57  ;;  %v1388_v46 = vmax.f32 %v1324_v60, 0.0  ;;  %v8115_v14 = vld [vmem:[%s8671_s0 + $0x1e8] sm:$0xff] }
 0x1ae   :  { %838 = vperm.xlu0 %6386, %v8115_v14  }
 0x1af   :  { %v1325_v13 = vadd.f32 %v1261_v20, %v940_v15  ;;  %6208 = vmatpush3.bf16.msra.mxu1 %v6433_v63 }
 0x1b0   :  { %6209 = vmatprep.subr.bf16.mxu1 %v6434_v19 }
 0x1b1   :  { %v1389_v11 = vmax.f32 %v1325_v13, 0.0  ;;  %1151 = vperm.xlu1 %6371, %v8037_v49   ;;  %v292_v33 = vpop.permute.xlu1 %291 }
 0x1b2   :  { %6388 = vset.pattern.permute.xlu0 %v8736_v4  ;;  %v493_v48 = vmul.f32 %v292_v33, %v7669_v26 }
 0x1b3   :  { %v1439_v56 = vpack.c.bf16 %v1389_v11, %v1388_v46  ;;  %6210 = vmatpush3.bf16.msra.mxu1 %v6435_v42  ;;  %1219 = vperm.xlu0 %6388, %v8745_v6  }
 0x1b4   :  { %6211 = vmatprep.subr.bf16.mxu1 %v6436_v58  ;;  %v557_v12 = vadd.f32 %v493_v48, %v7685_v36 }
 0x1b5   :  { %6372 = vset.pattern.permute.xlu1 %v8702_v9  ;;  %v297_v49 = vpop.permute.xlu1 %296  ;;  %6256 = vmatmul.mubr.msk.bf16.gmra.mrb[24].mxu0 %vm1491_vm0, %v1439_v56 }
 0x1b6   :  { %371 = vperm.xlu1 %6372, %v8744_v30   ;;  %v494_v3 = vmul.f32 %v297_v49, %v7669_v26  ;;  %v942_v60 = vadd.f32 %v878_v51, %v557_v12 }
 0x1b7   :  { %6212 = vmatpush3.bf16.msra.mxu1 %v6437_v38  ;;  %1231 = vperm.xlu0 %6388, %v8746_v61  }
 0x1b8   :  { %6213 = vmatprep.subr.bf16.mxu1 %v6438_v5  ;;  %v558_v20 = vadd.f32 %v494_v3, %v7685_v36 }
 0x1ba   :  { %376 = vperm.xlu1 %6372, %v8133_v21   ;;  %v707_v10 = vpop.permute.xlu1 %706 }
 0x1bb   :  { %6214 = vmatpush3.bf16.msra.mxu1 %v6439_v62  ;;  %v877_v8 = vmul.f32 %v707_v10, %v7676_v29  ;;  %v8750_v10 = vld [vmem:[#allocation42_spill] sm:$0xff] }
 0x1bc   :  { %6215 = vmatprep.subr.bf16.mxu1 %v6440_v37  ;;  %v8751_v37 = vld [vmem:[#allocation45_spill] sm:$0xff] }
 0x1bd   :  { %v941_v27 = vadd.f32 %v877_v8, %v556_v31  ;;  %v6937_v31 = vld [vmem:[%s8671_s0 + $0x188] sm:$0xff]  ;;  %v8752_v8 = vld [vmem:[#allocation30_spill] sm:$0xff] }
 0x1be   :  { %6373 = vset.pattern.permute.xlu1 %v8706_v22  ;;  %v715_v45 = vpop.permute.xlu1 %714 }
 0x1bf   :  { %770 = vperm.xlu1 %6373, %v6935_v24   ;;  %6216 = vmatpush3.bf16.msra.mxu1 %v6441_v39  ;;  %v1326_v50 = vadd.f32 %v1262_v2, %v941_v27  ;;  %v879_v28 = vmul.f32 %v715_v45, %v7676_v29  ;;  %v1267_v24 = vmul.f32 %v8752_v8, %v7698_v1 }
 0x1c1   :  { %v1390_v13 = vmax.f32 %v1326_v50, 0.0  ;;  %v943_v46 = vadd.f32 %v879_v28, %v558_v20 }
 0x1c2   :  { %v719_v16 = vpop.permute.xlu1 %718  ;;  %2569 = vmatmul.mubr.bf16.vlgmr.msra.gmra.mrb[8].mxu1 %v2069_v32 }
 0x1c3   :  { %778 = vperm.xlu1 %6373, %v8133_v21   ;;  %v880_v43 = vmul.f32 %v719_v16, %v7676_v29  ;;  %3043 = vmatprep.mubr.bf16.mxu1 %v8702_v9 }
 0x1c5   :  { %v944_v54 = vadd.f32 %v880_v43, %v559_v47 }
 0x1c7   :  { %782 = vperm.xlu1 %6373, %v6936_v0   ;;  %v1096_v57 = vpop.permute.xlu1 %1095  ;;  %v1329_v11 = vadd.f32 %v1265_v7, %v944_v54  ;;  %v8754_v0 = vld [vmem:[#allocation19_spill] sm:$0xff] }
 0x1c8   :  { %v1263_v15 = vmul.f32 %v1096_v57, %v7698_v1  ;;  %v884_v57 = vmul.f32 %v8754_v0, %v7676_v29 }
 0x1c9   :  { %v1393_v49 = vmax.f32 %v1329_v11, 0.0 }
 0x1ca   :  { %v1327_v63 = vadd.f32 %v1263_v15, %v942_v60 }
 0x1cb   :  { %6374 = vset.pattern.permute.xlu1 %v8736_v4  ;;  %v1100_v19 = vpop.permute.xlu1 %1099 }
 0x1cc   :  { %v1391_v33 = vmax.f32 %v1327_v63, 0.0  ;;  %v1264_v42 = vmul.f32 %v1100_v19, %v7698_v1  ;;  %1159 = vperm.xlu1 %6374, %v8744_v30   ;;  %v128_v30 = vld [vmem:[%s8671_s0 + $0x190] sm:$0xff] }
 0x1ce   :  { %v1440_v56 = vpack.c.bf16 %v1391_v33, %v1390_v13  ;;  %v1328_v58 = vadd.f32 %v1264_v42, %v943_v46  ;;  %v6939_v46 = vld [vmem:[%s8671_s0 + $0x198] sm:$0xff]  ;;  %v327_v42 = vpop.permute.xlu0 %326 }
 0x1d0   :  { %v1392_v38 = vmax.f32 %v1328_v58, 0.0  ;;  %1163 = vperm.xlu1 %6374, %v8133_v21   ;;  %v307_v25 = vpop.permute.xlu1 %306  ;;  %6259 = vmatprep.mubr.msk.bf16.mxu0 %vm1491_vm0, %v1440_v56  ;;  %v497_v21 = vmul.f32 %v312_v59, %v7669_v26  ;;  %v8227_v58 = vld [vmem:[#allocation5 + $0x7] ss:$0 sm:$0xff] }
 0x1d1   :  { %v496_v44 = vmul.f32 %v307_v25, %v7669_v26 }
 0x1d2   :  { %v1441_v5 = vpack.c.bf16 %v1393_v49, %v1392_v38  ;;  %v561_v45 = vadd.f32 %v497_v21, %v7685_v36  ;;  %v500_v49 = vmul.f32 %v8227_v58, %v327_v42  ;;  %v342_v38 = vpop.permute.xlu0 %341 }
 0x1d3   :  { %v560_v40 = vadd.f32 %v496_v44, %v7685_v36  ;;  %v503_v21 = vmul.f32 %v8227_v58, %v342_v38 }
 0x1d4   :  { %6375 = vset.pattern.permute.xlu1 %v8702_v9  ;;  %v317_v6 = vpop.permute.xlu1 %316  ;;  %6260 = vmatmul.mubr.msk.bf16.gmra.mrb[28].mxu0 %vm1491_vm0, %v1441_v5  ;;  %v8231_v5 = vld [vmem:[#allocation5] ss:$0 sm:$0xff] }
 0x1d5   :  { %386 = vperm.xlu1 %6375, %v8750_v10   ;;  %v498_v32 = vmul.f32 %v317_v6, %v7669_v26  ;;  %v945_v27 = vadd.f32 %v881_v17, %v560_v40  ;;  %v564_v6 = vadd.f32 %v8231_v5, %v500_v49  ;;  %v8234_v10 = vld [vmem:[#allocation5 + $0x40] ss:$0 sm:$0xff]  ;;  %v6945_v17 = vld [vmem:[%s8671_s0 + $0x1b8] sm:$0xff]  ;;  %v6946_v49 = vld [vmem:[%s8671_s0 + $0x1c8] sm:$0xff] }
 0x1d6   :  { %v352_v0 = vpop.permute.xlu0 %351 }
 0x1d7   :  { %v562_v23 = vadd.f32 %v498_v32, %v7685_v36 }
 0x1d8   :  { %v322_v62 = vpop.permute.xlu1 %321 }
 0x1d9   :  { %396 = vperm.xlu1 %6375, %v128_v30   ;;  %v499_v41 = vmul.f32 %v322_v62, %v7669_v26  ;;  %v6938_v26 = vld [vmem:[%s8671_s0 + $0x180] sm:$0xff] }
 0x1da   :  { %v6943_v62 = vld [vmem:[%s8671_s0 + $0x1a0] sm:$0xff] }
 0x1db   :  { %v563_v3 = vadd.f32 %v499_v41, %v7685_v36 }
 0x1dd   :  { %401 = vperm.xlu1 %6375, %v8751_v37   ;;  %v727_v61 = vpop.permute.xlu1 %726  ;;  %v948_v20 = vadd.f32 %v884_v57, %v563_v3 }
 0x1de   :  { %v882_v39 = vmul.f32 %v727_v61, %v7676_v29 }
 0x1e0   :  { %v946_v48 = vadd.f32 %v882_v39, %v561_v45  ;;  %v567_v45 = vadd.f32 %v8231_v5, %v503_v21 }
 0x1e1   :  { %6376 = vset.pattern.permute.xlu1 %v8706_v22  ;;  %v731_v52 = vpop.permute.xlu1 %730 }
 0x1e2   :  { %790 = vperm.xlu1 %6376, %v6937_v31   ;;  %v1331_v2 = vadd.f32 %v1267_v24, %v946_v48  ;;  %v883_v47 = vmul.f32 %v731_v52, %v7676_v29  ;;  %v8245_v52 = vld [vmem:[#allocation5 + $0x41] ss:$0 sm:$0xff]  ;;  %v8755_v31 = vld [vmem:[#allocation32_spill] sm:$0xff] }
 0x1e3   :  { %v1270_v8 = vmul.f32 %v8245_v52, %v8755_v31  ;;  %v8756_v24 = vld [vmem:[#allocation20_spill] sm:$0xff] }
 0x1e4   :  { %v1395_v53 = vmax.f32 %v1331_v2, 0.0  ;;  %v947_v28 = vadd.f32 %v883_v47, %v562_v23  ;;  %v886_v40 = vmul.f32 %v8234_v10, %v8756_v24 }
 0x1e6   :  { %794 = vperm.xlu1 %6376, %v128_v30   ;;  %v1108_v16 = vpop.permute.xlu1 %1107 }
 0x1e7   :  { %v1266_v12 = vmul.f32 %v1108_v16, %v7698_v1 }
 0x1e9   :  { %v1330_v43 = vadd.f32 %v1266_v12, %v945_v27  ;;  %v8757_v12 = vld [vmem:[#allocation35_spill] sm:$0xff] }
 0x1ea   :  { %6377 = vset.pattern.permute.xlu1 %v8736_v4  ;;  %v1116_v51 = vpop.permute.xlu1 %1115  ;;  %v1273_v47 = vmul.f32 %v8245_v52, %v8757_v12 }
 0x1eb   :  { %v1394_v7 = vmax.f32 %v1330_v43, 0.0  ;;  %v1268_v50 = vmul.f32 %v1116_v51, %v7698_v1  ;;  %1171 = vperm.xlu1 %6377, %v6938_v26  }
 0x1ed   :  { %v1442_v54 = vpack.c.bf16 %v1395_v53, %v1394_v7  ;;  %v1332_v15 = vadd.f32 %v1268_v50, %v947_v28 }
 0x1ee   :  { %v1120_v60 = vpop.permute.xlu1 %1119 }
 0x1ef   :  { %v1269_v63 = vmul.f32 %v1120_v60, %v7698_v1  ;;  %1179 = vperm.xlu1 %6377, %v128_v30   ;;  %6263 = vmatprep.mubr.msk.bf16.mxu0 %vm1491_vm0, %v1442_v54  ;;  %v1396_v13 = vmax.f32 %v1332_v15, 0.0  ;;  %v132_v1 = vld [vmem:[%s8671_s0 + $0x1b0] sm:$0xff] }
 0x1f1   :  { %v1333_v36 = vadd.f32 %v1269_v63, %v948_v20  ;;  %v8264_v63 = vpop.permute.xlu0 %366 }
 0x1f3   :  { %v1397_v19 = vmax.f32 %v1333_v36, 0.0  ;;  %1183 = vperm.xlu1 %6377, %v6939_v46   ;;  %v332_v11 = vpop.permute.xlu1 %331  ;;  %v505_v46 = vmul.f32 %v8227_v58, %v352_v0 }
 0x1f4   :  { %v501_v59 = vmul.f32 %v8227_v58, %v332_v11 }
 0x1f5   :  { %v1443_v29 = vpack.c.bf16 %v1397_v19, %v1396_v13  ;;  %v8272_v19 = vpop.permute.xlu0 %381 }
 0x1f6   :  { %v565_v44 = vadd.f32 %v8231_v5, %v501_v59 }
 0x1f7   :  { %6378 = vset.pattern.permute.xlu1 %v8702_v9  ;;  %v337_v33 = vpop.permute.xlu1 %336  ;;  %6264 = vmatmul.mubr.msk.bf16.gmra.mrb[32].mxu0 %vm1491_vm0, %v1443_v29 }
 0x1f8   :  { %411 = vperm.xlu1 %6378, %v7832_v35   ;;  %v502_v48 = vmul.f32 %v8227_v58, %v337_v33  ;;  %v950_v2 = vadd.f32 %v886_v40, %v565_v44  ;;  %v569_v33 = vadd.f32 %v8231_v5, %v505_v46  ;;  %v511_v46 = vmul.f32 %v8227_v58, %v8272_v19 }
 0x1f9   :  { %v8279_v42 = vpop.permute.xlu0 %391 }
 0x1fa   :  { %v566_v43 = vadd.f32 %v8231_v5, %v502_v48 }
 0x1fc   :  { %416 = vperm.xlu1 %6378, %v132_v1   ;;  %v739_v56 = vpop.permute.xlu1 %738 }
 0x1fd   :  { %v885_v30 = vmul.f32 %v8234_v10, %v739_v56  ;;  %v8290_v21 = vpop.permute.xlu0 %406 }
 0x1ff   :  { %v949_v61 = vadd.f32 %v885_v30, %v564_v6  ;;  %v8758_v6 = vld [vmem:[#allocation21_spill] sm:$0xff] }
 0x200   :  { %6379 = vset.pattern.permute.xlu1 %v8706_v22  ;;  %v747_v25 = vpop.permute.xlu1 %746  ;;  %v889_v30 = vmul.f32 %v8234_v10, %v8758_v6 }
 0x201   :  { %802 = vperm.xlu1 %6379, %v6943_v62   ;;  %v1334_v18 = vadd.f32 %v1270_v8, %v949_v61  ;;  %v887_v16 = vmul.f32 %v8234_v10, %v747_v25  ;;  %v8759_v62 = vld [vmem:[#allocation36_spill] sm:$0xff] }
 0x202   :  { %v1275_v59 = vmul.f32 %v8245_v52, %v8759_v62 }
 0x203   :  { %v1398_v51 = vmax.f32 %v1334_v18, 0.0  ;;  %v951_v53 = vadd.f32 %v887_v16, %v566_v43 }
 0x204   :  { %v751_v37 = vpop.permute.xlu1 %750 }
 0x205   :  { %810 = vperm.xlu1 %6379, %v132_v1   ;;  %v888_v39 = vmul.f32 %v8234_v10, %v751_v37 }
 0x207   :  { %v952_v41 = vadd.f32 %v888_v39, %v567_v45 }
 0x209   :  { %814 = vperm.xlu1 %6379, %v6945_v17   ;;  %v1128_v32 = vpop.permute.xlu1 %1127  ;;  %v1337_v7 = vadd.f32 %v1273_v47, %v952_v41 }
 0x20a   :  { %v1271_v27 = vmul.f32 %v8245_v52, %v1128_v32  ;;  %v8299_v32 = vpop.permute.xlu0 %421 }
 0x20b   :  { %v1401_v54 = vmax.f32 %v1337_v7, 0.0 }
 0x20c   :  { %v1335_v23 = vadd.f32 %v1271_v27, %v950_v2  ;;  %v8760_v2 = vld [vmem:[#allocation22_spill] sm:$0xff] }
 0x20d   :  { %6380 = vset.pattern.permute.xlu1 %v8736_v4  ;;  %v1132_v3 = vpop.permute.xlu1 %1131  ;;  %v892_v27 = vmul.f32 %v8234_v10, %v8760_v2 }
 0x20e   :  { %v1399_v50 = vmax.f32 %v1335_v23, 0.0  ;;  %v1272_v26 = vmul.f32 %v8245_v52, %v1132_v3  ;;  %1191 = vperm.xlu1 %6380, %v7832_v35   ;;  %v136_v35 = vld [vmem:[%s8671_s0 + $0x1d0] sm:$0xff] }
 0x210   :  { %v1444_v57 = vpack.c.bf16 %v1399_v50, %v1398_v51  ;;  %v1336_v28 = vadd.f32 %v1272_v26, %v951_v53  ;;  %v8307_v53 = vpop.permute.xlu0 %431 }
 0x212   :  { %v1400_v60 = vmax.f32 %v1336_v28, 0.0  ;;  %1195 = vperm.xlu1 %6380, %v132_v1   ;;  %v347_v15 = vpop.permute.xlu1 %346  ;;  %6267 = vmatprep.mubr.msk.bf16.mxu0 %vm1491_vm0, %v1444_v57 }
 0x213   :  { %v504_v29 = vmul.f32 %v8227_v58, %v347_v15 }
 0x214   :  { %v1445_v20 = vpack.c.bf16 %v1401_v54, %v1400_v60  ;;  %v8310_v57 = vpop.permute.xlu0 %446  ;;  %v140_v54 = vld [vmem:[%s8671_s0 + $0x1f0] sm:$0xff] }
 0x215   :  { %v568_v38 = vadd.f32 %v8231_v5, %v504_v29 }
 0x216   :  { %6381 = vset.pattern.permute.xlu1 %v8702_v9  ;;  %v357_v36 = vpop.permute.xlu1 %356  ;;  %6268 = vmatmul.mubr.msk.bf16.gmra.mrb[36].mxu0 %vm1491_vm0, %v1445_v20 }
 0x217   :  { %426 = vperm.xlu1 %6381, %v8021_v55   ;;  %v506_v37 = vmul.f32 %v8227_v58, %v357_v36  ;;  %v953_v39 = vadd.f32 %v889_v30, %v568_v38  ;;  %v8761_v38 = vld [vmem:[#allocation39_spill] sm:$0xff] }
 0x218   :  { %v8320_v15 = vpop.permute.xlu0 %461  ;;  %v6948_v30 = vld [vmem:[%s8671_s0 + $0x1f8] sm:$0xff] }
 0x219   :  { %v570_v40 = vadd.f32 %v8231_v5, %v506_v37 }
 0x21a   :  { %v362_v13 = vpop.permute.xlu1 %361 }
 0x21b   :  { %436 = vperm.xlu1 %6381, %v136_v35   ;;  %v507_v44 = vmul.f32 %v8227_v58, %v362_v13  ;;  %v6947_v13 = vld [vmem:[%s8671_s0 + $0x1e0] sm:$0xff]  ;;  %s7081_s0 = smov [#allocation10]  }
 0x21d   :  { %v571_v18 = vadd.f32 %v8231_v5, %v507_v44 }
 0x21f   :  { %441 = vperm.xlu1 %6381, %v8052_v34   ;;  %v759_v11 = vpop.permute.xlu1 %758  ;;  %v956_v51 = vadd.f32 %v892_v27, %v571_v18 }
 0x220   :  { %v890_v1 = vmul.f32 %v8234_v10, %v759_v11 }
 0x222   :  { %v954_v25 = vadd.f32 %v890_v1, %v569_v33 }
 0x223   :  { %6382 = vset.pattern.permute.xlu1 %v8706_v22  ;;  %v763_v56 = vpop.permute.xlu1 %762 }
 0x224   :  { %822 = vperm.xlu1 %6382, %v6946_v49   ;;  %v1339_v45 = vadd.f32 %v1275_v59, %v954_v25  ;;  %v891_v8 = vmul.f32 %v8234_v10, %v763_v56  ;;  %v1278_v25 = vmul.f32 %v8245_v52, %v8761_v38 }
 0x226   :  { %v1403_v17 = vmax.f32 %v1339_v45, 0.0  ;;  %v955_v12 = vadd.f32 %v891_v8, %v570_v40  ;;  %v8762_v45 = vld [vmem:[#allocation41_spill] sm:$0xff] }
 0x228   :  { %826 = vperm.xlu1 %6382, %v136_v35   ;;  %v1140_v61 = vpop.permute.xlu1 %1139 }
 0x229   :  { %v1274_v31 = vmul.f32 %v8245_v52, %v1140_v61 }
 0x22b   :  { %v1338_v24 = vadd.f32 %v1274_v31, %v953_v39  ;;  %v1281_v39 = vmul.f32 %v8245_v52, %v8762_v45 }
 0x22c   :  { %6383 = vset.pattern.permute.xlu1 %v8736_v4  ;;  %v1148_v48 = vpop.permute.xlu1 %1147 }
 0x22d   :  { %v1402_v16 = vmax.f32 %v1338_v24, 0.0  ;;  %v1276_v41 = vmul.f32 %v8245_v52, %v1148_v48  ;;  %1203 = vperm.xlu1 %6383, %v8021_v55  }
 0x22f   :  { %v1446_v47 = vpack.c.bf16 %v1403_v17, %v1402_v16  ;;  %v1340_v23 = vadd.f32 %v1276_v41, %v955_v12 }
 0x230   :  { %v1152_v43 = vpop.permute.xlu1 %1151 }
 0x231   :  { %v1277_v3 = vmul.f32 %v8245_v52, %v1152_v43  ;;  %1211 = vperm.xlu1 %6383, %v136_v35   ;;  %6271 = vmatprep.mubr.msk.bf16.mxu0 %vm1491_vm0, %v1446_v47  ;;  %v1404_v50 = vmax.f32 %v1340_v23, 0.0  ;;  %v8349_v23 = vld [vmem:[#allocation5 + $0x1] ss:$0 sm:$0xff] }
 0x233   :  { %v1341_v7 = vadd.f32 %v1277_v3, %v956_v51 }
 0x235   :  { %v1405_v26 = vmax.f32 %v1341_v7, 0.0  ;;  %1215 = vperm.xlu1 %6383, %v8052_v34   ;;  %v372_v55 = vpop.permute.xlu1 %371  ;;  %v508_v34 = vmul.f32 %v8227_v58, %v8264_v63  ;;  %v775_v63 = vpop.permute.xlu0 %774 }
 0x236   :  { %v509_v11 = vmul.f32 %v8227_v58, %v372_v55  ;;  %v894_v56 = vmul.f32 %v8234_v10, %v775_v63 }
 0x237   :  { %v1447_v0 = vpack.c.bf16 %v1405_v26, %v1404_v50  ;;  %v572_v36 = vadd.f32 %v8231_v5, %v508_v34 }
 0x238   :  { %v573_v1 = vadd.f32 %v8231_v5, %v509_v11 }
 0x239   :  { %6385 = vset.pattern.permute.xlu1 %v8702_v9  ;;  %v377_v28 = vpop.permute.xlu1 %376  ;;  %6272 = vmatmul.mubr.msk.bf16.gmra.mrb[40].mxu0 %vm1491_vm0, %v1447_v0 }
 0x23a   :  { %451 = vperm.xlu1 %6385, %v8115_v14   ;;  %v510_v6 = vmul.f32 %v8227_v58, %v377_v28  ;;  %v958_v59 = vadd.f32 %v894_v56, %v573_v1 }
 0x23c   :  { %v574_v31 = vadd.f32 %v8231_v5, %v510_v6 }
 0x23e   :  { %456 = vperm.xlu1 %6385, %v140_v54   ;;  %v771_v60 = vpop.permute.xlu1 %770 }
 0x23f   :  { %v893_v35 = vmul.f32 %v8234_v10, %v771_v60 }
 0x241   :  { %v957_v33 = vadd.f32 %v893_v35, %v572_v36 }
 0x242   :  { %6387 = vset.pattern.permute.xlu1 %v8706_v22  ;;  %v779_v20 = vpop.permute.xlu1 %778  ;;  %v575_v22 = vadd.f32 %v8231_v5, %v511_v46 }
 0x243   :  { %834 = vperm.xlu1 %6387, %v6947_v13   ;;  %v1342_v19 = vadd.f32 %v1278_v25, %v957_v33  ;;  %v895_v37 = vmul.f32 %v8234_v10, %v779_v20 }
 0x245   :  { %v1406_v24 = vmax.f32 %v1342_v19, 0.0  ;;  %v959_v18 = vadd.f32 %v895_v37, %v574_v31  ;;  %v513_v37 = vmul.f32 %v8227_v58, %v8279_v42 }
 0x246   :  { %v783_v29 = vpop.permute.xlu1 %782 }
 0x247   :  { %842 = vperm.xlu1 %6387, %v140_v54   ;;  %v896_v49 = vmul.f32 %v8234_v10, %v783_v29 }
 0x249   :  { %v960_v61 = vadd.f32 %v896_v49, %v575_v22 }
 0x24b   :  { %846 = vperm.xlu1 %6387, %v6948_v30   ;;  %v1160_v62 = vpop.permute.xlu1 %1159  ;;  %v1345_v17 = vadd.f32 %v1281_v39, %v960_v61  ;;  %v787_v61 = vpop.permute.xlu0 %786 }
 0x24c   :  { %v1279_v44 = vmul.f32 %v8245_v52, %v1160_v62 }
 0x24d   :  { %v1409_v51 = vmax.f32 %v1345_v17, 0.0  ;;  %v577_v17 = vadd.f32 %v8231_v5, %v513_v37 }
 0x24e   :  { %v1343_v8 = vadd.f32 %v1279_v44, %v958_v59 }
 0x24f   :  { %6389 = vset.pattern.permute.xlu1 %v8736_v4  ;;  %v1164_v40 = vpop.permute.xlu1 %1163  ;;  %v6233_v48 = vpop.f32.mrb[0].mxu0 }
 0x250   :  { %v1407_v16 = vmax.f32 %v1343_v8, 0.0  ;;  %v1280_v41 = vmul.f32 %v8245_v52, %v1164_v40  ;;  %1223 = vperm.xlu1 %6389, %v8115_v14   ;;  %v1622_v2 = vpop.f32.mrb[1].mxu0  ;;  %v1631_v50 = vadd.f32 %v6233_v48, %v8349_v23 }
 0x251   :  { %v6234_v27 = vpop.f32.mrb[2].mxu0  ;;  %v1623_v26 = vadd.f32 %v1622_v2, %v8349_v23 }
 0x252   :  { %v1448_v12 = vpack.c.bf16 %v1407_v16, %v1406_v24  ;;  %v1344_v47 = vadd.f32 %v1280_v41, %v959_v18  ;;  %v1625_v43 = vpop.f32.mrb[3].mxu0  ;;  %v1634_v14 = vadd.f32 %v6234_v27, %v8349_v23  ;;  %v1879_v36 = vsel %vm1491_vm0, %v1631_v50, -inf }
 0x253   :  { %v1626_v34 = vadd.f32 %v1625_v43, %v8349_v23  ;;  %v1877_v11 = vsel %vm1491_vm0, %v1623_v26, -inf  ;;  %v897_v18 = vmul.f32 %v8234_v10, %v787_v61 }
 0x254   :  { %v1408_v3 = vmax.f32 %v1344_v47, 0.0  ;;  %1227 = vperm.xlu1 %6389, %v140_v54   ;;  %v387_v4 = vpop.permute.xlu1 %386  ;;  %6275 = vmatprep.mubr.msk.bf16.mxu0 %vm1491_vm0, %v1448_v12  ;;  %v1880_v22 = vsel %vm1491_vm0, %v1634_v14, -inf  ;;  %v8763_v12 = vld [vmem:[#allocation44_spill] sm:$0xff] }
 0x255   :  { %v1878_v38 = vsel %vm1491_vm0, %v1626_v34, -inf  ;;  %v512_v30 = vmul.f32 %v8227_v58, %v387_v4  ;;  %v1283_v47 = vmul.f32 %v8245_v52, %v8763_v12 }
 0x256   :  { %v1449_v7 = vpack.c.bf16 %v1409_v51, %v1408_v3 }
 0x257   :  { %v6237_v55 = vpop.f32.mrb[4].mxu0  ;;  %v576_v48 = vadd.f32 %v8231_v5, %v512_v30 }
 0x258   :  { %v1647_v0 = vadd.f32 %v6237_v55, %v8349_v23  ;;  %v397_v28 = vpop.permute.xlu1 %396  ;;  %v1638_v60 = vpop.f32.mrb[5].mxu0  ;;  %6276 = vmatmul.mubr.msk.bf16.gmra.mrb[44].mxu0 %vm1491_vm0, %v1449_v7 }
 0x259   :  { %v1639_v54 = vadd.f32 %v1638_v60, %v8349_v23  ;;  %v6238_v20 = vpop.f32.mrb[6].mxu0  ;;  %v961_v43 = vadd.f32 %v897_v18, %v576_v48  ;;  %v514_v3 = vmul.f32 %v8227_v58, %v397_v28 }
 0x25a   :  { %v1885_v35 = vsel %vm1491_vm0, %v1647_v0, -inf  ;;  %v1650_v13 = vadd.f32 %v6238_v20, %v8349_v23  ;;  %v1641_v46 = vpop.f32.mrb[7].mxu0 }
 0x25b   :  { %v1886_v63 = vmax.f32 %v1879_v36, %v1885_v35  ;;  %v1881_v29 = vsel %vm1491_vm0, %v1639_v54, -inf  ;;  %v1642_v33 = vadd.f32 %v1641_v46, %v8349_v23  ;;  %v799_v46 = vpop.permute.xlu0 %798  ;;  %v578_v30 = vadd.f32 %v8231_v5, %v514_v3 }
 0x25c   :  { %v1882_v1 = vmax.f32 %v1877_v11, %v1881_v29  ;;  %v1887_v56 = vsel %vm1491_vm0, %v1650_v13, -inf  ;;  %v402_v49 = vpop.permute.xlu1 %401 }
 0x25d   :  { %v1888_v25 = vmax.f32 %v1880_v22, %v1887_v56  ;;  %v1883_v6 = vsel %vm1491_vm0, %v1642_v33, -inf  ;;  %v515_v55 = vmul.f32 %v8227_v58, %v402_v49 }
 0x25e   :  { %v1884_v19 = vmax.f32 %v1878_v38, %v1883_v6 }
 0x25f   :  { %v1890_v62 = vmax.f32 %v1886_v63, %v1888_v25  ;;  %v6241_v59 = vpop.f32.mrb[8].mxu0 }
 0x260   :  { %v1889_v44 = vmax.f32 %v1882_v1, %v1884_v19  ;;  %v1654_v45 = vpop.f32.mrb[9].mxu0  ;;  %v1663_v16 = vadd.f32 %v6241_v59, %v8349_v23  ;;  %v900_v59 = vmul.f32 %v8234_v10, %v799_v46 }
 0x261   :  { %v791_v39 = vpop.permute.xlu1 %790  ;;  %v6242_v31 = vpop.f32.mrb[10].mxu0  ;;  %v1655_v41 = vadd.f32 %v1654_v45, %v8349_v23 }
 0x262   :  { %v1891_v8 = vmax.f32 %v1889_v44, %v1890_v62  ;;  %v898_v24 = vmul.f32 %v8234_v10, %v791_v39  ;;  %v1657_v40 = vpop.f32.mrb[11].mxu0  ;;  %v1666_v27 = vadd.f32 %v6242_v31, %v8349_v23  ;;  %v1900_v14 = vsel %vm1491_vm0, %v1663_v16, -inf }
 0x263   :  { %v1658_v7 = vadd.f32 %v1657_v40, %v8349_v23  ;;  %v1898_v0 = vsel %vm1491_vm0, %v1655_v41, -inf  ;;  %v579_v62 = vadd.f32 %v8231_v5, %v515_v55 }
 0x264   :  { %v962_v2 = vadd.f32 %v898_v24, %v577_v17  ;;  %v1892_v4 = vrot.slane %v1891_v8, 4  ;;  %v1901_v20 = vsel %vm1491_vm0, %v1666_v27, -inf }
 0x265   :  { %v795_v42 = vpop.permute.xlu1 %794  ;;  %v1899_v1 = vsel %vm1491_vm0, %v1658_v7, -inf  ;;  %v964_v27 = vadd.f32 %v900_v59, %v579_v62 }
 0x266   :  { %v1347_v54 = vadd.f32 %v1283_v47, %v962_v2  ;;  %v1893_v22 = vmax.f32 %v1891_v8, %v1892_v4  ;;  %v899_v38 = vmul.f32 %v8234_v10, %v795_v42 }
 0x267   :  { %v6245_v51 = vpop.f32.mrb[12].mxu0 }
 0x268   :  { %v1679_v50 = vadd.f32 %v6245_v51, %v8349_v23  ;;  %v1670_v26 = vpop.f32.mrb[13].mxu0  ;;  %v1411_v44 = vmax.f32 %v1347_v54, 0.0  ;;  %v1894_v48 = vrot.slane %v1893_v22, 2  ;;  %v963_v18 = vadd.f32 %v899_v38, %v578_v30 }
 0x269   :  { %v1671_v60 = vadd.f32 %v1670_v26, %v8349_v23  ;;  %v6246_v34 = vpop.f32.mrb[14].mxu0 }
 0x26a   :  { %v1906_v28 = vsel %vm1491_vm0, %v1679_v50, -inf  ;;  %v1682_v36 = vadd.f32 %v6246_v34, %v8349_v23  ;;  %v1172_v35 = vpop.permute.xlu1 %1171  ;;  %v1673_v13 = vpop.f32.mrb[15].mxu0  ;;  %v1895_v51 = vmax.f32 %v1893_v22, %v1894_v48 }
 0x26b   :  { %v1907_v11 = vmax.f32 %v1900_v14, %v1906_v28  ;;  %v1902_v63 = vsel %vm1491_vm0, %v1671_v60, -inf  ;;  %v1282_v29 = vmul.f32 %v8245_v52, %v1172_v35  ;;  %v1674_v33 = vadd.f32 %v1673_v13, %v8349_v23 }
 0x26c   :  { %v1903_v56 = vmax.f32 %v1898_v0, %v1902_v63  ;;  %v1908_v49 = vsel %vm1491_vm0, %v1682_v36, -inf  ;;  %v516_v60 = vmul.f32 %v8227_v58, %v8290_v21  ;;  %v1896_v36 = vrot.slane %v1895_v51, 1 }
 0x26d   :  { %v1909_v25 = vmax.f32 %v1901_v20, %v1908_v49  ;;  %v1346_v6 = vadd.f32 %v1282_v29, %v961_v43  ;;  %v1904_v19 = vsel %vm1491_vm0, %v1674_v33, -inf }
 0x26e   :  { %v1905_v37 = vmax.f32 %v1899_v1, %v1904_v19  ;;  %v1180_v61 = vpop.permute.xlu1 %1179  ;;  %v580_v48 = vadd.f32 %v8231_v5, %v516_v60 }
 0x26f   :  { %v1911_v45 = vmax.f32 %v1907_v11, %v1909_v25  ;;  %v1410_v39 = vmax.f32 %v1346_v6, 0.0  ;;  %v1284_v31 = vmul.f32 %v8245_v52, %v1180_v61  ;;  %v6249_v8 = vpop.f32.mrb[16].mxu0 }
 0x270   :  { %v1910_v24 = vmax.f32 %v1903_v56, %v1905_v37  ;;  %v1686_v40 = vpop.f32.mrb[17].mxu0  ;;  %v1695_v7 = vadd.f32 %v6249_v8, %v8349_v23 }
 0x271   :  { %v1450_v17 = vpack.c.bf16 %v1411_v44, %v1410_v39  ;;  %v6250_v16 = vpop.f32.mrb[18].mxu0  ;;  %v1348_v12 = vadd.f32 %v1284_v31, %v963_v18  ;;  %v1687_v26 = vadd.f32 %v1686_v40, %v8349_v23  ;;  %v1897_v44 = vmax.f32 %v1895_v51, %v1896_v36 }
 0x272   :  { %v1912_v41 = vmax.f32 %v1910_v24, %v1911_v45  ;;  %v1184_v42 = vpop.permute.xlu1 %1183  ;;  %v1689_v2 = vpop.f32.mrb[19].mxu0  ;;  %v1698_v54 = vadd.f32 %v6250_v16, %v8349_v23  ;;  %v1921_v29 = vsel %vm1491_vm0, %v1695_v7, -inf  ;;  %v8764_v16 = vld [vmem:[#allocation47_spill] sm:$0xff] }
 0x273   :  { %v1285_v47 = vmul.f32 %v8245_v52, %v1184_v42  ;;  %6279 = vmatprep.mubr.msk.bf16.mxu0 %vm1491_vm0, %v1450_v17  ;;  %v1412_v50 = vmax.f32 %v1348_v12, 0.0  ;;  %v1690_v13 = vadd.f32 %v1689_v2, %v8349_v23  ;;  %v1919_v1 = vsel %vm1491_vm0, %v1687_v26, -inf }
 0x274   :  { %v1913_v43 = vrot.slane %v1912_v41, 4  ;;  %v1922_v19 = vsel %vm1491_vm0, %v1698_v54, -inf  ;;  %v519_v12 = vmul.f32 %v8227_v58, %v8299_v32 }
 0x275   :  { %v1349_v3 = vadd.f32 %v1285_v47, %v964_v27  ;;  %v1920_v59 = vsel %vm1491_vm0, %v1690_v13, -inf }
 0x276   :  { %v1914_v4 = vmax.f32 %v1912_v41, %v1913_v43  ;;  %v1286_v41 = vmul.f32 %v8245_v52, %v8764_v16  ;;  %v583_v26 = vadd.f32 %v8231_v5, %v519_v12 }
 0x277   :  { %v1413_v55 = vmax.f32 %v1349_v3, 0.0  ;;  %v412_v14 = vpop.permute.xlu1 %411  ;;  %v6253_v0 = vpop.f32.mrb[20].mxu0 }
 0x278   :  { %v1915_v34 = vrot.slane %v1914_v4, 2  ;;  %v1711_v20 = vadd.f32 %v6253_v0, %v8349_v23  ;;  %v1702_v28 = vpop.f32.mrb[21].mxu0  ;;  %v517_v43 = vmul.f32 %v8227_v58, %v412_v14  ;;  %v807_v3 = vpop.permute.xlu0 %806 }
 0x279   :  { %v1451_v35 = vpack.c.bf16 %v1413_v55, %v1412_v50  ;;  %v1703_v46 = vadd.f32 %v1702_v28, %v8349_v23  ;;  %v6254_v11 = vpop.f32.mrb[22].mxu0 }
 0x27a   :  { %v1916_v63 = vmax.f32 %v1914_v4, %v1915_v34  ;;  %v1927_v33 = vsel %vm1491_vm0, %v1711_v20, -inf  ;;  %v1714_v21 = vadd.f32 %v6254_v11, %v8349_v23  ;;  %v1705_v22 = vpop.f32.mrb[23].mxu0  ;;  %v581_v60 = vadd.f32 %v8231_v5, %v517_v43  ;;  %v8765_v20 = vld [vmem:[#allocation48_spill] sm:$0xff] }
 0x27b   :  { %v1928_v56 = vmax.f32 %v1921_v29, %v1927_v33  ;;  %v1923_v49 = vsel %vm1491_vm0, %v1703_v46, -inf  ;;  %v1706_v38 = vadd.f32 %v1705_v22, %v8349_v23  ;;  %v417_v25 = vpop.permute.xlu1 %416  ;;  %6280 = vmatmul.mubr.msk.bf16.gmra.mrb[48].mxu0 %vm1491_vm0, %v1451_v35  ;;  %v902_v34 = vmul.f32 %v8234_v10, %v807_v3 }
 0x27c   :  { %v1917_v6 = vrot.slane %v1916_v63, 1  ;;  %v1924_v30 = vmax.f32 %v1919_v1, %v1923_v49  ;;  %v1929_v62 = vsel %vm1491_vm0, %v1714_v21, -inf  ;;  %v1289_v14 = vmul.f32 %v8245_v52, %v8765_v20 }
 0x27d   :  { %v1930_v37 = vmax.f32 %v1922_v19, %v1929_v62  ;;  %v1925_v61 = vsel %vm1491_vm0, %v1706_v38, -inf  ;;  %v518_v13 = vmul.f32 %v8227_v58, %v417_v25  ;;  %v966_v29 = vadd.f32 %v902_v34, %v581_v60  ;;  %v2167_v19 = vld [vmem:[#allocation5 + $0x2] ss:$0 sm:$0xff] }
 0x27e   :  { %v1918_v45 = vmax.f32 %v1916_v63, %v1917_v6  ;;  %v1926_v39 = vmax.f32 %v1920_v59, %v1925_v61  ;;  %v6173_v63 = vpop.f32.mrb[0].mxu1 }
 0x27f   :  { %v1932_v31 = vmax.f32 %v1928_v56, %v1930_v37  ;;  %v6174_v1 = vpop.f32.mrb[1].mxu1  ;;  %v582_v38 = vadd.f32 %v8231_v5, %v518_v13 }
 0x280   :  { %v2046_v8 = vsel %vm2045_vm1, %v1897_v44, %v1918_v45  ;;  %v1931_v24 = vmax.f32 %v1924_v30, %v1926_v39  ;;  %v803_v40 = vpop.permute.xlu1 %802  ;;  %v6176_v56 = vpop.f32.mrb[2].mxu1  ;;  %v6175_v30 = vadd.f32 %v6174_v1, %v6173_v63 }
 0x281   :  { %v901_v18 = vmul.f32 %v8234_v10, %v803_v40  ;;  %v6177_v25 = vpop.f32.mrb[3].mxu1 }
 0x282   :  { %v1933_v17 = vmax.f32 %v1931_v24, %v1932_v31  ;;  %v6195_v37 = vpop.f32.mrb[4].mxu1  ;;  %v2491_v39 = vadd.f32 %v6175_v30, %v2167_v19 }
 0x283   :  { %v965_v42 = vadd.f32 %v901_v18, %v580_v48  ;;  %v6196_v31 = vpop.f32.mrb[5].mxu1 }
 0x284   :  { %v1934_v2 = vrot.slane %v1933_v17, 4  ;;  %v811_v27 = vpop.permute.xlu1 %810  ;;  %v6197_v24 = vadd.f32 %v6196_v31, %v6195_v37  ;;  %v6198_v40 = vpop.f32.mrb[6].mxu1 }
 0x285   :  { %v1350_v47 = vadd.f32 %v1286_v41, %v965_v42  ;;  %v903_v21 = vmul.f32 %v8234_v10, %v811_v27  ;;  %v6199_v18 = vpop.f32.mrb[7].mxu1 }
 0x286   :  { %v1935_v51 = vmax.f32 %v1933_v17, %v1934_v2  ;;  %v2531_v17 = vadd.f32 %v6197_v24, %v2491_v39 }
 0x287   :  { %v1414_v62 = vmax.f32 %v1350_v47, 0.0  ;;  %v967_v61 = vadd.f32 %v903_v21, %v582_v38 }
 0x288   :  { %v1936_v4 = vrot.slane %v1935_v51, 2  ;;  %v815_v7 = vpop.permute.xlu1 %814  ;;  %v8430_v50 = vpop.f32.mrb[24].mxu0 }
 0x289   :  { %v904_v55 = vmul.f32 %v8234_v10, %v815_v7  ;;  %v8434_v0 = vpop.f32.mrb[25].mxu0  ;;  %v1727_v20 = vadd.f32 %v8430_v50, %v8349_v23 }
 0x28a   :  { %v1937_v32 = vmax.f32 %v1935_v51, %v1936_v4  ;;  %v6258_v54 = vpop.f32.mrb[26].mxu0  ;;  %v1719_v13 = vadd.f32 %v8434_v0, %v8349_v23 }
 0x28b   :  { %v968_v28 = vadd.f32 %v904_v55, %v583_v26  ;;  %v1721_v36 = vpop.f32.mrb[27].mxu0  ;;  %v521_v26 = vmul.f32 %v8227_v58, %v8307_v53  ;;  %v1942_v56 = vsel %vm1491_vm0, %v1727_v20, -inf }
 0x28c   :  { %v1938_v35 = vrot.slane %v1937_v32, 1 }
 0x28d   :  { %v1353_v46 = vadd.f32 %v1289_v14, %v968_v28  ;;  %v1192_v11 = vpop.permute.xlu1 %1191  ;;  %v585_v60 = vadd.f32 %v8231_v5, %v521_v26  ;;  %v819_v14 = vpop.permute.xlu0 %818  ;;  %v8766_v28 = vld [vmem:[#allocation50_spill] sm:$0xff] }
 0x28e   :  { %v1939_v33 = vmax.f32 %v1937_v32, %v1938_v35  ;;  %v1287_v22 = vmul.f32 %v8245_v52, %v1192_v11  ;;  %v1291_v35 = vmul.f32 %v8245_v52, %v8766_v28  ;;  %v1722_v11 = vadd.f32 %v1721_v36, %v8349_v23 }
 0x28f   :  { %v1417_v16 = vmax.f32 %v1353_v46, 0.0  ;;  %v1730_v46 = vadd.f32 %v6258_v54, %v8349_v23  ;;  %v905_v21 = vmul.f32 %v8234_v10, %v819_v14  ;;  %v1940_v54 = vsel %vm1491_vm0, %v1719_v13, -inf }
 0x290   :  { %v8443_v49 = vsel %vm2047_vm2, %v2046_v8, %v1939_v33  ;;  %v1351_v6 = vadd.f32 %v1287_v22, %v966_v29  ;;  %v1941_v25 = vsel %vm1491_vm0, %v1722_v11, -inf }
 0x291   :  { %v1196_v59 = vpop.permute.xlu1 %1195  ;;  %v831_v40 = vpop.permute.xlu0 %830 }
 0x292   :  { %v1415_v44 = vmax.f32 %v1351_v6, 0.0  ;;  %v1288_v45 = vmul.f32 %v8245_v52, %v1196_v59  ;;  %v1943_v6 = vsel %vm1491_vm0, %v1730_v46, -inf }
 0x294   :  { %v1452_v48 = vpack.c.bf16 %v1415_v44, %v1414_v62  ;;  %v1352_v8 = vadd.f32 %v1288_v45, %v967_v61 }
 0x295   :  { %v6217_v27 = vpop.f32.mrb[8].mxu1 }
 0x296   :  { %v1416_v41 = vmax.f32 %v1352_v8, 0.0  ;;  %v427_v42 = vpop.permute.xlu1 %426  ;;  %6283 = vmatprep.mubr.msk.bf16.mxu0 %vm1491_vm0, %v1452_v48  ;;  %v6218_v12 = vpop.f32.mrb[9].mxu1 }
 0x297   :  { %v6219_v43 = vadd.f32 %v6218_v12, %v6217_v27  ;;  %v6220_v51 = vpop.f32.mrb[10].mxu1  ;;  %v520_v34 = vmul.f32 %v8227_v58, %v427_v42  ;;  %v908_v27 = vmul.f32 %v8234_v10, %v831_v40 }
 0x298   :  { %v1453_v2 = vpack.c.bf16 %v1417_v16, %v1416_v41  ;;  %v6221_v3 = vpop.f32.mrb[11].mxu1 }
 0x299   :  { %v2571_v4 = vadd.f32 %v6219_v43, %v2531_v17  ;;  %v584_v33 = vadd.f32 %v8231_v5, %v520_v34 }
 0x29a   :  { %v437_v47 = vpop.permute.xlu1 %436  ;;  %6284 = vmatmul.mubr.msk.bf16.gmra.mrb[52].mxu0 %vm1491_vm0, %v1453_v2 }
 0x29b   :  { %2577 = vrot.lane.b32.xlu1 %v2571_v4, %s7070_s8  ;;  %v969_v61 = vadd.f32 %v905_v21, %v584_v33  ;;  %v522_v44 = vmul.f32 %v8227_v58, %v437_v47  ;;  %s5642_s8 = sshll.u32 %s7081_s0, 4  ;;  %s5643_s8 = int_to_ptr.vmem [resolvable:$true] %s5642_s8 }
 0x29c   :  { %s7038_s30 = scalar_lea.vmem %s5643_s8, 128  ;;  %p7043_p5 = scmp.lt.s32.totalorder %s5643_s8, %s5643_s8 }
 0x29d   :  { %v586_v2 = vadd.f32 %v8231_v5, %v522_v44  ;;  %p7039_p4 = scmp.ne.s32.totalorder %s5643_s8, %s7038_s30  ;;  %p7044_p6 = scmp.lt.s32.totalorder %s7038_s30, %s7038_s30 }
 0x29e   :  { %v442_v7 = vpop.permute.xlu1 %441 }
 0x29f   :  { %v523_v24 = vmul.f32 %v8227_v58, %v442_v7  ;;  %p7045_p7 = por %p7044_p6, %p7043_p5 }
 0x2a1   :  { %v587_v43 = vadd.f32 %v8231_v5, %v523_v24  ;;  %p7046_p8 = pnand %p7045_p7, %p7039_p4 }
 0x2a3   :  { %v823_v55 = vpop.permute.xlu1 %822 }
 0x2a4   :  { %v906_v32 = vmul.f32 %v8234_v10, %v823_v55 }
 0x2a6   :  { %v970_v53 = vadd.f32 %v906_v32, %v585_v60  ;;  %v972_v32 = vadd.f32 %v908_v27, %v587_v43 }
 0x2a7   :  { %v827_v63 = vpop.permute.xlu1 %826  ;;  %v6261_v29 = vpop.f32.mrb[28].mxu0 }
 0x2a8   :  { %v1355_v22 = vadd.f32 %v1291_v35, %v970_v53  ;;  %v1743_v50 = vadd.f32 %v6261_v29, %v8349_v23  ;;  %v1734_v1 = vpop.f32.mrb[29].mxu0  ;;  %v907_v16 = vmul.f32 %v8234_v10, %v827_v63 }
 0x2a9   :  { %v1735_v38 = vadd.f32 %v1734_v1, %v8349_v23  ;;  %v6262_v0 = vpop.f32.mrb[30].mxu0 }
 0x2aa   :  { %v1948_v36 = vsel %vm1491_vm0, %v1743_v50, -inf  ;;  %v1746_v19 = vadd.f32 %v6262_v0, %v8349_v23  ;;  %v1737_v30 = vpop.f32.mrb[31].mxu0  ;;  %v1419_v51 = vmax.f32 %v1355_v22, 0.0  ;;  %v971_v26 = vadd.f32 %v907_v16, %v586_v2 }
 0x2ab   :  { %v1949_v62 = vmax.f32 %v1942_v56, %v1948_v36  ;;  %v1944_v59 = vsel %vm1491_vm0, %v1735_v38, -inf  ;;  %v1738_v37 = vadd.f32 %v1737_v30, %v8349_v23  ;;  %v839_v56 = vpop.permute.xlu0 %838  ;;  %v524_v38 = vmul.f32 %v8227_v58, %v8310_v57 }
 0x2ac   :  { %v1945_v45 = vmax.f32 %v1940_v54, %v1944_v59  ;;  %v1950_v39 = vsel %vm1491_vm0, %v1746_v19, -inf  ;;  %v1204_v31 = vpop.permute.xlu1 %1203  ;;  %v527_v30 = vmul.f32 %v8227_v58, %v8320_v15  ;;  %v910_v24 = vmul.f32 %v8234_v10, %v839_v56 }
 0x2ad   :  { %v1951_v48 = vmax.f32 %v1943_v6, %v1950_v39  ;;  %v1946_v8 = vsel %vm1491_vm0, %v1738_v37, -inf  ;;  %v1290_v18 = vmul.f32 %v8245_v52, %v1204_v31  ;;  %v588_v19 = vadd.f32 %v8231_v5, %v524_v38 }
 0x2ae   :  { %v1947_v17 = vmax.f32 %v1941_v25, %v1946_v8  ;;  %v591_v31 = vadd.f32 %v8231_v5, %v527_v30 }
 0x2af   :  { %v1953_v41 = vmax.f32 %v1949_v62, %v1951_v48  ;;  %v1354_v42 = vadd.f32 %v1290_v18, %v969_v61  ;;  %v1220_v36 = vpop.permute.xlu0 %1219 }
 0x2b0   :  { %v1952_v12 = vmax.f32 %v1945_v45, %v1947_v17  ;;  %v1212_v47 = vpop.permute.xlu1 %1211  ;;  %v1294_v59 = vmul.f32 %v8245_v52, %v1220_v36 }
 0x2b1   :  { %v1418_v3 = vmax.f32 %v1354_v42, 0.0  ;;  %v1292_v4 = vmul.f32 %v8245_v52, %v1212_v47 }
 0x2b2   :  { %v1954_v7 = vmax.f32 %v1952_v12, %v1953_v41 }
 0x2b3   :  { %v1454_v55 = vpack.c.bf16 %v1419_v51, %v1418_v3  ;;  %v1356_v20 = vadd.f32 %v1292_v4, %v971_v26  ;;  %v1232_v45 = vpop.permute.xlu0 %1231 }
 0x2b4   :  { %v1955_v60 = vrot.slane %v1954_v7, 4  ;;  %v1216_v34 = vpop.permute.xlu1 %1215  ;;  %v1297_v48 = vmul.f32 %v8245_v52, %v1232_v45 }
 0x2b5   :  { %v1293_v14 = vmul.f32 %v8245_v52, %v1216_v34  ;;  %6287 = vmatprep.mubr.msk.bf16.mxu0 %vm1491_vm0, %v1454_v55  ;;  %v1420_v46 = vmax.f32 %v1356_v20, 0.0 }
 0x2b6   :  { %v1956_v28 = vmax.f32 %v1954_v7, %v1955_v60 }
 0x2b7   :  { %v1357_v35 = vadd.f32 %v1293_v14, %v972_v32 }
 0x2b8   :  { %v1957_v13 = vrot.slane %v1956_v28, 2 }
 0x2b9   :  { %v1421_v53 = vmax.f32 %v1357_v35, 0.0  ;;  %v452_v11 = vpop.permute.xlu1 %451 }
 0x2ba   :  { %v1958_v63 = vmax.f32 %v1956_v28, %v1957_v13  ;;  %v525_v6 = vmul.f32 %v8227_v58, %v452_v11 }
 0x2bb   :  { %v1455_v29 = vpack.c.bf16 %v1421_v53, %v1420_v46 }
 0x2bc   :  { %v1959_v33 = vrot.slane %v1958_v63, 1  ;;  %v589_v61 = vadd.f32 %v8231_v5, %v525_v6 }
 0x2bd   :  { %v457_v21 = vpop.permute.xlu1 %456  ;;  %6288 = vmatmul.mubr.msk.bf16.gmra.mrb[56].mxu0 %vm1491_vm0, %v1455_v29 }
 0x2be   :  { %v1960_v22 = vmax.f32 %v1958_v63, %v1959_v33  ;;  %v526_v40 = vmul.f32 %v8227_v58, %v457_v21  ;;  %v974_v16 = vadd.f32 %v910_v24, %v589_v61 }
 0x2c0   :  { %v8489_v50 = vsel %vm2049_vm3, %v8443_v49, %v1960_v22  ;;  %v590_v42 = vadd.f32 %v8231_v5, %v526_v40 }
 0x2c2   :  { %v835_v1 = vpop.permute.xlu1 %834 }
 0x2c3   :  { %v909_v54 = vmul.f32 %v8234_v10, %v835_v1 }
 0x2c5   :  { %v973_v49 = vadd.f32 %v909_v54, %v588_v19 }
 0x2c6   :  { %v843_v0 = vpop.permute.xlu1 %842 }
 0x2c7   :  { %v1358_v15 = vadd.f32 %v1294_v59, %v973_v49  ;;  %v911_v18 = vmul.f32 %v8234_v10, %v843_v0 }
 0x2c9   :  { %v1422_v27 = vmax.f32 %v1358_v15, 0.0  ;;  %v975_v47 = vadd.f32 %v911_v18, %v590_v42  ;;  %v2582_v18 = vld [vmem:[#allocation7] sm:$0xff]  ;;  %v2599_v42 = vld [vmem:[#allocation7 + $0x88] sm:$0xff] }
 0x2ca   :  { %v847_v25 = vpop.permute.xlu1 %846  ;;  %v6265_v62 = vpop.f32.mrb[32].mxu0 }
 0x2cb   :  { %v1750_v37 = vpop.f32.mrb[33].mxu0  ;;  %v912_v57 = vmul.f32 %v8234_v10, %v847_v25  ;;  %v1759_v5 = vadd.f32 %v6265_v62, %v8349_v23 }
 0x2cc   :  { %v6266_v44 = vpop.f32.mrb[34].mxu0  ;;  %v1751_v55 = vadd.f32 %v1750_v37, %v8349_v23 }
 0x2cd   :  { %v1753_v39 = vpop.f32.mrb[35].mxu0  ;;  %v976_v17 = vadd.f32 %v912_v57, %v591_v31  ;;  %v1762_v34 = vadd.f32 %v6266_v44, %v8349_v23  ;;  %v1963_v35 = vsel %vm1491_vm0, %v1759_v5, -inf  ;;  %v2583_v57 = vld [vmem:[#allocation7 + $0x8] sm:$0xff] }
 0x2ce   :  { %v1754_v20 = vadd.f32 %v1753_v39, %v8349_v23  ;;  %v1961_v11 = vsel %vm1491_vm0, %v1751_v55, -inf  ;;  %v2587_v44 = vld [vmem:[#allocation7 + $0x28] sm:$0xff] }
 0x2cf   :  { %v1224_v8 = vpop.permute.xlu1 %1223  ;;  %v1361_v43 = vadd.f32 %v1297_v48, %v976_v17  ;;  %v1964_v21 = vsel %vm1491_vm0, %v1762_v34, -inf  ;;  %v5739_v45 = vcombine.low %v2583_v57, %v2587_v44  ;;  %v5740_v39 = vcombine.high %v2583_v57, %v2587_v44  ;;  %v2591_v48 = vld [vmem:[#allocation7 + $0x48] sm:$0xff]  ;;  %v2594_v34 = vld [vmem:[#allocation7 + $0x60] sm:$0xff] }
 0x2d0   :  { %v1295_v41 = vmul.f32 %v8245_v52, %v1224_v8  ;;  %v1962_v56 = vsel %vm1491_vm0, %v1754_v20, -inf  ;;  %v2595_v8 = vld [vmem:[#allocation7 + $0x68] sm:$0xff] }
 0x2d1   :  { %v1425_v7 = vmax.f32 %v1361_v43, 0.0  ;;  %3052 = vmatprep.subr.bf16.mxu0 %v5740_v39  ;;  %v5747_v17 = vcombine.low %v2591_v48, %v2595_v8  ;;  %v2618_v39 = vld [vmem:[#allocation7 + $0x120] sm:$0xff] }
 0x2d2   :  { %v1359_v2 = vadd.f32 %v1295_v41, %v974_v16  ;;  %3053 = vmatpush1.bf16.msra.mxu0 %v5739_v45  ;;  %v5748_v16 = vcombine.high %v2591_v48, %v2595_v8  ;;  %v2586_v41 = vld [vmem:[#allocation7 + $0x20] sm:$0xff] }
 0x2d3   :  { %v1228_v12 = vpop.permute.xlu1 %1227  ;;  %v2614_v45 = vld [vmem:[#allocation7 + $0x100] sm:$0xff] }
 0x2d4   :  { %v1423_v51 = vmax.f32 %v1359_v2, 0.0  ;;  %v1296_v58 = vmul.f32 %v8245_v52, %v1228_v12  ;;  %v2603_v2 = vld [vmem:[#allocation7 + $0xa8] sm:$0xff]  ;;  %3054 = vmatprep.subr.bf16.mxu0 %v5748_v16  ;;  %v5769_v48 = vcombine.low %v2614_v45, %v2618_v39  ;;  %v2622_v16 = vld [vmem:[#allocation7 + $0x140] sm:$0xff] }
 0x2d5   :  { %v5756_v12 = vcombine.high %v2599_v42, %v2603_v2 }
 0x2d6   :  { %v1456_v3 = vpack.c.bf16 %v1423_v51, %v1422_v27  ;;  %v1360_v4 = vadd.f32 %v1296_v58, %v975_v47  ;;  %v5738_v27 = vcombine.high %v2582_v18, %v2586_v41  ;;  %3055 = vmatpush1.bf16.msra.mxu0 %v5747_v17  ;;  %v5755_v47 = vcombine.low %v2599_v42, %v2603_v2  ;;  %v2623_v42 = vld [vmem:[#allocation7 + $0x148] sm:$0xff] }
 0x2d7   :  { %3056 = vmatprep.subr.bf16.mxu0 %v5756_v12 }
 0x2d8   :  { %v1424_v26 = vmax.f32 %v1360_v4, 0.0  ;;  %6291 = vmatprep.mubr.msk.bf16.mxu0 %vm1491_vm0, %v1456_v3  ;;  %3011 = vmatprep.subr.bf16.mxu1 %v5738_v27  ;;  %v2627_v27 = vld [vmem:[#allocation7 + $0x168] sm:$0xff] }
 0x2da   :  { %v1457_v10 = vpack.c.bf16 %v1425_v7, %v1424_v26  ;;  %3057 = vmatpush1.bf16.msra.mxu0 %v5755_v47  ;;  %v5779_v47 = vcombine.low %v2623_v42, %v2627_v27 }
 0x2dc   :  { %6292 = vmatmul.mubr.msk.bf16.gmra.mrb[60].mxu0 %vm1491_vm0, %v1457_v10 }
 0x2dd   :  { %3084 = vmatprep.mubr.bf16.mxu0 %v8702_v9 }
 0x2e9   :  { %v6269_v60 = vpop.f32.mrb[36].mxu0 }
 0x2ea   :  { %v1775_v52 = vadd.f32 %v6269_v60, %v8349_v23  ;;  %v1766_v32 = vpop.f32.mrb[37].mxu0  ;;  %v2590_v60 = vld [vmem:[#allocation7 + $0x40] sm:$0xff] }
 0x2eb   :  { %v1767_v14 = vadd.f32 %v1766_v32, %v8349_v23  ;;  %v6270_v28 = vpop.f32.mrb[38].mxu0 }
 0x2ec   :  { %v1969_v13 = vsel %vm1491_vm0, %v1775_v52, -inf  ;;  %v1778_v46 = vadd.f32 %v6270_v28, %v8349_v23  ;;  %v1769_v53 = vpop.f32.mrb[39].mxu0  ;;  %v5746_v28 = vcombine.high %v2590_v60, %v2594_v34 }
 0x2ed   :  { %v1970_v63 = vmax.f32 %v1963_v35, %v1969_v13  ;;  %v1965_v29 = vsel %vm1491_vm0, %v1767_v14, -inf  ;;  %v1770_v33 = vadd.f32 %v1769_v53, %v8349_v23  ;;  %v5745_v53 = vcombine.low %v2590_v60, %v2594_v34 }
 0x2ee   :  { %v1966_v22 = vmax.f32 %v1961_v11, %v1965_v29  ;;  %v1971_v1 = vsel %vm1491_vm0, %v1778_v46, -inf }
 0x2ef   :  { %v1972_v38 = vmax.f32 %v1964_v21, %v1971_v1  ;;  %v1967_v0 = vsel %vm1491_vm0, %v1770_v33, -inf  ;;  %v2598_v1 = vld [vmem:[#allocation7 + $0x80] sm:$0xff] }
 0x2f0   :  { %v1968_v54 = vmax.f32 %v1962_v56, %v1967_v0  ;;  %v2602_v56 = vld [vmem:[#allocation7 + $0xa0] sm:$0xff] }
 0x2f1   :  { %v1974_v6 = vmax.f32 %v1970_v63, %v1972_v38  ;;  %v5754_v0 = vcombine.high %v2598_v1, %v2602_v56 }
 0x2f2   :  { %v1973_v36 = vmax.f32 %v1966_v22, %v1968_v54 }
 0x2f4   :  { %v1975_v19 = vmax.f32 %v1973_v36, %v1974_v6  ;;  %v5753_v6 = vcombine.low %v2598_v1, %v2602_v56  ;;  %v2606_v36 = vld [vmem:[#allocation7 + $0xc0] sm:$0xff] }
 0x2f6   :  { %v1976_v30 = vrot.slane %v1975_v19, 4 }
 0x2f8   :  { %v1977_v25 = vmax.f32 %v1975_v19, %v1976_v30  ;;  %v2610_v19 = vld [vmem:[#allocation7 + $0xe0] sm:$0xff]  ;;  %v2607_v30 = vld [vmem:[#allocation7 + $0xc8] sm:$0xff] }
 0x2fa   :  { %v1978_v62 = vrot.slane %v1977_v25, 2 }
 0x2fc   :  { %v1979_v49 = vmax.f32 %v1977_v25, %v1978_v62  ;;  %v5762_v62 = vcombine.high %v2606_v36, %v2610_v19 }
 0x2fe   :  { %v1980_v59 = vrot.slane %v1979_v49, 1 }
 0x300   :  { %v1981_v37 = vmax.f32 %v1979_v49, %v1980_v59  ;;  %v2611_v49 = vld [vmem:[#allocation7 + $0xe8] sm:$0xff]  ;;  %v5761_v59 = vcombine.low %v2606_v36, %v2610_v19 }
 0x301   :  { %v5764_v57 = vcombine.high %v2607_v30, %v2611_v49 }
 0x302   :  { %v8529_v61 = vsel %vm2051_vm4, %v8489_v50, %v1981_v37  ;;  %v5737_v50 = vcombine.low %v2582_v18, %v2586_v41  ;;  %v5763_v37 = vcombine.low %v2607_v30, %v2611_v49  ;;  %v2626_v41 = vld [vmem:[#allocation7 + $0x160] sm:$0xff] }
 0x303   :  { %3058 = vmatprep.subr.bf16.mxu0 %v5764_v57  ;;  %v5777_v12 = vcombine.low %v2622_v16, %v2626_v41 }
 0x304   :  { %3012 = vmatpush1.bf16.msra.mxu1 %v5737_v50  ;;  %3059 = vmatpush1.bf16.msra.mxu0 %v5763_v37  ;;  %v5778_v50 = vcombine.high %v2622_v16, %v2626_v41 }
 0x305   :  { %3013 = vmatprep.subr.bf16.mxu1 %v5746_v28 }
 0x308   :  { %3014 = vmatpush1.bf16.msra.mxu1 %v5745_v53 }
 0x309   :  { %3015 = vmatprep.subr.bf16.mxu1 %v5754_v0 }
 0x30c   :  { %v6273_v31 = vpop.f32.mrb[40].mxu0  ;;  %3016 = vmatpush1.bf16.msra.mxu1 %v5753_v6 }
 0x30d   :  { %v1782_v24 = vpop.f32.mrb[41].mxu0  ;;  %v1791_v43 = vadd.f32 %v6273_v31, %v8349_v23  ;;  %3017 = vmatprep.subr.bf16.mxu1 %v5762_v62  ;;  %v2615_v31 = vld [vmem:[#allocation7 + $0x108] sm:$0xff] }
 0x30e   :  { %v6274_v40 = vpop.f32.mrb[42].mxu0  ;;  %v1783_v51 = vadd.f32 %v1782_v24, %v8349_v23 }
 0x30f   :  { %v1785_v15 = vpop.f32.mrb[43].mxu0  ;;  %v1794_v3 = vadd.f32 %v6274_v40, %v8349_v23  ;;  %v1984_v26 = vsel %vm1491_vm0, %v1791_v43, -inf  ;;  %v5770_v40 = vcombine.high %v2614_v45, %v2618_v39  ;;  %v5780_v43 = vcombine.high %v2623_v42, %v2627_v27 }
 0x310   :  { %v1786_v10 = vadd.f32 %v1785_v15, %v8349_v23  ;;  %v1982_v52 = vsel %vm1491_vm0, %v1783_v51, -inf  ;;  %3018 = vmatpush1.bf16.msra.mxu1 %v5761_v59  ;;  %v2619_v15 = vld [vmem:[#allocation7 + $0x128] sm:$0xff] }
 0x311   :  { %v1985_v11 = vsel %vm1491_vm0, %v1794_v3, -inf  ;;  %v5771_v8 = vcombine.low %v2615_v31, %v2619_v15  ;;  %v5772_v18 = vcombine.high %v2615_v31, %v2619_v15  ;;  %3019 = vmatprep.subr.bf16.mxu1 %v5770_v40  ;;  %v2634_v3 = vld [vmem:[#allocation7 + $0x1a0] sm:$0xff] }
 0x312   :  { %v1983_v33 = vsel %vm1491_vm0, %v1786_v10, -inf  ;;  %v2635_v10 = vld [vmem:[#allocation7 + $0x1a8] sm:$0xff] }
 0x313   :  { %3060 = vmatprep.subr.bf16.mxu0 %v5772_v18 }
 0x314   :  { %3020 = vmatpush1.bf16.msra.mxu1 %v5769_v48  ;;  %3061 = vmatpush1.bf16.msra.mxu0 %v5771_v8 }
 0x315   :  { %3021 = vmatprep.subr.bf16.mxu1 %v5778_v50  ;;  %3062 = vmatprep.subr.bf16.mxu0 %v5780_v43 }
 0x318   :  { %3022 = vmatpush1.bf16.msra.mxu1 %v5777_v12  ;;  %3063 = vmatpush1.bf16.msra.mxu0 %v5779_v47 }
 0x32b   :  { %v6277_v58 = vpop.f32.mrb[44].mxu0 }
 0x32c   :  { %v1807_v4 = vadd.f32 %v6277_v58, %v8349_v23  ;;  %v1798_v7 = vpop.f32.mrb[45].mxu0  ;;  %v2630_v58 = vld [vmem:[#allocation7 + $0x180] sm:$0xff] }
 0x32d   :  { %v1799_v5 = vadd.f32 %v1798_v7, %v8349_v23  ;;  %v6278_v55 = vpop.f32.mrb[46].mxu0 }
 0x32e   :  { %v1990_v32 = vsel %vm1491_vm0, %v1807_v4, -inf  ;;  %v1810_v20 = vadd.f32 %v6278_v55, %v8349_v23  ;;  %v1801_v14 = vpop.f32.mrb[47].mxu0  ;;  %v2631_v4 = vld [vmem:[#allocation7 + $0x188] sm:$0xff] }
 0x32f   :  { %v1991_v35 = vmax.f32 %v1984_v26, %v1990_v32  ;;  %v1986_v13 = vsel %vm1491_vm0, %v1799_v5, -inf  ;;  %v1802_v46 = vadd.f32 %v1801_v14, %v8349_v23  ;;  %v5786_v26 = vcombine.high %v2630_v58, %v2634_v3  ;;  %v2642_v32 = vld [vmem:[#allocation7 + $0x1e0] sm:$0xff] }
 0x330   :  { %v1987_v63 = vmax.f32 %v1982_v52, %v1986_v13  ;;  %v1992_v29 = vsel %vm1491_vm0, %v1810_v20, -inf  ;;  %v5785_v5 = vcombine.low %v2630_v58, %v2634_v3  ;;  %v5787_v55 = vcombine.low %v2631_v4, %v2635_v10  ;;  %v2638_v52 = vld [vmem:[#allocation7 + $0x1c0] sm:$0xff]  ;;  %v2639_v20 = vld [vmem:[#allocation7 + $0x1c8] sm:$0xff]  ;;  %v8550_v13 = vld [vmem:[#allocation7 + $0x10] sm:$0xff] }
 0x331   :  { %v1993_v21 = vmax.f32 %v1985_v11, %v1992_v29  ;;  %v1988_v22 = vsel %vm1491_vm0, %v1802_v46, -inf  ;;  %v5788_v60 = vcombine.high %v2631_v4, %v2635_v10  ;;  %3023 = vmatprep.subr.bf16.mxu1 %v5786_v26  ;;  %v5793_v14 = vcombine.low %v2638_v52, %v2642_v32  ;;  %v8552_v46 = vld [vmem:[#allocation7 + $0x30] sm:$0xff]  ;;  %v8558_v29 = vld [vmem:[#allocation7 + $0x18] sm:$0xff] }
 0x332   :  { %v1989_v38 = vmax.f32 %v1983_v33, %v1988_v22  ;;  %3024 = vmatpush1.bf16.msra.mxu1 %v5785_v5  ;;  %v5794_v28 = vcombine.high %v2638_v52, %v2642_v32  ;;  %v8560_v33 = vld [vmem:[#allocation7 + $0x38] sm:$0xff] }
 0x333   :  { %v1995_v54 = vmax.f32 %v1991_v35, %v1993_v21  ;;  %3064 = vmatprep.subr.bf16.mxu0 %v5788_v60  ;;  %v2643_v35 = vld [vmem:[#allocation7 + $0x1e8] sm:$0xff]  ;;  %v5743_v21 = vcombine.low %v8558_v29, %v8560_v33  ;;  %v5744_v22 = vcombine.high %v8558_v29, %v8560_v33  ;;  %v2616_v33 = vld [vmem:[#allocation7 + $0x110] sm:$0xff] }
 0x334   :  { %v1994_v23 = vmax.f32 %v1987_v63, %v1989_v38  ;;  %3065 = vmatpush1.bf16.msra.mxu0 %v5787_v55  ;;  %v5795_v53 = vcombine.low %v2639_v20, %v2643_v35  ;;  %v5796_v11 = vcombine.high %v2639_v20, %v2643_v35  ;;  %v5741_v63 = vcombine.low %v8550_v13, %v8552_v46 }
 0x335   :  { %3025 = vmatprep.subr.bf16.mxu1 %v5794_v28 }
 0x336   :  { %v1996_v25 = vmax.f32 %v1994_v23, %v1995_v54  ;;  %3066 = vmatprep.subr.bf16.mxu0 %v5796_v11  ;;  %3026 = vmatpush1.bf16.msra.mxu1 %v5793_v14  ;;  %v6949_v54 = vld [vmem:[#allocation5 + $0x1] ss:$0 sm:$0xff] }
 0x338   :  { %v1997_v44 = vrot.slane %v1996_v25, 4  ;;  %3067 = vmatpush1.bf16.msra.mxu0 %v5795_v53 }
 0x339   :  { %3134 = vmatprep.subr.bf16.mxu0 %v5744_v22 }
 0x33a   :  { %v1998_v24 = vmax.f32 %v1996_v25, %v1997_v44 }
 0x33c   :  { %v1999_v17 = vrot.slane %v1998_v24, 2 }
 0x33e   :  { %v2000_v2 = vmax.f32 %v1998_v24, %v1999_v17 }
 0x340   :  { %v2001_v51 = vrot.slane %v2000_v2, 1 }
 0x342   :  { %v2002_v7 = vmax.f32 %v2000_v2, %v2001_v51 }
 0x344   :  { %v8548_v34 = vsel %vm2053_vm5, %v8529_v61, %v2002_v7  ;;  %v5742_v61 = vcombine.high %v8550_v13, %v8552_v46 }
 0x346   :  { %3093 = vmatprep.subr.bf16.mxu1 %v5742_v61 }
 0x34e   :  { %v6281_v1 = vpop.f32.mrb[48].mxu0 }
 0x34f   :  { %v1814_v56 = vpop.f32.mrb[49].mxu0  ;;  %v1823_v6 = vadd.f32 %v6949_v54, %v6281_v1 }
 0x350   :  { %v6282_v38 = vpop.f32.mrb[50].mxu0  ;;  %v1815_v23 = vadd.f32 %v6949_v54, %v1814_v56 }
 0x351   :  { %v1817_v0 = vpop.f32.mrb[51].mxu0  ;;  %v1826_v19 = vadd.f32 %v6949_v54, %v6282_v38  ;;  %v2005_v37 = vsel %vm1491_vm0, %v1823_v6, -inf }
 0x352   :  { %v1818_v62 = vadd.f32 %v6949_v54, %v1817_v0  ;;  %v2003_v39 = vsel %vm1491_vm0, %v1815_v23, -inf }
 0x353   :  { %v2006_v15 = vsel %vm1491_vm0, %v1826_v19, -inf }
 0x354   :  { %v2004_v18 = vsel %vm1491_vm0, %v1818_v62, -inf }
 0x36d   :  { %v6285_v36 = vpop.f32.mrb[52].mxu0 }
 0x36e   :  { %v1839_v30 = vadd.f32 %v6949_v54, %v6285_v36  ;;  %v1830_v25 = vpop.f32.mrb[53].mxu0 }
 0x36f   :  { %v1831_v49 = vadd.f32 %v6949_v54, %v1830_v25  ;;  %v6286_v59 = vpop.f32.mrb[54].mxu0 }
 0x370   :  { %v2011_v57 = vsel %vm1491_vm0, %v1839_v30, -inf  ;;  %v1842_v44 = vadd.f32 %v6949_v54, %v6286_v59  ;;  %v1833_v45 = vpop.f32.mrb[55].mxu0 }
 0x371   :  { %v2012_v31 = vmax.f32 %v2005_v37, %v2011_v57  ;;  %v2007_v24 = vsel %vm1491_vm0, %v1831_v49, -inf  ;;  %v1834_v40 = vadd.f32 %v6949_v54, %v1833_v45 }
 0x372   :  { %v2008_v48 = vmax.f32 %v2003_v39, %v2007_v24  ;;  %v2013_v8 = vsel %vm1491_vm0, %v1842_v44, -inf  ;;  %v2596_v24 = vld [vmem:[#allocation7 + $0x70] sm:$0xff] }
 0x373   :  { %v2014_v17 = vmax.f32 %v2006_v15, %v2013_v8  ;;  %v2009_v16 = vsel %vm1491_vm0, %v1834_v40, -inf  ;;  %v2593_v40 = vld [vmem:[#allocation7 + $0x58] sm:$0xff] }
 0x374   :  { %v2010_v41 = vmax.f32 %v2004_v18, %v2009_v16  ;;  %v2597_v15 = vld [vmem:[#allocation7 + $0x78] sm:$0xff] }
 0x375   :  { %v2016_v42 = vmax.f32 %v2012_v31, %v2014_v17  ;;  %v2592_v31 = vld [vmem:[#allocation7 + $0x50] sm:$0xff] }
 0x376   :  { %v2015_v2 = vmax.f32 %v2008_v48, %v2010_v41  ;;  %v2578_v48 = vpop.permute.xlu1 %2577  ;;  %v5750_v16 = vcombine.high %v2592_v31, %v2596_v24  ;;  %v5752_v41 = vcombine.high %v2593_v40, %v2597_v15 }
 0x378   :  { %v2017_v50 = vmax.f32 %v2015_v2, %v2016_v42  ;;  %v2600_v42 = vld [vmem:[#allocation7 + $0x90] sm:$0xff] }
 0x379   :  { %v2604_v2 = vld [vmem:[#allocation7 + $0xb0] sm:$0xff] }
 0x37a   :  { %v2018_v27 = vrot.slane %v2017_v50, 4  ;;  %v5757_v13 = vcombine.low %v2600_v42, %v2604_v2 }
 0x37c   :  { %v2019_v12 = vmax.f32 %v2017_v50, %v2018_v27  ;;  %v2601_v50 = vld [vmem:[#allocation7 + $0x98] sm:$0xff] }
 0x37d   :  { %v2605_v27 = vld [vmem:[#allocation7 + $0xb8] sm:$0xff] }
 0x37e   :  { %v2020_v47 = vrot.slane %v2019_v12, 2  ;;  %v5759_v46 = vcombine.low %v2601_v50, %v2605_v27 }
 0x380   :  { %v2021_v43 = vmax.f32 %v2019_v12, %v2020_v47  ;;  %v5749_v12 = vcombine.low %v2592_v31, %v2596_v24  ;;  %v5751_v47 = vcombine.low %v2593_v40, %v2597_v15  ;;  %v6450_v31 = vld [vmem:[#allocation8 + $0x24] ss:$16 sps:$4 sm:$0xff]   ;;  %v6453_v24 = vld [vmem:[#allocation8 + $0x2c] ss:$16 sps:$4 sm:$0xff]   ;;  %v6448_v40 = vld [vmem:[#allocation8 + $0x20] ss:$16 sps:$4 sm:$0xff]  }
 0x381   :  { %v6451_v15 = vld [vmem:[#allocation8 + $0x28] ss:$16 sps:$4 sm:$0xff]  }
 0x382   :  { %v2022_v51 = vrot.slane %v2021_v43, 1 }
 0x384   :  { %v2023_v58 = vmax.f32 %v2021_v43, %v2022_v51  ;;  %v5758_v43 = vcombine.high %v2600_v42, %v2604_v2  ;;  %v5760_v51 = vcombine.high %v2601_v50, %v2605_v27  ;;  %v6465_v42 = vld [vmem:[#allocation8 + $0x6c] ss:$16 sps:$4 sm:$0xff]   ;;  %v6460_v2 = vld [vmem:[#allocation8 + $0x60] ss:$16 sps:$4 sm:$0xff]   ;;  %v6468_v50 = vld [vmem:[#allocation8 + $0x84] ss:$16 sps:$4 sm:$0xff]  }
 0x385   :  { %v6471_v27 = vld [vmem:[#allocation8 + $0x8c] ss:$16 sps:$4 sm:$0xff]  }
 0x386   :  { %v2056_v3 = vsel %vm2055_vm6, %v8548_v34, %v2023_v58  ;;  %v2608_v58 = vld [vmem:[#allocation7 + $0xd0] sm:$0xff] }
 0x390   :  { %v6289_v4 = vpop.f32.mrb[56].mxu0 }
 0x391   :  { %v1846_v7 = vpop.f32.mrb[57].mxu0  ;;  %v1855_v5 = vadd.f32 %v6949_v54, %v6289_v4  ;;  %v2609_v4 = vld [vmem:[#allocation7 + $0xd8] sm:$0xff] }
 0x392   :  { %v6290_v26 = vpop.f32.mrb[58].mxu0  ;;  %v1847_v55 = vadd.f32 %v6949_v54, %v1846_v7  ;;  %v2613_v7 = vld [vmem:[#allocation7 + $0xf8] sm:$0xff] }
 0x393   :  { %v1849_v10 = vpop.f32.mrb[59].mxu0  ;;  %v1858_v52 = vadd.f32 %v6949_v54, %v6290_v26  ;;  %v2026_v53 = vsel %vm1491_vm0, %v1855_v5, -inf  ;;  %v5768_v29 = vcombine.high %v2609_v4, %v2613_v7  ;;  %v2617_v26 = vld [vmem:[#allocation7 + $0x118] sm:$0xff] }
 0x394   :  { %v1850_v14 = vadd.f32 %v6949_v54, %v1849_v10  ;;  %v2024_v34 = vsel %vm1491_vm0, %v1847_v55, -inf  ;;  %v2621_v10 = vld [vmem:[#allocation7 + $0x138] sm:$0xff]  ;;  %v5767_v55 = vcombine.low %v2609_v4, %v2613_v7  ;;  %v6480_v4 = vld [vmem:[#allocation8 + $0xc4] ss:$16 sps:$4 sm:$0xff]  }
 0x395   :  { %v2027_v0 = vsel %vm1491_vm0, %v1858_v52, -inf  ;;  %v2624_v52 = vld [vmem:[#allocation7 + $0x150] sm:$0xff]  ;;  %v6483_v7 = vld [vmem:[#allocation8 + $0xcc] ss:$16 sps:$4 sm:$0xff]  }
 0x396   :  { %v2025_v36 = vsel %vm1491_vm0, %v1850_v14, -inf  ;;  %v2629_v14 = vld [vmem:[#allocation7 + $0x178] sm:$0xff] }
 0x3af   :  { %v6293_v60 = vpop.f32.mrb[60].mxu0 }
 0x3b0   :  { %v1871_v32 = vadd.f32 %v6949_v54, %v6293_v60  ;;  %v1862_v20 = vpop.f32.mrb[61].mxu0 }
 0x3b1   :  { %v1863_v28 = vadd.f32 %v6949_v54, %v1862_v20  ;;  %v6294_v35 = vpop.f32.mrb[62].mxu0  ;;  %v2625_v20 = vld [vmem:[#allocation7 + $0x158] sm:$0xff] }
 0x3b2   :  { %v2032_v11 = vsel %vm1491_vm0, %v1871_v32, -inf  ;;  %v1874_v61 = vadd.f32 %v6949_v54, %v6294_v35  ;;  %v1865_v22 = vpop.f32.mrb[63].mxu0  ;;  %v2628_v32 = vld [vmem:[#allocation7 + $0x170] sm:$0xff]  ;;  %v5775_v35 = vcombine.low %v2617_v26, %v2621_v10 }
 0x3b3   :  { %v2033_v1 = vmax.f32 %v2026_v53, %v2032_v11  ;;  %v2028_v56 = vsel %vm1491_vm0, %v1863_v28, -inf  ;;  %v1866_v38 = vadd.f32 %v6949_v54, %v1865_v22  ;;  %v5782_v53 = vcombine.high %v2624_v52, %v2628_v32  ;;  %v2636_v22 = vld [vmem:[#allocation7 + $0x1b0] sm:$0xff] }
 0x3b4   :  { %v2029_v6 = vmax.f32 %v2024_v34, %v2028_v56  ;;  %v2034_v23 = vsel %vm1491_vm0, %v1874_v61, -inf  ;;  %v5784_v11 = vcombine.high %v2625_v20, %v2629_v14  ;;  %v2632_v61 = vld [vmem:[#allocation7 + $0x190] sm:$0xff]  ;;  %v2633_v34 = vld [vmem:[#allocation7 + $0x198] sm:$0xff]  ;;  %v5781_v56 = vcombine.low %v2624_v52, %v2628_v32 }
 0x3b5   :  { %v2035_v19 = vmax.f32 %v2027_v0, %v2034_v23  ;;  %v2030_v30 = vsel %vm1491_vm0, %v1866_v38, -inf  ;;  %v5783_v38 = vcombine.low %v2625_v20, %v2629_v14  ;;  %v5790_v0 = vcombine.high %v2632_v61, %v2636_v22  ;;  %v2640_v23 = vld [vmem:[#allocation7 + $0x1d0] sm:$0xff]  ;;  %v6499_v32 = vld [vmem:[#allocation8 + $0x128] ss:$16 sps:$4 sm:$0xff]   ;;  %v6507_v14 = vld [vmem:[#allocation8 + $0x14c] ss:$16 sps:$4 sm:$0xff]  }
 0x3b6   :  { %v2031_v25 = vmax.f32 %v2025_v36, %v2030_v30  ;;  %v2644_v36 = vld [vmem:[#allocation7 + $0x1f0] sm:$0xff]  ;;  %v2645_v30 = vld [vmem:[#allocation7 + $0x1f8] sm:$0xff] }
 0x3b7   :  { %v2037_v62 = vmax.f32 %v2033_v1, %v2035_v19  ;;  %v2637_v1 = vld [vmem:[#allocation7 + $0x1b8] sm:$0xff]  ;;  %v6496_v52 = vld [vmem:[#allocation8 + $0x120] ss:$16 sps:$4 sm:$0xff]   ;;  %v6504_v20 = vld [vmem:[#allocation8 + $0x144] ss:$16 sps:$4 sm:$0xff]  }
 0x3b8   :  { %v2036_v49 = vmax.f32 %v2029_v6, %v2031_v25  ;;  %v5792_v6 = vcombine.high %v2633_v34, %v2637_v1  ;;  %v2641_v19 = vld [vmem:[#allocation7 + $0x1d8] sm:$0xff]  ;;  %v5789_v25 = vcombine.low %v2632_v61, %v2636_v22  ;;  %v6508_v61 = vld [vmem:[#allocation8 + $0x160] ss:$16 sps:$4 sm:$0xff]  }
 0x3b9   :  { %v6511_v22 = vld [vmem:[#allocation8 + $0x168] ss:$16 sps:$4 sm:$0xff]  }
 0x3ba   :  { %v2038_v59 = vmax.f32 %v2036_v49, %v2037_v62  ;;  %v5791_v62 = vcombine.low %v2633_v34, %v2637_v1  ;;  %v5798_v49 = vcombine.high %v2640_v23, %v2644_v36  ;;  %v6516_v34 = vld [vmem:[#allocation8 + $0x184] ss:$16 sps:$4 sm:$0xff]   ;;  %v6519_v1 = vld [vmem:[#allocation8 + $0x18c] ss:$16 sps:$4 sm:$0xff]  }
 0x3bc   :  { %v2039_v37 = vrot.slane %v2038_v59, 4 }
 0x3be   :  { %v2040_v57 = vmax.f32 %v2038_v59, %v2039_v37  ;;  %v5800_v59 = vcombine.high %v2641_v19, %v2645_v30  ;;  %v5797_v37 = vcombine.low %v2640_v23, %v2644_v36  ;;  %v6520_v23 = vld [vmem:[#allocation8 + $0x1a0] ss:$16 sps:$4 sm:$0xff]   ;;  %v6523_v36 = vld [vmem:[#allocation8 + $0x1a8] ss:$16 sps:$4 sm:$0xff]  }
 0x3c0   :  { %v2041_v44 = vrot.slane %v2040_v57, 2 }
 0x3c2   :  { %v2042_v45 = vmax.f32 %v2040_v57, %v2041_v44  ;;  %v5799_v57 = vcombine.low %v2641_v19, %v2645_v30  ;;  %v6444_v44 = vld [vmem:[#allocation8 + $0x4] ss:$16 sps:$4 sm:$0xff]   ;;  %v6531_v30 = vld [vmem:[#allocation8 + $0x1cc] ss:$16 sps:$4 sm:$0xff]  }
 0x3c3   :  { %v6528_v19 = vld [vmem:[#allocation8 + $0x1c4] ss:$16 sps:$4 sm:$0xff]  }
 0x3c4   :  { %v2043_v39 = vrot.slane %v2042_v45, 1 }
 0x3c6   :  { %v2044_v54 = vmax.f32 %v2042_v45, %v2043_v39  ;;  %v6447_v45 = vld [vmem:[#allocation8 + $0xc] ss:$16 sps:$4 sm:$0xff]   ;;  %v6442_v39 = vld [vmem:[#allocation8] ss:$16 sps:$4 sm:$0xff]  }
 0x3c8   :  { %v2058_v8 = vsel %vm2057_vm7, %v2056_v3, %v2044_v54  ;;  %v2612_v3 = vld [vmem:[#allocation7 + $0xf0] sm:$0xff]  ;;  %v6445_v54 = vld [vmem:[#allocation8 + $0x8] ss:$16 sps:$4 sm:$0xff]  }
 0x3c9   :  { %v2580_v18 = vsel %vm1491_vm0, %v2058_v8, %v2578_v48  ;;  %v5765_v5 = vcombine.low %v2608_v58, %v2612_v3  ;;  %v6456_v48 = vld [vmem:[#allocation8 + $0x44] ss:$16 sps:$4 sm:$0xff]   ;;  %v6459_v8 = vld [vmem:[#allocation8 + $0x4c] ss:$16 sps:$4 sm:$0xff]  }
 0x3ca   :  { %v8584_v17 = vpack.c.bf16 %v2580_v18, %v2580_v18  ;;  %v6454_v18 = vld [vmem:[#allocation8 + $0x40] ss:$16 sps:$4 sm:$0xff]  }
 0x3cc   :  { %3044 = vmatmul.mubr.bf16.vlgmr.msra.gmra.mrb[12].mxu1 %v8584_v17  ;;  %3085 = vmatmul.mubr.bf16.vlgmr.msra.gmra.mrb[64].mxu0 %v8584_v17 }
 0x3cd   :  { %3094 = vmatpush1.bf16.msra.mxu1 %v5741_v63  ;;  %3135 = vmatpush1.bf16.msra.mxu0 %v5743_v21  ;;  %v5766_v63 = vcombine.high %v2608_v58, %v2612_v3  ;;  %v2620_v21 = vld [vmem:[#allocation7 + $0x130] sm:$0xff]  ;;  %v6475_v3 = vld [vmem:[#allocation8 + $0xa8] ss:$16 sps:$4 sm:$0xff]  }
 0x3ce   :  { %3095 = vmatprep.subr.bf16.mxu1 %v5750_v16  ;;  %3136 = vmatprep.subr.bf16.mxu0 %v5752_v41  ;;  %v5774_v60 = vcombine.high %v2616_v33, %v2620_v21  ;;  %v5773_v28 = vcombine.low %v2616_v33, %v2620_v21  ;;  %v6457_v16 = vld [vmem:[#allocation8 + $0x48] ss:$16 sps:$4 sm:$0xff]   ;;  %v6462_v41 = vld [vmem:[#allocation8 + $0x64] ss:$16 sps:$4 sm:$0xff]   ;;  %v6472_v58 = vld [vmem:[#allocation8 + $0xa0] ss:$16 sps:$4 sm:$0xff]  }
 0x3cf   :  { %3125 = vmatprep.mubr.bf16.mxu1 %v8702_v9  ;;  %3166 = vmatprep.mubr.bf16.mxu0 %v8702_v9  ;;  %v5776_v9 = vcombine.high %v2617_v26, %v2621_v10  ;;  %v6484_v33 = vld [vmem:[#allocation8 + $0xe0] ss:$16 sps:$4 sm:$0xff]   ;;  %v6487_v21 = vld [vmem:[#allocation8 + $0xe8] ss:$16 sps:$4 sm:$0xff]   ;;  %v6492_v26 = vld [vmem:[#allocation8 + $0x104] ss:$16 sps:$4 sm:$0xff]  }
 0x3d0   :  { %v6495_v10 = vld [vmem:[#allocation8 + $0x10c] ss:$16 sps:$4 sm:$0xff]  }
 0x3d1   :  { %3096 = vmatpush1.bf16.msra.mxu1 %v5749_v12  ;;  %3137 = vmatpush1.bf16.msra.mxu0 %v5751_v47  ;;  %v6466_v12 = vld [vmem:[#allocation8 + $0x80] ss:$16 sps:$4 sm:$0xff]   ;;  %v6469_v47 = vld [vmem:[#allocation8 + $0x88] ss:$16 sps:$4 sm:$0xff]  }
 0x3d2   :  { %3097 = vmatprep.subr.bf16.mxu1 %v5758_v43  ;;  %3138 = vmatprep.subr.bf16.mxu0 %v5760_v51  ;;  %v6474_v43 = vld [vmem:[#allocation8 + $0xa4] ss:$16 sps:$4 sm:$0xff]   ;;  %v6477_v51 = vld [vmem:[#allocation8 + $0xac] ss:$16 sps:$4 sm:$0xff]  }
 0x3d5   :  { %3098 = vmatpush1.bf16.msra.mxu1 %v5757_v13  ;;  %3139 = vmatpush1.bf16.msra.mxu0 %v5759_v46  ;;  %v6478_v13 = vld [vmem:[#allocation8 + $0xc0] ss:$16 sps:$4 sm:$0xff]   ;;  %v6481_v46 = vld [vmem:[#allocation8 + $0xc8] ss:$16 sps:$4 sm:$0xff]  }
 0x3d6   :  { %3099 = vmatprep.subr.bf16.mxu1 %v5766_v63  ;;  %3140 = vmatprep.subr.bf16.mxu0 %v5768_v29  ;;  %v6486_v63 = vld [vmem:[#allocation8 + $0xe4] ss:$16 sps:$4 sm:$0xff]   ;;  %v6489_v29 = vld [vmem:[#allocation8 + $0xec] ss:$16 sps:$4 sm:$0xff]  }
 0x3d9   :  { %3100 = vmatpush1.bf16.msra.mxu1 %v5765_v5  ;;  %3141 = vmatpush1.bf16.msra.mxu0 %v5767_v55  ;;  %v6490_v5 = vld [vmem:[#allocation8 + $0x100] ss:$16 sps:$4 sm:$0xff]   ;;  %v6493_v55 = vld [vmem:[#allocation8 + $0x108] ss:$16 sps:$4 sm:$0xff]  }
 0x3da   :  { %3101 = vmatprep.subr.bf16.mxu1 %v5774_v60  ;;  %3142 = vmatprep.subr.bf16.mxu0 %v5776_v9  ;;  %v6498_v60 = vld [vmem:[#allocation8 + $0x124] ss:$16 sps:$4 sm:$0xff]   ;;  %v6501_v9 = vld [vmem:[#allocation8 + $0x12c] ss:$16 sps:$4 sm:$0xff]  }
 0x3dd   :  { %3102 = vmatpush1.bf16.msra.mxu1 %v5773_v28  ;;  %3143 = vmatpush1.bf16.msra.mxu0 %v5775_v35  ;;  %v6502_v28 = vld [vmem:[#allocation8 + $0x140] ss:$16 sps:$4 sm:$0xff]   ;;  %v6505_v35 = vld [vmem:[#allocation8 + $0x148] ss:$16 sps:$4 sm:$0xff]  }
 0x3de   :  { %3103 = vmatprep.subr.bf16.mxu1 %v5782_v53  ;;  %3144 = vmatprep.subr.bf16.mxu0 %v5784_v11  ;;  %v6510_v53 = vld [vmem:[#allocation8 + $0x164] ss:$16 sps:$4 sm:$0xff]   ;;  %v6513_v11 = vld [vmem:[#allocation8 + $0x16c] ss:$16 sps:$4 sm:$0xff]  }
 0x3e1   :  { %3104 = vmatpush1.bf16.msra.mxu1 %v5781_v56  ;;  %3145 = vmatpush1.bf16.msra.mxu0 %v5783_v38  ;;  %v6514_v56 = vld [vmem:[#allocation8 + $0x180] ss:$16 sps:$4 sm:$0xff]   ;;  %v6517_v38 = vld [vmem:[#allocation8 + $0x188] ss:$16 sps:$4 sm:$0xff]  }
 0x3e2   :  { %3105 = vmatprep.subr.bf16.mxu1 %v5790_v0  ;;  %3146 = vmatprep.subr.bf16.mxu0 %v5792_v6  ;;  %v6522_v0 = vld [vmem:[#allocation8 + $0x1a4] ss:$16 sps:$4 sm:$0xff]   ;;  %v6525_v6 = vld [vmem:[#allocation8 + $0x1ac] ss:$16 sps:$4 sm:$0xff]  }
 0x3e5   :  { %3106 = vmatpush1.bf16.msra.mxu1 %v5789_v25  ;;  %3147 = vmatpush1.bf16.msra.mxu0 %v5791_v62  ;;  %v6526_v25 = vld [vmem:[#allocation8 + $0x1c0] ss:$16 sps:$4 sm:$0xff]   ;;  %v6529_v62 = vld [vmem:[#allocation8 + $0x1c8] ss:$16 sps:$4 sm:$0xff]  }
 0x3e6   :  { %3107 = vmatprep.subr.bf16.mxu1 %v5798_v49  ;;  %3148 = vmatprep.subr.bf16.mxu0 %v5800_v59  ;;  %v6534_v49 = vld [vmem:[#allocation8 + $0x1e4] ss:$16 sps:$4 sm:$0xff]   ;;  %v6537_v59 = vld [vmem:[#allocation8 + $0x1ec] ss:$16 sps:$4 sm:$0xff]  }
 0x3e9   :  { %3108 = vmatpush1.bf16.msra.mxu1 %v5797_v37  ;;  %3149 = vmatpush1.bf16.msra.mxu0 %v5799_v57  ;;  %v6532_v37 = vld [vmem:[#allocation8 + $0x1e0] ss:$16 sps:$4 sm:$0xff]   ;;  %v6535_v57 = vld [vmem:[#allocation8 + $0x1e8] ss:$16 sps:$4 sm:$0xff]  }
 0x3ea   :  { %4750 = vmatprep.subr.bf16.mxu1 %v6444_v44  ;;  %4914 = vmatprep.subr.bf16.mxu0 %v6447_v45  ;;  %v6540_v44 = vld [vmem:[#allocation8 + $0x204] ss:$16 sps:$4 sm:$0xff]   ;;  %v6543_v45 = vld [vmem:[#allocation8 + $0x20c] ss:$16 sps:$4 sm:$0xff]  }
 0x3ec   :  { %3126 = vmatmul.mubr.bf16.vlgmr.msra.gmra.mrb[16].mxu1 %v8584_v17  ;;  %3167 = vmatmul.mubr.bf16.vlgmr.msra.gmra.mrb[68].mxu0 %v8584_v17  ;;  %v6463_v17 = vld [vmem:[#allocation8 + $0x68] ss:$16 sps:$4 sm:$0xff]  }
 0x3ed   :  { %4751 = vmatpush1.bf16.msra.mxu1 %v6442_v39  ;;  %4915 = vmatpush1.bf16.msra.mxu0 %v6445_v54  ;;  %v2651_v39 = vlaneseq }
 0x3ee   :  { %4752 = vmatprep.subr.bf16.mxu1 %v6450_v31  ;;  %4916 = vmatprep.subr.bf16.mxu0 %v6453_v24  ;;  %v2647_v31 = vld [vmem:[#allocation5 + $0x3] ss:$8 sm:$0xf] }
 0x3ef   :  { %v8599_v54 = vshrl.u32 %v2651_v39, 7  ;;  %v2648_v24 = vld [vmem:[#allocation5 + $0x3] ss:$8 sm:$0xf0] }
 0x3f1   :  { %4753 = vmatpush1.bf16.msra.mxu1 %v6448_v40  ;;  %4917 = vmatpush1.bf16.msra.mxu0 %v6451_v15  ;;  %v8601_v40 = vor.u32 %v2648_v24, %v2647_v31  ;;  %v8604_v15 = vsub.s32 0, %v8599_v54 }
 0x3f2   :  { %4754 = vmatprep.subr.bf16.mxu1 %v6456_v48  ;;  %4918 = vmatprep.subr.bf16.mxu0 %v6459_v8  ;;  %v8607_v48 = vsub.s32 1, %v8599_v54  ;;  %v2665_v8 = vsub.s32 3, %v8599_v54 }
 0x3f5   :  { %4755 = vmatpush1.bf16.msra.mxu1 %v6454_v18  ;;  %4919 = vmatpush1.bf16.msra.mxu0 %v6457_v16  ;;  %v2654_v18 = vrot.slane %v8601_v40, %v8604_v15  ;;  %v2658_v16 = vrot.slane %v8601_v40, %v8607_v48 }
 0x3f6   :  { %4756 = vmatprep.subr.bf16.mxu1 %v6462_v41  ;;  %4920 = vmatprep.subr.bf16.mxu0 %v6465_v42  ;;  %v2666_v41 = vrot.slane %v8601_v40, %v2665_v8 }
 0x3f9   :  { %4757 = vmatpush1.bf16.msra.mxu1 %v6460_v2  ;;  %4921 = vmatpush1.bf16.msra.mxu0 %v6463_v17 }
 0x3fa   :  { %4758 = vmatprep.subr.bf16.mxu1 %v6468_v50  ;;  %4922 = vmatprep.subr.bf16.mxu0 %v6471_v27 }
 0x3fd   :  { %4759 = vmatpush1.bf16.msra.mxu1 %v6466_v12  ;;  %4923 = vmatpush1.bf16.msra.mxu0 %v6469_v47 }
 0x3fe   :  { %4760 = vmatprep.subr.bf16.mxu1 %v6474_v43  ;;  %4924 = vmatprep.subr.bf16.mxu0 %v6477_v51 }
 0x401   :  { %4761 = vmatpush1.bf16.msra.mxu1 %v6472_v58  ;;  %4925 = vmatpush1.bf16.msra.mxu0 %v6475_v3 }
 0x402   :  { %4762 = vmatprep.subr.bf16.mxu1 %v6480_v4  ;;  %4926 = vmatprep.subr.bf16.mxu0 %v6483_v7 }
 0x405   :  { %4763 = vmatpush1.bf16.msra.mxu1 %v6478_v13  ;;  %4927 = vmatpush1.bf16.msra.mxu0 %v6481_v46 }
 0x406   :  { %4764 = vmatprep.subr.bf16.mxu1 %v6486_v63  ;;  %4928 = vmatprep.subr.bf16.mxu0 %v6489_v29  ;;  %v6538_v63 = vld [vmem:[#allocation8 + $0x200] ss:$16 sps:$4 sm:$0xff]   ;;  %v6541_v29 = vld [vmem:[#allocation8 + $0x208] ss:$16 sps:$4 sm:$0xff]  }
 0x409   :  { %4765 = vmatpush1.bf16.msra.mxu1 %v6484_v33  ;;  %4929 = vmatpush1.bf16.msra.mxu0 %v6487_v21  ;;  %v6546_v21 = vld [vmem:[#allocation8 + $0x224] ss:$16 sps:$4 sm:$0xff]  }
 0x40a   :  { %4766 = vmatprep.subr.bf16.mxu1 %v6492_v26  ;;  %4930 = vmatprep.subr.bf16.mxu0 %v6495_v10  ;;  %v6549_v26 = vld [vmem:[#allocation8 + $0x22c] ss:$16 sps:$4 sm:$0xff]  }
 0x40d   :  { %4767 = vmatpush1.bf16.msra.mxu1 %v6490_v5  ;;  %4931 = vmatpush1.bf16.msra.mxu0 %v6493_v55  ;;  %v6544_v5 = vld [vmem:[#allocation8 + $0x220] ss:$16 sps:$4 sm:$0xff]   ;;  %v6547_v55 = vld [vmem:[#allocation8 + $0x228] ss:$16 sps:$4 sm:$0xff]  }
 0x40e   :  { %4768 = vmatprep.subr.bf16.mxu1 %v6498_v60  ;;  %4932 = vmatprep.subr.bf16.mxu0 %v6501_v9  ;;  %v6552_v60 = vld [vmem:[#allocation8 + $0x244] ss:$16 sps:$4 sm:$0xff]   ;;  %v6555_v9 = vld [vmem:[#allocation8 + $0x24c] ss:$16 sps:$4 sm:$0xff]  }
 0x411   :  { %4769 = vmatpush1.bf16.msra.mxu1 %v6496_v52  ;;  %4933 = vmatpush1.bf16.msra.mxu0 %v6499_v32  ;;  %v6550_v52 = vld [vmem:[#allocation8 + $0x240] ss:$16 sps:$4 sm:$0xff]   ;;  %v6553_v32 = vld [vmem:[#allocation8 + $0x248] ss:$16 sps:$4 sm:$0xff]  }
 0x412   :  { %4770 = vmatprep.subr.bf16.mxu1 %v6504_v20  ;;  %4934 = vmatprep.subr.bf16.mxu0 %v6507_v14  ;;  %v6558_v20 = vld [vmem:[#allocation8 + $0x264] ss:$16 sps:$4 sm:$0xff]   ;;  %v6561_v14 = vld [vmem:[#allocation8 + $0x26c] ss:$16 sps:$4 sm:$0xff]  }
 0x415   :  { %4771 = vmatpush1.bf16.msra.mxu1 %v6502_v28  ;;  %4935 = vmatpush1.bf16.msra.mxu0 %v6505_v35  ;;  %v6556_v28 = vld [vmem:[#allocation8 + $0x260] ss:$16 sps:$4 sm:$0xff]   ;;  %v6559_v35 = vld [vmem:[#allocation8 + $0x268] ss:$16 sps:$4 sm:$0xff]  }
 0x416   :  { %4772 = vmatprep.subr.bf16.mxu1 %v6510_v53  ;;  %4936 = vmatprep.subr.bf16.mxu0 %v6513_v11  ;;  %v6564_v53 = vld [vmem:[#allocation8 + $0x284] ss:$16 sps:$4 sm:$0xff]   ;;  %v6567_v11 = vld [vmem:[#allocation8 + $0x28c] ss:$16 sps:$4 sm:$0xff]  }
 0x419   :  { %4773 = vmatpush1.bf16.msra.mxu1 %v6508_v61  ;;  %4937 = vmatpush1.bf16.msra.mxu0 %v6511_v22  ;;  %v6562_v61 = vld [vmem:[#allocation8 + $0x280] ss:$16 sps:$4 sm:$0xff]   ;;  %v6565_v22 = vld [vmem:[#allocation8 + $0x288] ss:$16 sps:$4 sm:$0xff]  }
 0x41a   :  { %4774 = vmatprep.subr.bf16.mxu1 %v6516_v34  ;;  %4938 = vmatprep.subr.bf16.mxu0 %v6519_v1  ;;  %v6570_v34 = vld [vmem:[#allocation8 + $0x2a4] ss:$16 sps:$4 sm:$0xff]   ;;  %v6573_v1 = vld [vmem:[#allocation8 + $0x2ac] ss:$16 sps:$4 sm:$0xff]  }
 0x41d   :  { %4775 = vmatpush1.bf16.msra.mxu1 %v6514_v56  ;;  %4939 = vmatpush1.bf16.msra.mxu0 %v6517_v38  ;;  %v6568_v56 = vld [vmem:[#allocation8 + $0x2a0] ss:$16 sps:$4 sm:$0xff]   ;;  %v6571_v38 = vld [vmem:[#allocation8 + $0x2a8] ss:$16 sps:$4 sm:$0xff]  }
 0x41e   :  { %4776 = vmatprep.subr.bf16.mxu1 %v6522_v0  ;;  %4940 = vmatprep.subr.bf16.mxu0 %v6525_v6  ;;  %v6576_v0 = vld [vmem:[#allocation8 + $0x2c4] ss:$16 sps:$4 sm:$0xff]   ;;  %v6579_v6 = vld [vmem:[#allocation8 + $0x2cc] ss:$16 sps:$4 sm:$0xff]  }
 0x421   :  { %4777 = vmatpush1.bf16.msra.mxu1 %v6520_v23  ;;  %4941 = vmatpush1.bf16.msra.mxu0 %v6523_v36  ;;  %v6574_v23 = vld [vmem:[#allocation8 + $0x2c0] ss:$16 sps:$4 sm:$0xff]   ;;  %v6577_v36 = vld [vmem:[#allocation8 + $0x2c8] ss:$16 sps:$4 sm:$0xff]  }
 0x422   :  { %4778 = vmatprep.subr.bf16.mxu1 %v6528_v19  ;;  %4942 = vmatprep.subr.bf16.mxu0 %v6531_v30  ;;  %v6582_v19 = vld [vmem:[#allocation8 + $0x2e4] ss:$16 sps:$4 sm:$0xff]   ;;  %v6585_v30 = vld [vmem:[#allocation8 + $0x2ec] ss:$16 sps:$4 sm:$0xff]  }
 0x425   :  { %4779 = vmatpush1.bf16.msra.mxu1 %v6526_v25  ;;  %4943 = vmatpush1.bf16.msra.mxu0 %v6529_v62 }
 0x426   :  { %4780 = vmatprep.subr.bf16.mxu1 %v6534_v49  ;;  %4944 = vmatprep.subr.bf16.mxu0 %v6537_v59 }
 0x429   :  { %4781 = vmatpush1.bf16.msra.mxu1 %v6532_v37  ;;  %4945 = vmatpush1.bf16.msra.mxu0 %v6535_v57 }
 0x42a   :  { %4791 = vmatprep.subr.bf16.mxu1 %v6540_v44  ;;  %4955 = vmatprep.subr.bf16.mxu0 %v6543_v45  ;;  %v6580_v44 = vld [vmem:[#allocation8 + $0x2e0] ss:$16 sps:$4 sm:$0xff]   ;;  %v6583_v45 = vld [vmem:[#allocation8 + $0x2e8] ss:$16 sps:$4 sm:$0xff]  }
 0x49f   :  { %v3045_v42 = vpop.f32.mrb[12].mxu1  ;;  %v8617_v2 = vpop.f32.mrb[64].mxu0 }
 0x4a0   :  { %v3046_v17 = vadd.f32 %v3045_v42, %v2654_v18  ;;  %v3047_v50 = vpop.f32.mrb[13].mxu1  ;;  %v3088_v27 = vpop.f32.mrb[65].mxu0  ;;  %v6588_v18 = vld [vmem:[#allocation8 + $0x304] ss:$16 sps:$4 sm:$0xff]   ;;  %v6589_v42 = vld [vmem:[#allocation8 + $0x308] ss:$16 sps:$4 sm:$0xff]  }
 0x4a1   :  { %v3048_v12 = vadd.f32 %v3047_v50, %v2658_v16  ;;  %v3089_v47 = vadd.f32 %v3088_v27, %v2666_v41  ;;  %v3049_v43 = vpop.f32.mrb[14].mxu1  ;;  %v3090_v51 = vpop.f32.mrb[66].mxu0  ;;  %v6591_v16 = vld [vmem:[#allocation8 + $0x30c] ss:$16 sps:$4 sm:$0xff]   ;;  %v6586_v41 = vld [vmem:[#allocation8 + $0x300] ss:$16 sps:$4 sm:$0xff]  }
 0x4a2   :  { %v3175_v58 = vmax.f32 %v3046_v17, 0.0  ;;  %v3050_v3 = vpop.f32.mrb[15].mxu1  ;;  %v3091_v4 = vpop.f32.mrb[67].mxu0  ;;  %v6594_v17 = vld [vmem:[#allocation8 + $0x324] ss:$16 sps:$4 sm:$0xff]  }
 0x4a3   :  { %v3176_v7 = vmax.f32 %v3048_v12, 0.0  ;;  %v3178_v13 = vmax.f32 %v3089_v47, 0.0  ;;  %v6597_v50 = vld [vmem:[#allocation8 + $0x32c] ss:$16 sps:$4 sm:$0xff]   ;;  %v6592_v27 = vld [vmem:[#allocation8 + $0x320] ss:$16 sps:$4 sm:$0xff]  }
 0x4a4   :  { %v3183_v33 = vpack.c.bf16 %v3175_v58, %v3175_v58  ;;  %v6595_v12 = vld [vmem:[#allocation8 + $0x328] ss:$16 sps:$4 sm:$0xff]   ;;  %v6600_v47 = vld [vmem:[#allocation8 + $0x344] ss:$16 sps:$4 sm:$0xff]   ;;  %v6603_v43 = vld [vmem:[#allocation8 + $0x34c] ss:$16 sps:$4 sm:$0xff]  }
 0x4a5   :  { %v3184_v46 = vpack.c.bf16 %v3176_v7, %v3176_v7  ;;  %v3186_v10 = vpack.c.bf16 %v3178_v13, %v3178_v13  ;;  %v6598_v51 = vld [vmem:[#allocation8 + $0x340] ss:$16 sps:$4 sm:$0xff]   ;;  %v6601_v58 = vld [vmem:[#allocation8 + $0x348] ss:$16 sps:$4 sm:$0xff]   ;;  %v6606_v3 = vld [vmem:[#allocation8 + $0x364] ss:$16 sps:$4 sm:$0xff]  }
 0x4a6   :  { %v6609_v4 = vld [vmem:[#allocation8 + $0x36c] ss:$16 sps:$4 sm:$0xff]   ;;  %v6604_v7 = vld [vmem:[#allocation8 + $0x360] ss:$16 sps:$4 sm:$0xff]   ;;  %v6607_v13 = vld [vmem:[#allocation8 + $0x368] ss:$16 sps:$4 sm:$0xff]  }
 0x4a7   :  { %4782 = vmatprep.mubr.bf16.mxu1 %v3184_v46  ;;  %4946 = vmatprep.mubr.bf16.mxu0 %v3184_v46  ;;  %v6612_v46 = vld [vmem:[#allocation8 + $0x384] ss:$16 sps:$4 sm:$0xff]  }
 0x4a8   :  { %4783 = vmatmul.mubr.bf16.vlgmr.msra.gmra.mrb[20].mxu1 %v3183_v33  ;;  %4947 = vmatmul.mubr.bf16.vlgmr.msra.gmra.mrb[72].mxu0 %v3183_v33  ;;  %v6613_v33 = vld [vmem:[#allocation8 + $0x388] ss:$16 sps:$4 sm:$0xff]  }
 0x4a9   :  { %4792 = vmatpush1.bf16.msra.mxu1 %v6538_v63  ;;  %4956 = vmatpush1.bf16.msra.mxu0 %v6541_v29  ;;  %v6615_v63 = vld [vmem:[#allocation8 + $0x38c] ss:$16 sps:$4 sm:$0xff]   ;;  %v6610_v29 = vld [vmem:[#allocation8 + $0x380] ss:$16 sps:$4 sm:$0xff]  }
 0x4aa   :  { %4823 = vmatprep.mubr.bf16.mxu1 %v3186_v10  ;;  %4987 = vmatprep.mubr.bf16.mxu0 %v3186_v10  ;;  %v6621_v10 = vld [vmem:[#allocation8 + $0x3ac] ss:$16 sps:$4 sm:$0xff]  }
 0x4ab   :  { %4793 = vmatprep.subr.bf16.mxu1 %v6546_v21  ;;  %4957 = vmatprep.subr.bf16.mxu0 %v6549_v26  ;;  %v2661_v21 = vsub.s32 2, %v8599_v54  ;;  %v6618_v26 = vld [vmem:[#allocation8 + $0x3a4] ss:$16 sps:$4 sm:$0xff]  }
 0x4ad   :  { %4794 = vmatpush1.bf16.msra.mxu1 %v6544_v5  ;;  %4958 = vmatpush1.bf16.msra.mxu0 %v6547_v55  ;;  %v2673_v5 = vsub.s32 5, %v8599_v54  ;;  %v6616_v55 = vld [vmem:[#allocation8 + $0x3a0] ss:$16 sps:$4 sm:$0xff]  }
 0x4ae   :  { %4795 = vmatprep.subr.bf16.mxu1 %v6552_v60  ;;  %4959 = vmatprep.subr.bf16.mxu0 %v6555_v9  ;;  %v6619_v60 = vld [vmem:[#allocation8 + $0x3a8] ss:$16 sps:$4 sm:$0xff]   ;;  %v2662_v9 = vrot.slane %v8601_v40, %v2661_v21 }
 0x4b1   :  { %4796 = vmatpush1.bf16.msra.mxu1 %v6550_v52  ;;  %4960 = vmatpush1.bf16.msra.mxu0 %v6553_v32  ;;  %v6624_v52 = vld [vmem:[#allocation8 + $0x3c4] ss:$16 sps:$4 sm:$0xff]   ;;  %v6627_v32 = vld [vmem:[#allocation8 + $0x3cc] ss:$16 sps:$4 sm:$0xff]  }
 0x4b2   :  { %4797 = vmatprep.subr.bf16.mxu1 %v6558_v20  ;;  %4961 = vmatprep.subr.bf16.mxu0 %v6561_v14  ;;  %v2674_v20 = vrot.slane %v8601_v40, %v2673_v5  ;;  %v6622_v14 = vld [vmem:[#allocation8 + $0x3c0] ss:$16 sps:$4 sm:$0xff]   ;;  %v6685_v5 = vld [vmem:[#allocation8 + $0x508] ss:$16 sps:$4 sm:$0xff]  }
 0x4b5   :  { %4798 = vmatpush1.bf16.msra.mxu1 %v6556_v28  ;;  %4962 = vmatpush1.bf16.msra.mxu0 %v6559_v35  ;;  %v6625_v28 = vld [vmem:[#allocation8 + $0x3c8] ss:$16 sps:$4 sm:$0xff]   ;;  %v3087_v35 = vadd.f32 %v8617_v2, %v2662_v9  ;;  %v6688_v9 = vld [vmem:[#allocation8 + $0x520] ss:$16 sps:$4 sm:$0xff]  }
 0x4b6   :  { %4799 = vmatprep.subr.bf16.mxu1 %v6564_v53  ;;  %4963 = vmatprep.subr.bf16.mxu0 %v6567_v11  ;;  %v6630_v53 = vld [vmem:[#allocation8 + $0x3e4] ss:$16 sps:$4 sm:$0xff]   ;;  %v6633_v11 = vld [vmem:[#allocation8 + $0x3ec] ss:$16 sps:$4 sm:$0xff]  }
 0x4b9   :  { %4800 = vmatpush1.bf16.msra.mxu1 %v6562_v61  ;;  %4964 = vmatpush1.bf16.msra.mxu0 %v6565_v22  ;;  %v6628_v22 = vld [vmem:[#allocation8 + $0x3e0] ss:$16 sps:$4 sm:$0xff]  }
 0x4ba   :  { %4801 = vmatprep.subr.bf16.mxu1 %v6570_v34  ;;  %4965 = vmatprep.subr.bf16.mxu0 %v6573_v1  ;;  %v6631_v34 = vld [vmem:[#allocation8 + $0x3e8] ss:$16 sps:$4 sm:$0xff]   ;;  %v3177_v1 = vmax.f32 %v3087_v35, 0.0  ;;  %v6702_v35 = vld [vmem:[#allocation8 + $0x564] ss:$16 sps:$4 sm:$0xff]  }
 0x4bc   :  { %v3185_v2 = vpack.c.bf16 %v3177_v1, %v3177_v1  ;;  %v6706_v1 = vld [vmem:[#allocation8 + $0x580] ss:$16 sps:$4 sm:$0xff]  }
 0x4bd   :  { %4802 = vmatpush1.bf16.msra.mxu1 %v6568_v56  ;;  %4966 = vmatpush1.bf16.msra.mxu0 %v6571_v38  ;;  %v6636_v56 = vld [vmem:[#allocation8 + $0x404] ss:$16 sps:$4 sm:$0xff]   ;;  %v6639_v38 = vld [vmem:[#allocation8 + $0x40c] ss:$16 sps:$4 sm:$0xff]  }
 0x4be   :  { %4803 = vmatprep.subr.bf16.mxu1 %v6576_v0  ;;  %4967 = vmatprep.subr.bf16.mxu0 %v6579_v6  ;;  %v6634_v6 = vld [vmem:[#allocation8 + $0x400] ss:$16 sps:$4 sm:$0xff]  }
 0x4bf   :  { %v8619_v25 = vpop.f32.mrb[16].mxu1  ;;  %v8621_v62 = vpop.f32.mrb[68].mxu0 }
 0x4c0   :  { %v8623_v49 = vpop.f32.mrb[17].mxu1  ;;  %v8625_v59 = vpop.f32.mrb[69].mxu0 }
 0x4c1   :  { %v3131_v37 = vpop.f32.mrb[18].mxu1  ;;  %v3172_v57 = vpop.f32.mrb[70].mxu0  ;;  %4804 = vmatpush1.bf16.msra.mxu1 %v6574_v23  ;;  %4968 = vmatpush1.bf16.msra.mxu0 %v6577_v36  ;;  %v3130_v61 = vadd.f32 %v8623_v49, %v2674_v20  ;;  %v6637_v23 = vld [vmem:[#allocation8 + $0x408] ss:$16 sps:$4 sm:$0xff]   ;;  %v6640_v49 = vld [vmem:[#allocation8 + $0x420] ss:$16 sps:$4 sm:$0xff]  }
 0x4c2   :  { %v3132_v31 = vpop.f32.mrb[19].mxu1  ;;  %v3173_v24 = vpop.f32.mrb[71].mxu0  ;;  %4805 = vmatprep.subr.bf16.mxu1 %v6582_v19  ;;  %4969 = vmatprep.subr.bf16.mxu0 %v6585_v30  ;;  %v6642_v19 = vld [vmem:[#allocation8 + $0x424] ss:$16 sps:$4 sm:$0xff]   ;;  %v6645_v30 = vld [vmem:[#allocation8 + $0x42c] ss:$16 sps:$4 sm:$0xff]  }
 0x4c3   :  { %v3180_v0 = vmax.f32 %v3130_v61, 0.0  ;;  %v6643_v37 = vld [vmem:[#allocation8 + $0x428] ss:$16 sps:$4 sm:$0xff]   ;;  %v6648_v57 = vld [vmem:[#allocation8 + $0x444] ss:$16 sps:$4 sm:$0xff]  }
 0x4c4   :  { %v6649_v31 = vld [vmem:[#allocation8 + $0x448] ss:$16 sps:$4 sm:$0xff]   ;;  %v6654_v24 = vld [vmem:[#allocation8 + $0x464] ss:$16 sps:$4 sm:$0xff]   ;;  %v6699_v20 = vld [vmem:[#allocation8 + $0x54c] ss:$16 sps:$4 sm:$0xff]  }
 0x4c5   :  { %4806 = vmatpush1.bf16.msra.mxu1 %v6580_v44  ;;  %4970 = vmatpush1.bf16.msra.mxu0 %v6583_v45  ;;  %v3188_v36 = vpack.c.bf16 %v3180_v0, %v3180_v0  ;;  %v6651_v44 = vld [vmem:[#allocation8 + $0x44c] ss:$16 sps:$4 sm:$0xff]   ;;  %v6646_v45 = vld [vmem:[#allocation8 + $0x440] ss:$16 sps:$4 sm:$0xff]   ;;  %v6703_v61 = vld [vmem:[#allocation8 + $0x568] ss:$16 sps:$4 sm:$0xff]  }
 0x4c6   :  { %4807 = vmatprep.subr.bf16.mxu1 %v6588_v18  ;;  %4971 = vmatprep.subr.bf16.mxu0 %v6591_v16  ;;  %v6657_v18 = vld [vmem:[#allocation8 + $0x46c] ss:$16 sps:$4 sm:$0xff]   ;;  %v6652_v16 = vld [vmem:[#allocation8 + $0x460] ss:$16 sps:$4 sm:$0xff]   ;;  %v6714_v0 = vld [vmem:[#allocation8 + $0x5a4] ss:$16 sps:$4 sm:$0xff]  }
 0x4c9   :  { %4808 = vmatpush1.bf16.msra.mxu1 %v6586_v41  ;;  %4972 = vmatpush1.bf16.msra.mxu0 %v6589_v42  ;;  %v6655_v41 = vld [vmem:[#allocation8 + $0x468] ss:$16 sps:$4 sm:$0xff]   ;;  %v6660_v42 = vld [vmem:[#allocation8 + $0x484] ss:$16 sps:$4 sm:$0xff]  }
 0x4ca   :  { %4809 = vmatprep.subr.bf16.mxu1 %v6594_v17  ;;  %4973 = vmatprep.subr.bf16.mxu0 %v6597_v50  ;;  %v6663_v17 = vld [vmem:[#allocation8 + $0x48c] ss:$16 sps:$4 sm:$0xff]   ;;  %v6658_v50 = vld [vmem:[#allocation8 + $0x480] ss:$16 sps:$4 sm:$0xff]  }
 0x4cd   :  { %4810 = vmatpush1.bf16.msra.mxu1 %v6592_v27  ;;  %4974 = vmatpush1.bf16.msra.mxu0 %v6595_v12  ;;  %v6661_v27 = vld [vmem:[#allocation8 + $0x488] ss:$16 sps:$4 sm:$0xff]   ;;  %v6666_v12 = vld [vmem:[#allocation8 + $0x4a4] ss:$16 sps:$4 sm:$0xff]  }
 0x4ce   :  { %4811 = vmatprep.subr.bf16.mxu1 %v6600_v47  ;;  %4975 = vmatprep.subr.bf16.mxu0 %v6603_v43  ;;  %v6669_v47 = vld [vmem:[#allocation8 + $0x4ac] ss:$16 sps:$4 sm:$0xff]   ;;  %v6664_v43 = vld [vmem:[#allocation8 + $0x4a0] ss:$16 sps:$4 sm:$0xff]  }
 0x4d1   :  { %4812 = vmatpush1.bf16.msra.mxu1 %v6598_v51  ;;  %4976 = vmatpush1.bf16.msra.mxu0 %v6601_v58  ;;  %v6667_v51 = vld [vmem:[#allocation8 + $0x4a8] ss:$16 sps:$4 sm:$0xff]   ;;  %v6672_v58 = vld [vmem:[#allocation8 + $0x4c4] ss:$16 sps:$4 sm:$0xff]  }
 0x4d2   :  { %4813 = vmatprep.subr.bf16.mxu1 %v6606_v3  ;;  %4977 = vmatprep.subr.bf16.mxu0 %v6609_v4  ;;  %v6675_v3 = vld [vmem:[#allocation8 + $0x4cc] ss:$16 sps:$4 sm:$0xff]   ;;  %v6670_v4 = vld [vmem:[#allocation8 + $0x4c0] ss:$16 sps:$4 sm:$0xff]  }
 0x4d5   :  { %4814 = vmatpush1.bf16.msra.mxu1 %v6604_v7  ;;  %4978 = vmatpush1.bf16.msra.mxu0 %v6607_v13  ;;  %v6673_v7 = vld [vmem:[#allocation8 + $0x4c8] ss:$16 sps:$4 sm:$0xff]   ;;  %v6678_v13 = vld [vmem:[#allocation8 + $0x4e4] ss:$16 sps:$4 sm:$0xff]  }
 0x4d6   :  { %4815 = vmatprep.subr.bf16.mxu1 %v6612_v46  ;;  %4979 = vmatprep.subr.bf16.mxu0 %v6615_v63  ;;  %v6681_v46 = vld [vmem:[#allocation8 + $0x4ec] ss:$16 sps:$4 sm:$0xff]   ;;  %v6676_v63 = vld [vmem:[#allocation8 + $0x4e0] ss:$16 sps:$4 sm:$0xff]  }
 0x4d9   :  { %4816 = vmatpush1.bf16.msra.mxu1 %v6610_v29  ;;  %4980 = vmatpush1.bf16.msra.mxu0 %v6613_v33  ;;  %v6679_v29 = vld [vmem:[#allocation8 + $0x4e8] ss:$16 sps:$4 sm:$0xff]   ;;  %v6684_v33 = vld [vmem:[#allocation8 + $0x504] ss:$16 sps:$4 sm:$0xff]  }
 0x4da   :  { %4817 = vmatprep.subr.bf16.mxu1 %v6618_v26  ;;  %4981 = vmatprep.subr.bf16.mxu0 %v6621_v10  ;;  %v6687_v26 = vld [vmem:[#allocation8 + $0x50c] ss:$16 sps:$4 sm:$0xff]   ;;  %v6682_v10 = vld [vmem:[#allocation8 + $0x500] ss:$16 sps:$4 sm:$0xff]  }
 0x4dd   :  { %4818 = vmatpush1.bf16.msra.mxu1 %v6616_v55  ;;  %4982 = vmatpush1.bf16.msra.mxu0 %v6619_v60  ;;  %v6690_v55 = vld [vmem:[#allocation8 + $0x524] ss:$16 sps:$4 sm:$0xff]   ;;  %v6693_v60 = vld [vmem:[#allocation8 + $0x52c] ss:$16 sps:$4 sm:$0xff]  }
 0x4de   :  { %4819 = vmatprep.subr.bf16.mxu1 %v6624_v52  ;;  %4983 = vmatprep.subr.bf16.mxu0 %v6627_v32  ;;  %v6691_v52 = vld [vmem:[#allocation8 + $0x528] ss:$16 sps:$4 sm:$0xff]   ;;  %v6696_v32 = vld [vmem:[#allocation8 + $0x544] ss:$16 sps:$4 sm:$0xff]  }
 0x4e1   :  { %4820 = vmatpush1.bf16.msra.mxu1 %v6622_v14  ;;  %4984 = vmatpush1.bf16.msra.mxu0 %v6625_v28  ;;  %v6694_v14 = vld [vmem:[#allocation8 + $0x540] ss:$16 sps:$4 sm:$0xff]   ;;  %v6697_v28 = vld [vmem:[#allocation8 + $0x548] ss:$16 sps:$4 sm:$0xff]  }
 0x4e2   :  { %4821 = vmatprep.subr.bf16.mxu1 %v6630_v53  ;;  %4985 = vmatprep.subr.bf16.mxu0 %v6633_v11  ;;  %v6705_v53 = vld [vmem:[#allocation8 + $0x56c] ss:$16 sps:$4 sm:$0xff]   ;;  %v6700_v11 = vld [vmem:[#allocation8 + $0x560] ss:$16 sps:$4 sm:$0xff]  }
 0x4e5   :  { %4822 = vmatpush1.bf16.msra.mxu1 %v6628_v22  ;;  %4986 = vmatpush1.bf16.msra.mxu0 %v6631_v34  ;;  %v6708_v22 = vld [vmem:[#allocation8 + $0x584] ss:$16 sps:$4 sm:$0xff]   ;;  %v6711_v34 = vld [vmem:[#allocation8 + $0x58c] ss:$16 sps:$4 sm:$0xff]  }
 0x4e6   :  { %4832 = vmatprep.subr.bf16.mxu1 %v6636_v56  ;;  %4996 = vmatprep.subr.bf16.mxu0 %v6639_v38  ;;  %v2669_v56 = vsub.s32 4, %v8599_v54  ;;  %v6709_v38 = vld [vmem:[#allocation8 + $0x588] ss:$16 sps:$4 sm:$0xff]  }
 0x4e8   :  { %4824 = vmatmul.mubr.bf16.vlgmr.msra.gmra.mrb[20].mxu1 %v3185_v2  ;;  %4988 = vmatmul.mubr.bf16.vlgmr.msra.gmra.mrb[72].mxu0 %v3185_v2  ;;  %v2681_v2 = vsub.s32 7, %v8599_v54 }
 0x4e9   :  { %4833 = vmatpush1.bf16.msra.mxu1 %v6634_v6  ;;  %4864 = vmatprep.mubr.bf16.mxu1 %v3188_v36  ;;  %v6717_v6 = vld [vmem:[#allocation8 + $0x5ac] ss:$16 sps:$4 sm:$0xff]  }
 0x4ea   :  { %4997 = vmatpush1.bf16.msra.mxu0 %v6637_v23  ;;  %5028 = vmatprep.mubr.bf16.mxu0 %v3188_v36  ;;  %v6712_v23 = vld [vmem:[#allocation8 + $0x5a0] ss:$16 sps:$4 sm:$0xff]   ;;  %v2670_v36 = vrot.slane %v8601_v40, %v2669_v56  ;;  %v6783_v56 = vld [vmem:[#allocation8 + $0x70c] ss:$16 sps:$4 sm:$0xff]  }
 0x4eb   :  { %4834 = vmatprep.subr.bf16.mxu1 %v6642_v19  ;;  %4998 = vmatprep.subr.bf16.mxu0 %v6645_v30  ;;  %v6715_v19 = vld [vmem:[#allocation8 + $0x5a8] ss:$16 sps:$4 sm:$0xff]   ;;  %v6720_v30 = vld [vmem:[#allocation8 + $0x5c4] ss:$16 sps:$4 sm:$0xff]  }
 0x4ed   :  { %4835 = vmatpush1.bf16.msra.mxu1 %v6640_v49  ;;  %v6723_v49 = vld [vmem:[#allocation8 + $0x5cc] ss:$16 sps:$4 sm:$0xff]  }
 0x4ee   :  { %4999 = vmatpush1.bf16.msra.mxu0 %v6643_v37  ;;  %4836 = vmatprep.subr.bf16.mxu1 %v6648_v57  ;;  %v2682_v37 = vrot.slane %v8601_v40, %v2681_v2  ;;  %v6718_v57 = vld [vmem:[#allocation8 + $0x5c0] ss:$16 sps:$4 sm:$0xff]   ;;  %v6789_v2 = vld [vmem:[#allocation8 + $0x72c] ss:$16 sps:$4 sm:$0xff]  }
 0x4ef   :  { %5000 = vmatprep.subr.bf16.mxu0 %v6651_v44  ;;  %v3128_v44 = vadd.f32 %v8619_v25, %v2670_v36  ;;  %v6730_v25 = vld [vmem:[#allocation8 + $0x600] ss:$16 sps:$4 sm:$0xff]   ;;  %v6787_v36 = vld [vmem:[#allocation8 + $0x728] ss:$16 sps:$4 sm:$0xff]  }
 0x4f1   :  { %4837 = vmatpush1.bf16.msra.mxu1 %v6646_v45  ;;  %v6721_v45 = vld [vmem:[#allocation8 + $0x5c8] ss:$16 sps:$4 sm:$0xff]  }
 0x4f2   :  { %5001 = vmatpush1.bf16.msra.mxu0 %v6649_v31  ;;  %4838 = vmatprep.subr.bf16.mxu1 %v6654_v24  ;;  %v6726_v31 = vld [vmem:[#allocation8 + $0x5e4] ss:$16 sps:$4 sm:$0xff]   ;;  %v6729_v24 = vld [vmem:[#allocation8 + $0x5ec] ss:$16 sps:$4 sm:$0xff]  }
 0x4f3   :  { %5002 = vmatprep.subr.bf16.mxu0 %v6657_v18  ;;  %v3171_v18 = vadd.f32 %v8625_v59, %v2682_v37  ;;  %v6741_v59 = vld [vmem:[#allocation8 + $0x62c] ss:$16 sps:$4 sm:$0xff]   ;;  %v6793_v37 = vld [vmem:[#allocation8 + $0x748] ss:$16 sps:$4 sm:$0xff]  }
 0x4f5   :  { %4839 = vmatpush1.bf16.msra.mxu1 %v6652_v16  ;;  %v6724_v16 = vld [vmem:[#allocation8 + $0x5e0] ss:$16 sps:$4 sm:$0xff]  }
 0x4f6   :  { %5003 = vmatpush1.bf16.msra.mxu0 %v6655_v41  ;;  %4840 = vmatprep.subr.bf16.mxu1 %v6660_v42  ;;  %v3179_v41 = vmax.f32 %v3128_v44, 0.0  ;;  %v6727_v42 = vld [vmem:[#allocation8 + $0x5e8] ss:$16 sps:$4 sm:$0xff]   ;;  %v6801_v44 = vld [vmem:[#allocation8 + $0x76c] ss:$16 sps:$4 sm:$0xff]  }
 0x4f7   :  { %5004 = vmatprep.subr.bf16.mxu0 %v6663_v17  ;;  %v6732_v17 = vld [vmem:[#allocation8 + $0x604] ss:$16 sps:$4 sm:$0xff]  }
 0x4f9   :  { %4841 = vmatpush1.bf16.msra.mxu1 %v6658_v50  ;;  %v6735_v50 = vld [vmem:[#allocation8 + $0x60c] ss:$16 sps:$4 sm:$0xff]  }
 0x4fa   :  { %5005 = vmatpush1.bf16.msra.mxu0 %v6661_v27  ;;  %4842 = vmatprep.subr.bf16.mxu1 %v6666_v12  ;;  %v3182_v27 = vmax.f32 %v3171_v18, 0.0  ;;  %v3187_v12 = vpack.c.bf16 %v3179_v41, %v3179_v41  ;;  %v6807_v18 = vld [vmem:[#allocation8 + $0x78c] ss:$16 sps:$4 sm:$0xff]   ;;  %v2677_v41 = vsub.s32 6, %v8599_v54 }
 0x4fb   :  { %5006 = vmatprep.subr.bf16.mxu0 %v6669_v47  ;;  %v6733_v47 = vld [vmem:[#allocation8 + $0x608] ss:$16 sps:$4 sm:$0xff]  }
 0x4fd   :  { %4843 = vmatpush1.bf16.msra.mxu1 %v6664_v43  ;;  %v6738_v43 = vld [vmem:[#allocation8 + $0x624] ss:$16 sps:$4 sm:$0xff]  }
 0x4fe   :  { %5007 = vmatpush1.bf16.msra.mxu0 %v6667_v51  ;;  %4844 = vmatprep.subr.bf16.mxu1 %v6672_v58  ;;  %v3190_v51 = vpack.c.bf16 %v3182_v27, %v3182_v27  ;;  %v6736_v58 = vld [vmem:[#allocation8 + $0x620] ss:$16 sps:$4 sm:$0xff]  }
 0x4ff   :  { %5008 = vmatprep.subr.bf16.mxu0 %v6675_v3  ;;  %v6739_v3 = vld [vmem:[#allocation8 + $0x628] ss:$16 sps:$4 sm:$0xff]   ;;  %v6808_v27 = vld [vmem:[#allocation8 + $0x7a0] ss:$16 sps:$4 sm:$0xff]  }
 0x501   :  { %4845 = vmatpush1.bf16.msra.mxu1 %v6670_v4  ;;  %v6744_v4 = vld [vmem:[#allocation8 + $0x644] ss:$16 sps:$4 sm:$0xff]  }
 0x502   :  { %5009 = vmatpush1.bf16.msra.mxu0 %v6673_v7  ;;  %4846 = vmatprep.subr.bf16.mxu1 %v6678_v13  ;;  %v6747_v7 = vld [vmem:[#allocation8 + $0x64c] ss:$16 sps:$4 sm:$0xff]   ;;  %v6742_v13 = vld [vmem:[#allocation8 + $0x640] ss:$16 sps:$4 sm:$0xff]  }
 0x503   :  { %5010 = vmatprep.subr.bf16.mxu0 %v6681_v46  ;;  %v6745_v46 = vld [vmem:[#allocation8 + $0x648] ss:$16 sps:$4 sm:$0xff]  }
 0x505   :  { %4847 = vmatpush1.bf16.msra.mxu1 %v6676_v63  ;;  %v6750_v63 = vld [vmem:[#allocation8 + $0x664] ss:$16 sps:$4 sm:$0xff]  }
 0x506   :  { %5011 = vmatpush1.bf16.msra.mxu0 %v6679_v29  ;;  %4848 = vmatprep.subr.bf16.mxu1 %v6684_v33  ;;  %v6753_v29 = vld [vmem:[#allocation8 + $0x66c] ss:$16 sps:$4 sm:$0xff]   ;;  %v6748_v33 = vld [vmem:[#allocation8 + $0x660] ss:$16 sps:$4 sm:$0xff]  }
 0x507   :  { %5012 = vmatprep.subr.bf16.mxu0 %v6687_v26  ;;  %v6751_v26 = vld [vmem:[#allocation8 + $0x668] ss:$16 sps:$4 sm:$0xff]  }
 0x509   :  { %4849 = vmatpush1.bf16.msra.mxu1 %v6682_v10  ;;  %v6756_v10 = vld [vmem:[#allocation8 + $0x684] ss:$16 sps:$4 sm:$0xff]  }
 0x50a   :  { %5013 = vmatpush1.bf16.msra.mxu0 %v6685_v5  ;;  %4850 = vmatprep.subr.bf16.mxu1 %v6690_v55  ;;  %v6759_v5 = vld [vmem:[#allocation8 + $0x68c] ss:$16 sps:$4 sm:$0xff]   ;;  %v6754_v55 = vld [vmem:[#allocation8 + $0x680] ss:$16 sps:$4 sm:$0xff]  }
 0x50b   :  { %5014 = vmatprep.subr.bf16.mxu0 %v6693_v60  ;;  %v6757_v60 = vld [vmem:[#allocation8 + $0x688] ss:$16 sps:$4 sm:$0xff]  }
 0x50d   :  { %4851 = vmatpush1.bf16.msra.mxu1 %v6688_v9  ;;  %v6762_v9 = vld [vmem:[#allocation8 + $0x6a4] ss:$16 sps:$4 sm:$0xff]  }
 0x50e   :  { %5015 = vmatpush1.bf16.msra.mxu0 %v6691_v52  ;;  %4852 = vmatprep.subr.bf16.mxu1 %v6696_v32  ;;  %v6765_v52 = vld [vmem:[#allocation8 + $0x6ac] ss:$16 sps:$4 sm:$0xff]   ;;  %v6760_v32 = vld [vmem:[#allocation8 + $0x6a0] ss:$16 sps:$4 sm:$0xff]  }
 0x50f   :  { %5016 = vmatprep.subr.bf16.mxu0 %v6699_v20  ;;  %v6763_v20 = vld [vmem:[#allocation8 + $0x6a8] ss:$16 sps:$4 sm:$0xff]  }
 0x511   :  { %4853 = vmatpush1.bf16.msra.mxu1 %v6694_v14  ;;  %v6768_v14 = vld [vmem:[#allocation8 + $0x6c4] ss:$16 sps:$4 sm:$0xff]  }
 0x512   :  { %5017 = vmatpush1.bf16.msra.mxu0 %v6697_v28  ;;  %4854 = vmatprep.subr.bf16.mxu1 %v6702_v35  ;;  %v6771_v28 = vld [vmem:[#allocation8 + $0x6cc] ss:$16 sps:$4 sm:$0xff]   ;;  %v6766_v35 = vld [vmem:[#allocation8 + $0x6c0] ss:$16 sps:$4 sm:$0xff]  }
 0x513   :  { %5018 = vmatprep.subr.bf16.mxu0 %v6705_v53  ;;  %v6769_v53 = vld [vmem:[#allocation8 + $0x6c8] ss:$16 sps:$4 sm:$0xff]  }
 0x515   :  { %4855 = vmatpush1.bf16.msra.mxu1 %v6700_v11  ;;  %v6774_v11 = vld [vmem:[#allocation8 + $0x6e4] ss:$16 sps:$4 sm:$0xff]  }
 0x516   :  { %5019 = vmatpush1.bf16.msra.mxu0 %v6703_v61  ;;  %4856 = vmatprep.subr.bf16.mxu1 %v6708_v22  ;;  %v6777_v61 = vld [vmem:[#allocation8 + $0x6ec] ss:$16 sps:$4 sm:$0xff]   ;;  %v6772_v22 = vld [vmem:[#allocation8 + $0x6e0] ss:$16 sps:$4 sm:$0xff]  }
 0x517   :  { %5020 = vmatprep.subr.bf16.mxu0 %v6711_v34  ;;  %v6775_v34 = vld [vmem:[#allocation8 + $0x6e8] ss:$16 sps:$4 sm:$0xff]  }
 0x519   :  { %4857 = vmatpush1.bf16.msra.mxu1 %v6706_v1  ;;  %v6780_v1 = vld [vmem:[#allocation8 + $0x704] ss:$16 sps:$4 sm:$0xff]  }
 0x51a   :  { %5021 = vmatpush1.bf16.msra.mxu0 %v6709_v38  ;;  %4858 = vmatprep.subr.bf16.mxu1 %v6714_v0  ;;  %v6778_v38 = vld [vmem:[#allocation8 + $0x700] ss:$16 sps:$4 sm:$0xff]   ;;  %v6781_v0 = vld [vmem:[#allocation8 + $0x708] ss:$16 sps:$4 sm:$0xff]  }
 0x51b   :  { %5022 = vmatprep.subr.bf16.mxu0 %v6717_v6  ;;  %v6786_v6 = vld [vmem:[#allocation8 + $0x724] ss:$16 sps:$4 sm:$0xff]  }
 0x51d   :  { %4859 = vmatpush1.bf16.msra.mxu1 %v6712_v23  ;;  %v6784_v23 = vld [vmem:[#allocation8 + $0x720] ss:$16 sps:$4 sm:$0xff]  }
 0x51e   :  { %5023 = vmatpush1.bf16.msra.mxu0 %v6715_v19  ;;  %4860 = vmatprep.subr.bf16.mxu1 %v6720_v30  ;;  %v6792_v19 = vld [vmem:[#allocation8 + $0x744] ss:$16 sps:$4 sm:$0xff]   ;;  %v6795_v30 = vld [vmem:[#allocation8 + $0x74c] ss:$16 sps:$4 sm:$0xff]  }
 0x51f   :  { %5024 = vmatprep.subr.bf16.mxu0 %v6723_v49  ;;  %v6790_v49 = vld [vmem:[#allocation8 + $0x740] ss:$16 sps:$4 sm:$0xff]  }
 0x521   :  { %4861 = vmatpush1.bf16.msra.mxu1 %v6718_v57  ;;  %v6798_v57 = vld [vmem:[#allocation8 + $0x764] ss:$16 sps:$4 sm:$0xff]  }
 0x522   :  { %5025 = vmatpush1.bf16.msra.mxu0 %v6721_v45  ;;  %4862 = vmatprep.subr.bf16.mxu1 %v6726_v31  ;;  %v6796_v45 = vld [vmem:[#allocation8 + $0x760] ss:$16 sps:$4 sm:$0xff]   ;;  %v6799_v31 = vld [vmem:[#allocation8 + $0x768] ss:$16 sps:$4 sm:$0xff]  }
 0x523   :  { %5026 = vmatprep.subr.bf16.mxu0 %v6729_v24  ;;  %v6804_v24 = vld [vmem:[#allocation8 + $0x784] ss:$16 sps:$4 sm:$0xff]  }
 0x525   :  { %4863 = vmatpush1.bf16.msra.mxu1 %v6724_v16  ;;  %v6802_v16 = vld [vmem:[#allocation8 + $0x780] ss:$16 sps:$4 sm:$0xff]  }
 0x526   :  { %5027 = vmatpush1.bf16.msra.mxu0 %v6727_v42  ;;  %4873 = vmatprep.subr.bf16.mxu1 %v6732_v17  ;;  %v6805_v42 = vld [vmem:[#allocation8 + $0x788] ss:$16 sps:$4 sm:$0xff]   ;;  %v6810_v17 = vld [vmem:[#allocation8 + $0x7a4] ss:$16 sps:$4 sm:$0xff]  }
 0x527   :  { %5037 = vmatprep.subr.bf16.mxu0 %v6735_v50  ;;  %v6813_v50 = vld [vmem:[#allocation8 + $0x7ac] ss:$16 sps:$4 sm:$0xff]  }
 0x528   :  { %4865 = vmatmul.mubr.bf16.vlgmr.msra.gmra.mrb[20].mxu1 %v3187_v12 }
 0x529   :  { %5029 = vmatmul.mubr.bf16.vlgmr.msra.gmra.mrb[72].mxu0 %v3187_v12  ;;  %4874 = vmatpush1.bf16.msra.mxu1 %v6730_v25  ;;  %v2678_v25 = vrot.slane %v8601_v40, %v2677_v41  ;;  %v6811_v12 = vld [vmem:[#allocation8 + $0x7a8] ss:$16 sps:$4 sm:$0xff]   ;;  %v6888_v41 = vld [vmem:[#allocation8 + $0x94c] ss:$16 sps:$4 sm:$0xff]  }
 0x52a   :  { %4905 = vmatprep.mubr.bf16.mxu1 %v3190_v51  ;;  %5038 = vmatpush1.bf16.msra.mxu0 %v6733_v47  ;;  %v6816_v47 = vld [vmem:[#allocation8 + $0x7c4] ss:$16 sps:$4 sm:$0xff]   ;;  %v6823_v40 = vld [vmem:[#allocation8 + $0x7e8] ss:$16 sps:$4 sm:$0xff]  }
 0x52b   :  { %5069 = vmatprep.mubr.bf16.mxu0 %v3190_v51  ;;  %4875 = vmatprep.subr.bf16.mxu1 %v6738_v43  ;;  %v6819_v43 = vld [vmem:[#allocation8 + $0x7cc] ss:$16 sps:$4 sm:$0xff]   ;;  %v6814_v51 = vld [vmem:[#allocation8 + $0x7c0] ss:$16 sps:$4 sm:$0xff]  }
 0x52c   :  { %5039 = vmatprep.subr.bf16.mxu0 %v6741_v59  ;;  %v3169_v59 = vadd.f32 %v8621_v62, %v2678_v25  ;;  %v6829_v62 = vld [vmem:[#allocation8 + $0x800] ss:$16 sps:$4 sm:$0xff]   ;;  %v6897_v25 = vld [vmem:[#allocation8 + $0x964] ss:$16 sps:$4 sm:$0xff]  }
 0x52d   :  { %4876 = vmatpush1.bf16.msra.mxu1 %v6736_v58  ;;  %v6817_v58 = vld [vmem:[#allocation8 + $0x7c8] ss:$16 sps:$4 sm:$0xff]  }
 0x52e   :  { %5040 = vmatpush1.bf16.msra.mxu0 %v6739_v3  ;;  %4877 = vmatprep.subr.bf16.mxu1 %v6744_v4  ;;  %v6822_v3 = vld [vmem:[#allocation8 + $0x7e4] ss:$16 sps:$4 sm:$0xff]   ;;  %v6825_v4 = vld [vmem:[#allocation8 + $0x7ec] ss:$16 sps:$4 sm:$0xff]  }
 0x52f   :  { %5041 = vmatprep.subr.bf16.mxu0 %v6747_v7  ;;  %v6820_v7 = vld [vmem:[#allocation8 + $0x7e0] ss:$16 sps:$4 sm:$0xff]  }
 0x531   :  { %4878 = vmatpush1.bf16.msra.mxu1 %v6742_v13  ;;  %v3181_v13 = vmax.f32 %v3169_v59, 0.0  ;;  %v6898_v59 = vld [vmem:[#allocation8 + $0x988] ss:$16 sps:$4 sm:$0xff]  }
 0x532   :  { %5042 = vmatpush1.bf16.msra.mxu0 %v6745_v46  ;;  %4879 = vmatprep.subr.bf16.mxu1 %v6750_v63  ;;  %v6828_v46 = vld [vmem:[#allocation8 + $0x80c] ss:$16 sps:$4 sm:$0xff]   ;;  %v6831_v63 = vld [vmem:[#allocation8 + $0x804] ss:$16 sps:$4 sm:$0xff]  }
 0x533   :  { %5043 = vmatprep.subr.bf16.mxu0 %v6753_v29  ;;  %v6826_v29 = vld [vmem:[#allocation8 + $0x808] ss:$16 sps:$4 sm:$0xff]  }
 0x535   :  { %4880 = vmatpush1.bf16.msra.mxu1 %v6748_v33  ;;  %v3189_v33 = vpack.c.bf16 %v3181_v13, %v3181_v13  ;;  %v6907_v13 = vld [vmem:[#allocation8 + $0x9a0] ss:$16 sps:$4 sm:$0xff]  }
 0x536   :  { %5044 = vmatpush1.bf16.msra.mxu0 %v6751_v26  ;;  %4881 = vmatprep.subr.bf16.mxu1 %v6756_v10  ;;  %v6834_v26 = vld [vmem:[#allocation8 + $0x82c] ss:$16 sps:$4 sm:$0xff]   ;;  %v6837_v10 = vld [vmem:[#allocation8 + $0x824] ss:$16 sps:$4 sm:$0xff]  }
 0x537   :  { %5045 = vmatprep.subr.bf16.mxu0 %v6759_v5  ;;  %v6832_v5 = vld [vmem:[#allocation8 + $0x828] ss:$16 sps:$4 sm:$0xff]  }
 0x539   :  { %4882 = vmatpush1.bf16.msra.mxu1 %v6754_v55  ;;  %v6835_v55 = vld [vmem:[#allocation8 + $0x820] ss:$16 sps:$4 sm:$0xff]  }
 0x53a   :  { %5046 = vmatpush1.bf16.msra.mxu0 %v6757_v60  ;;  %4883 = vmatprep.subr.bf16.mxu1 %v6762_v9  ;;  %v6840_v60 = vld [vmem:[#allocation8 + $0x84c] ss:$16 sps:$4 sm:$0xff]   ;;  %v6843_v9 = vld [vmem:[#allocation8 + $0x844] ss:$16 sps:$4 sm:$0xff]  }
 0x53b   :  { %5047 = vmatprep.subr.bf16.mxu0 %v6765_v52  ;;  %v6838_v52 = vld [vmem:[#allocation8 + $0x848] ss:$16 sps:$4 sm:$0xff]  }
 0x53d   :  { %4884 = vmatpush1.bf16.msra.mxu1 %v6760_v32  ;;  %v6841_v32 = vld [vmem:[#allocation8 + $0x840] ss:$16 sps:$4 sm:$0xff]  }
 0x53e   :  { %5048 = vmatpush1.bf16.msra.mxu0 %v6763_v20  ;;  %4885 = vmatprep.subr.bf16.mxu1 %v6768_v14  ;;  %v6846_v20 = vld [vmem:[#allocation8 + $0x86c] ss:$16 sps:$4 sm:$0xff]   ;;  %v6849_v14 = vld [vmem:[#allocation8 + $0x864] ss:$16 sps:$4 sm:$0xff]  }
 0x53f   :  { %5049 = vmatprep.subr.bf16.mxu0 %v6771_v28  ;;  %v6844_v28 = vld [vmem:[#allocation8 + $0x868] ss:$16 sps:$4 sm:$0xff]  }
 0x541   :  { %4886 = vmatpush1.bf16.msra.mxu1 %v6766_v35  ;;  %v6847_v35 = vld [vmem:[#allocation8 + $0x860] ss:$16 sps:$4 sm:$0xff]  }
 0x542   :  { %5050 = vmatpush1.bf16.msra.mxu0 %v6769_v53  ;;  %4887 = vmatprep.subr.bf16.mxu1 %v6774_v11  ;;  %v6852_v53 = vld [vmem:[#allocation8 + $0x88c] ss:$16 sps:$4 sm:$0xff]   ;;  %v6855_v11 = vld [vmem:[#allocation8 + $0x884] ss:$16 sps:$4 sm:$0xff]  }
 0x543   :  { %5051 = vmatprep.subr.bf16.mxu0 %v6777_v61  ;;  %v6850_v61 = vld [vmem:[#allocation8 + $0x888] ss:$16 sps:$4 sm:$0xff]  }
 0x545   :  { %4888 = vmatpush1.bf16.msra.mxu1 %v6772_v22  ;;  %v6853_v22 = vld [vmem:[#allocation8 + $0x880] ss:$16 sps:$4 sm:$0xff]  }
 0x546   :  { %5052 = vmatpush1.bf16.msra.mxu0 %v6775_v34  ;;  %4889 = vmatprep.subr.bf16.mxu1 %v6780_v1  ;;  %v6858_v34 = vld [vmem:[#allocation8 + $0x8ac] ss:$16 sps:$4 sm:$0xff]   ;;  %v6861_v1 = vld [vmem:[#allocation8 + $0x8a4] ss:$16 sps:$4 sm:$0xff]  }
 0x547   :  { %5053 = vmatprep.subr.bf16.mxu0 %v6783_v56  ;;  %v6856_v56 = vld [vmem:[#allocation8 + $0x8a8] ss:$16 sps:$4 sm:$0xff]  }
 0x549   :  { %4890 = vmatpush1.bf16.msra.mxu1 %v6778_v38  ;;  %v6859_v38 = vld [vmem:[#allocation8 + $0x8a0] ss:$16 sps:$4 sm:$0xff]  }
 0x54a   :  { %5054 = vmatpush1.bf16.msra.mxu0 %v6781_v0  ;;  %4891 = vmatprep.subr.bf16.mxu1 %v6786_v6  ;;  %v6864_v0 = vld [vmem:[#allocation8 + $0x8cc] ss:$16 sps:$4 sm:$0xff]   ;;  %v6867_v6 = vld [vmem:[#allocation8 + $0x8c4] ss:$16 sps:$4 sm:$0xff]  }
 0x54b   :  { %5055 = vmatprep.subr.bf16.mxu0 %v6789_v2  ;;  %v6862_v2 = vld [vmem:[#allocation8 + $0x8c8] ss:$16 sps:$4 sm:$0xff]  }
 0x54d   :  { %4892 = vmatpush1.bf16.msra.mxu1 %v6784_v23  ;;  %v6865_v23 = vld [vmem:[#allocation8 + $0x8c0] ss:$16 sps:$4 sm:$0xff]  }
 0x54e   :  { %5056 = vmatpush1.bf16.msra.mxu0 %v6787_v36  ;;  %4893 = vmatprep.subr.bf16.mxu1 %v6792_v19  ;;  %v6870_v36 = vld [vmem:[#allocation8 + $0x8ec] ss:$16 sps:$4 sm:$0xff]   ;;  %v6873_v19 = vld [vmem:[#allocation8 + $0x8e4] ss:$16 sps:$4 sm:$0xff]  }
 0x54f   :  { %5057 = vmatprep.subr.bf16.mxu0 %v6795_v30  ;;  %v6868_v30 = vld [vmem:[#allocation8 + $0x8e8] ss:$16 sps:$4 sm:$0xff]  }
 0x551   :  { %4894 = vmatpush1.bf16.msra.mxu1 %v6790_v49  ;;  %v6871_v49 = vld [vmem:[#allocation8 + $0x8e0] ss:$16 sps:$4 sm:$0xff]  }
 0x552   :  { %5058 = vmatpush1.bf16.msra.mxu0 %v6793_v37  ;;  %4895 = vmatprep.subr.bf16.mxu1 %v6798_v57  ;;  %v6876_v37 = vld [vmem:[#allocation8 + $0x90c] ss:$16 sps:$4 sm:$0xff]   ;;  %v6879_v57 = vld [vmem:[#allocation8 + $0x904] ss:$16 sps:$4 sm:$0xff]  }
 0x553   :  { %5059 = vmatprep.subr.bf16.mxu0 %v6801_v44  ;;  %v6874_v44 = vld [vmem:[#allocation8 + $0x908] ss:$16 sps:$4 sm:$0xff]  }
 0x555   :  { %4896 = vmatpush1.bf16.msra.mxu1 %v6796_v45  ;;  %v6877_v45 = vld [vmem:[#allocation8 + $0x900] ss:$16 sps:$4 sm:$0xff]  }
 0x556   :  { %5060 = vmatpush1.bf16.msra.mxu0 %v6799_v31  ;;  %4897 = vmatprep.subr.bf16.mxu1 %v6804_v24  ;;  %v6882_v31 = vld [vmem:[#allocation8 + $0x92c] ss:$16 sps:$4 sm:$0xff]   ;;  %v6885_v24 = vld [vmem:[#allocation8 + $0x924] ss:$16 sps:$4 sm:$0xff]  }
 0x557   :  { %5061 = vmatprep.subr.bf16.mxu0 %v6807_v18  ;;  %v6880_v18 = vld [vmem:[#allocation8 + $0x928] ss:$16 sps:$4 sm:$0xff]  }
 0x559   :  { %4898 = vmatpush1.bf16.msra.mxu1 %v6802_v16  ;;  %v6883_v16 = vld [vmem:[#allocation8 + $0x920] ss:$16 sps:$4 sm:$0xff]  }
 0x55a   :  { %5062 = vmatpush1.bf16.msra.mxu0 %v6805_v42  ;;  %4899 = vmatprep.subr.bf16.mxu1 %v6810_v17  ;;  %v6891_v42 = vld [vmem:[#allocation8 + $0x944] ss:$16 sps:$4 sm:$0xff]   ;;  %v6886_v17 = vld [vmem:[#allocation8 + $0x948] ss:$16 sps:$4 sm:$0xff]  }
 0x55b   :  { %5063 = vmatprep.subr.bf16.mxu0 %v6813_v50  ;;  %v6889_v50 = vld [vmem:[#allocation8 + $0x940] ss:$16 sps:$4 sm:$0xff]  }
 0x55d   :  { %4900 = vmatpush1.bf16.msra.mxu1 %v6808_v27  ;;  %v6894_v27 = vld [vmem:[#allocation8 + $0x96c] ss:$16 sps:$4 sm:$0xff]  }
 0x55e   :  { %5064 = vmatpush1.bf16.msra.mxu0 %v6811_v12  ;;  %4901 = vmatprep.subr.bf16.mxu1 %v6816_v47  ;;  %v6892_v12 = vld [vmem:[#allocation8 + $0x968] ss:$16 sps:$4 sm:$0xff]   ;;  %v6895_v47 = vld [vmem:[#allocation8 + $0x960] ss:$16 sps:$4 sm:$0xff]  }
 0x55f   :  { %5065 = vmatprep.subr.bf16.mxu0 %v6819_v43  ;;  %v6900_v43 = vld [vmem:[#allocation8 + $0x98c] ss:$16 sps:$4 sm:$0xff]  }
 0x561   :  { %4902 = vmatpush1.bf16.msra.mxu1 %v6814_v51  ;;  %v6903_v51 = vld [vmem:[#allocation8 + $0x984] ss:$16 sps:$4 sm:$0xff]  }
 0x562   :  { %5066 = vmatpush1.bf16.msra.mxu0 %v6817_v58  ;;  %4903 = vmatprep.subr.bf16.mxu1 %v6822_v3  ;;  %v6901_v58 = vld [vmem:[#allocation8 + $0x980] ss:$16 sps:$4 sm:$0xff]   ;;  %v6906_v3 = vld [vmem:[#allocation8 + $0x9ac] ss:$16 sps:$4 sm:$0xff]  }
 0x563   :  { %5067 = vmatprep.subr.bf16.mxu0 %v6825_v4  ;;  %v6909_v4 = vld [vmem:[#allocation8 + $0x9a4] ss:$16 sps:$4 sm:$0xff]  }
 0x565   :  { %4904 = vmatpush1.bf16.msra.mxu1 %v6820_v7  ;;  %v6904_v7 = vld [vmem:[#allocation8 + $0x9a8] ss:$16 sps:$4 sm:$0xff]  }
 0x566   :  { %5068 = vmatpush1.bf16.msra.mxu0 %v6823_v40  ;;  %5310 = vmatprep.subr.bf16.mxu1 %v6828_v46  ;;  %v6912_v40 = vld [vmem:[#allocation8 + $0x9cc] ss:$16 sps:$4 sm:$0xff]   ;;  %v6915_v46 = vld [vmem:[#allocation8 + $0x9c4] ss:$16 sps:$4 sm:$0xff]  }
 0x567   :  { %5511 = vmatprep.subr.bf16.mxu0 %v6831_v63  ;;  %v6910_v63 = vld [vmem:[#allocation8 + $0x9c8] ss:$16 sps:$4 sm:$0xff]  }
 0x568   :  { %4906 = vmatmul.mubr.bf16.vlgmr.msra.gmra.mrb[20].mxu1 %v3189_v33 }
 0x569   :  { %5070 = vmatmul.mubr.bf16.vlgmr.msra.gmra.mrb[72].mxu0 %v3189_v33  ;;  %5311 = vmatpush1.bf16.msra.mxu1 %v6826_v29  ;;  %v6913_v29 = vld [vmem:[#allocation8 + $0x9c0] ss:$16 sps:$4 sm:$0xff]   ;;  %v6918_v33 = vld [vmem:[#allocation8 + $0x9ec] ss:$16 sps:$4 sm:$0xff]  }
 0x56a   :  { %5512 = vmatpush1.bf16.msra.mxu0 %v6829_v62  ;;  %5312 = vmatprep.subr.bf16.mxu1 %v6834_v26  ;;  %v6921_v62 = vld [vmem:[#allocation8 + $0x9e4] ss:$16 sps:$4 sm:$0xff]   ;;  %v6916_v26 = vld [vmem:[#allocation8 + $0x9e8] ss:$16 sps:$4 sm:$0xff]  }
 0x56b   :  { %5513 = vmatprep.subr.bf16.mxu0 %v6837_v10  ;;  %v6919_v10 = vld [vmem:[#allocation8 + $0x9e0] ss:$16 sps:$4 sm:$0xff]  }
 0x56d   :  { %5313 = vmatpush1.bf16.msra.mxu1 %v6832_v5  ;;  %v3448_v5 = vld [vmem:[#allocation5 + $0x4] ss:$8 sm:$0xf] }
 0x56e   :  { %5514 = vmatpush1.bf16.msra.mxu0 %v6835_v55  ;;  %5314 = vmatprep.subr.bf16.mxu1 %v6840_v60  ;;  %v3453_v55 = vrot.slane %v3448_v5, %v8604_v15  ;;  %v3461_v60 = vrot.slane %v3448_v5, %v2661_v21 }
 0x56f   :  { %5515 = vmatprep.subr.bf16.mxu0 %v6843_v9  ;;  %v3457_v9 = vrot.slane %v3448_v5, %v8607_v48 }
 0x571   :  { %5315 = vmatpush1.bf16.msra.mxu1 %v6838_v52  ;;  %v3465_v52 = vrot.slane %v3448_v5, %v2665_v8 }
 0x572   :  { %5516 = vmatpush1.bf16.msra.mxu0 %v6841_v32  ;;  %5316 = vmatprep.subr.bf16.mxu1 %v6846_v20 }
 0x573   :  { %5517 = vmatprep.subr.bf16.mxu0 %v6849_v14 }
 0x575   :  { %5317 = vmatpush1.bf16.msra.mxu1 %v6844_v28 }
 0x576   :  { %5518 = vmatpush1.bf16.msra.mxu0 %v6847_v35  ;;  %5318 = vmatprep.subr.bf16.mxu1 %v6852_v53 }
 0x577   :  { %5519 = vmatprep.subr.bf16.mxu0 %v6855_v11 }
 0x579   :  { %5319 = vmatpush1.bf16.msra.mxu1 %v6850_v61 }
 0x57a   :  { %5520 = vmatpush1.bf16.msra.mxu0 %v6853_v22  ;;  %5320 = vmatprep.subr.bf16.mxu1 %v6858_v34 }
 0x57b   :  { %5521 = vmatprep.subr.bf16.mxu0 %v6861_v1 }
 0x57d   :  { %5321 = vmatpush1.bf16.msra.mxu1 %v6856_v56 }
 0x57e   :  { %5522 = vmatpush1.bf16.msra.mxu0 %v6859_v38  ;;  %5322 = vmatprep.subr.bf16.mxu1 %v6864_v0 }
 0x57f   :  { %5523 = vmatprep.subr.bf16.mxu0 %v6867_v6 }
 0x581   :  { %5323 = vmatpush1.bf16.msra.mxu1 %v6862_v2 }
 0x582   :  { %5524 = vmatpush1.bf16.msra.mxu0 %v6865_v23  ;;  %5324 = vmatprep.subr.bf16.mxu1 %v6870_v36  ;;  %v5553_v36 = vld [vmem:[#allocation5 + $0x5] ss:$8 sm:$0x3] }
 0x583   :  { %5525 = vmatprep.subr.bf16.mxu0 %v6873_v19  ;;  %v5594_v19 = vld [vmem:[#allocation5 + $0x43] ss:$8 sm:$0x3] }
 0x585   :  { %5325 = vmatpush1.bf16.msra.mxu1 %v6868_v30 }
 0x586   :  { %5526 = vmatpush1.bf16.msra.mxu0 %v6871_v49  ;;  %5326 = vmatprep.subr.bf16.mxu1 %v6876_v37  ;;  %v5558_v49 = vrot.slane %v5553_v36, %v8604_v15  ;;  %v5573_v37 = vld [vmem:[#allocation5 + $0x42] ss:$8 sm:$0x3] }
 0x587   :  { %5527 = vmatprep.subr.bf16.mxu0 %v6879_v57 }
 0x589   :  { %5327 = vmatpush1.bf16.msra.mxu1 %v6874_v44 }
 0x58a   :  { %5528 = vmatpush1.bf16.msra.mxu0 %v6877_v45  ;;  %5328 = vmatprep.subr.bf16.mxu1 %v6882_v31  ;;  %v5562_v45 = vrot.slane %v5553_v36, %v8607_v48  ;;  %v5615_v31 = vld [vmem:[#allocation5 + $0x44] ss:$8 sm:$0x3] }
 0x58b   :  { %5529 = vmatprep.subr.bf16.mxu0 %v6885_v24 }
 0x58d   :  { %5329 = vmatpush1.bf16.msra.mxu1 %v6880_v18 }
 0x58e   :  { %5530 = vmatpush1.bf16.msra.mxu0 %v6883_v16  ;;  %5330 = vmatprep.subr.bf16.mxu1 %v6888_v41 }
 0x58f   :  { %5531 = vmatprep.subr.bf16.mxu0 %v6891_v42 }
 0x591   :  { %5331 = vmatpush1.bf16.msra.mxu1 %v6886_v17 }
 0x592   :  { %5532 = vmatpush1.bf16.msra.mxu0 %v6889_v50  ;;  %5332 = vmatprep.subr.bf16.mxu1 %v6894_v27 }
 0x593   :  { %5533 = vmatprep.subr.bf16.mxu0 %v6897_v25  ;;  %v5599_v25 = vrot.slane %v5594_v19, %v8604_v15 }
 0x595   :  { %5333 = vmatpush1.bf16.msra.mxu1 %v6892_v12  ;;  %v5578_v12 = vrot.slane %v5573_v37, %v8604_v15 }
 0x596   :  { %5534 = vmatpush1.bf16.msra.mxu0 %v6895_v47  ;;  %5334 = vmatprep.subr.bf16.mxu1 %v6900_v43  ;;  %v5620_v47 = vrot.slane %v5615_v31, %v8604_v15  ;;  %v5570_v15 = vand.u32 127, %v2651_v39 }
 0x597   :  { %5535 = vmatprep.subr.bf16.mxu0 %v6903_v51  ;;  %v5603_v51 = vrot.slane %v5594_v19, %v8607_v48 }
 0x598   :  { %vm5590_vm8 = vcmp.eq.s32.totalorder %v5570_v15, 0  ;;  %vm5611_vm9 = vcmp.eq.s32.totalorder %v5570_v15, 1  ;;  %vm5632_vm10 = vcmp.eq.s32.totalorder %v5570_v15, 2 }
 0x599   :  { %5335 = vmatpush1.bf16.msra.mxu1 %v6898_v59  ;;  %v5582_v59 = vrot.slane %v5573_v37, %v8607_v48 }
 0x59a   :  { %5536 = vmatpush1.bf16.msra.mxu0 %v6901_v58  ;;  %5336 = vmatprep.subr.bf16.mxu1 %v6906_v3  ;;  %v5624_v58 = vrot.slane %v5615_v31, %v8607_v48 }
 0x59b   :  { %5537 = vmatprep.subr.bf16.mxu0 %v6909_v4 }
 0x59d   :  { %5337 = vmatpush1.bf16.msra.mxu1 %v6904_v7 }
 0x59e   :  { %5538 = vmatpush1.bf16.msra.mxu0 %v6907_v13  ;;  %5338 = vmatprep.subr.bf16.mxu1 %v6912_v40 }
 0x59f   :  { %5539 = vmatprep.subr.bf16.mxu0 %v6915_v46 }
 0x5a1   :  { %5339 = vmatpush1.bf16.msra.mxu1 %v6910_v63 }
 0x5a2   :  { %5540 = vmatpush1.bf16.msra.mxu0 %v6913_v29  ;;  %5340 = vmatprep.subr.bf16.mxu1 %v6918_v33 }
 0x5a3   :  { %5541 = vmatprep.subr.bf16.mxu0 %v6921_v62 }
 0x5a5   :  { %5341 = vmatpush1.bf16.msra.mxu1 %v6916_v26 }
 0x5a6   :  { %5542 = vmatpush1.bf16.msra.mxu0 %v6919_v10  ;;  %v5571_v10 = vld [vmem:[#allocation5 + $0x6] ss:$0 sm:$0xff] }
 0x63b   :  { %v4907_v32 = vpop.f32.mrb[20].mxu1 }
 0x63c   :  { %v6295_v20 = vadd.f32 %v4907_v32, %v3453_v55  ;;  %v5071_v14 = vpop.f32.mrb[72].mxu0  ;;  %v4909_v28 = vpop.f32.mrb[21].mxu1 }
 0x63d   :  { %v6297_v35 = vadd.f32 %v5071_v14, %v3461_v60  ;;  %v6296_v53 = vadd.f32 %v4909_v28, %v3457_v9  ;;  %v5073_v11 = vpop.f32.mrb[73].mxu0  ;;  %v4911_v61 = vpop.f32.mrb[22].mxu1 }
 0x63e   :  { %v5078_v22 = vmax.f32 %v6295_v20, 0.0  ;;  %v6298_v34 = vadd.f32 %v5073_v11, %v3465_v52  ;;  %v5075_v1 = vpop.f32.mrb[74].mxu0  ;;  %v4912_v56 = vpop.f32.mrb[23].mxu1 }
 0x63f   :  { %v5080_v38 = vmax.f32 %v6297_v35, 0.0  ;;  %v5079_v0 = vmax.f32 %v6296_v53, 0.0  ;;  %v5076_v21 = vpop.f32.mrb[75].mxu0 }
 0x640   :  { %v5081_v6 = vmax.f32 %v6298_v34, 0.0  ;;  %v5082_v23 = vpack.c.bf16 %v5078_v22, %v5078_v22 }
 0x641   :  { %v5083_v2 = vpack.c.bf16 %v5079_v0, %v5079_v0  ;;  %v5084_v8 = vpack.c.bf16 %v5080_v38, %v5080_v38 }
 0x642   :  { %v5085_v54 = vpack.c.bf16 %v5081_v6, %v5081_v6 }
 0x643   :  { %5543 = vmatprep.mubr.bf16.mxu0 %v5083_v2 }
 0x644   :  { %5342 = vmatprep.mubr.bf16.mxu1 %v5085_v54  ;;  %5544 = vmatmul.mubr.bf16.vlgmr.msra.gmra.mrb[76].mxu0 %v5082_v23 }
 0x645   :  { %5343 = vmatmul.mubr.bf16.vlgmr.msra.gmra.mrb[24].mxu1 %v5084_v8 }
 0x717   :  { %v5545_v30 = vpop.f32.mrb[76].mxu0 }
 0x718   :  { %v5344_v57 = vpop.f32.mrb[24].mxu1  ;;  %v5547_v44 = vpop.f32.mrb[77].mxu0 }
 0x719   :  { %v5546_v24 = vadd.f32 %v5545_v30, %v5344_v57  ;;  %v5346_v18 = vpop.f32.mrb[25].mxu1  ;;  %v5549_v16 = vpop.f32.mrb[78].mxu0 }
 0x71a   :  { %v5548_v41 = vadd.f32 %v5547_v44, %v5346_v18  ;;  %v5348_v42 = vpop.f32.mrb[26].mxu1  ;;  %v5550_v17 = vpop.f32.mrb[79].mxu0 }
 0x71b   :  { %v5565_v50 = vadd.f32 %v5558_v49, %v5546_v24  ;;  %v5349_v27 = vpop.f32.mrb[27].mxu1 }
 0x71c   :  { %v5566_v43 = vadd.f32 %v5562_v45, %v5548_v41 }
 0x71d   :  { %v5567_v3 = vmax.f32 %v5565_v50, 0.0 }
 0x71e   :  { %v5568_v4 = vmax.f32 %v5566_v43, 0.0 }
 0x71f   :  { %v5606_v7 = vmul.f32 %v5599_v25, %v5567_v3  ;;  %v5585_v13 = vmul.f32 %v5578_v12, %v5567_v3  ;;  %v5627_v40 = vmul.f32 %v5620_v47, %v5567_v3 }
 0x720   :  { %v5607_v46 = vmul.f32 %v5603_v51, %v5568_v4  ;;  %v5586_v63 = vmul.f32 %v5582_v59, %v5568_v4  ;;  %v5628_v29 = vmul.f32 %v5624_v58, %v5568_v4 }
 0x722   :  { %v5608_v33 = vadd.f32 %v5607_v46, %v5606_v7  ;;  %v5587_v62 = vadd.f32 %v5586_v63, %v5585_v13  ;;  %v5629_v26 = vadd.f32 %v5628_v29, %v5627_v40 }
 0x724   :  { %5609 = vadd.xlane.f32.xlu1 %v5608_v33  ;;  %5588 = vadd.xlane.f32.xlu0 %v5587_v62 }
 0x728   :  { %5630 = vadd.xlane.f32.xlu0 %v5629_v26 }
 0x7b1   :  { %v5610_v48 = vpop.xlane.xlu1 %5609  ;;  %v5589_v5 = vpop.xlane.xlu0 %5588 }
 0x7b2   :  { %v5591_v55 = vsel %vm5590_vm8, %v5589_v5, 0.0  ;;  %v5612_v9 = vsel %vm5611_vm9, %v5610_v48, 0.0 }
 0x7b3   :  { %v5592_v60 = vadd.f32 %v5591_v55, %v5571_v10 }
 0x7b5   :  { %v5613_v52 = vadd.f32 %v5612_v9, %v5592_v60  ;;  %v5631_v32 = vpop.xlane.xlu0 %5630 }
 0x7b6   :  { %v5633_v20 = vsel %vm5632_vm10, %v5631_v32, 0.0 }
 0x7b7   :  { %v5634_v14 = vadd.f32 %v5633_v20, %v5613_v52 }
 0x7b9   :  { %5635 = vst [vmem:[#allocation10] sm:$0xff] %v5634_v14 }
 0x7ba   :  { %7049 = shalt.err (!%p7046_p8)
}
 0x7bb   :  { %s7050_s1 = scalar_lea.hbm %s8677_s6, 128 }
 0x7bc   :  { %p7051_p9 = scmp.ne.s32.totalorder %s8677_s6, %s7050_s1  ;;  %p7054_p10 = scmp.lt.u32.totalorder %s7050_s1, %s8677_s6 }
 0x7be   :  { %p7056_p11 = pnand %p7054_p10, %p7051_p9 }
 0x7c0   :  { %7059 = shalt.err (!%p7056_p11)
}
 0x7c1   :  { %5645 = dma.vmem_to_hbm [thread:$0]  %s5643_s8, 128, %s8677_s6, [#allocation4]  }
 0x7c2   :  { %7066 = dma.done.wait [#allocation4], 128  }
 0x7c3   :  { %7067 = vsyncadd [#allocation4], 4294967168 }
 0x7c4   :  { %5649 = vsyncpa [#allocation3], 1 }
 0x7c5   :  { %5650 = vsyncpa [#allocation6], 1 }
 0x7c6   :  { %5651 = vsyncpa [#allocation9], 1 }
 0x7c7   :  { %5652 = vsyncpa [#allocation4], 1 }

</bundles_post_ra>
